<compile_context>
chip_gen: v7x
topology: tpu7x:2x2x1
jax: 0.10.0
libtpu: 0.0.40
codegen_flags: <defaults>
</compile_context>

<pallas_src>
import jax
import jax.numpy as jnp
from jax import lax
from jax.experimental import pallas as pl
from jax.experimental.pallas import tpu as pltpu


def lstm_text_kernel(xe_ref, wih_ref, whh_ref, b_ref,
                     watt_ref, batt_ref, watt2_ref,
                     wmlp_ref, bmlp_ref,
                     out_ref,
                     xg_sc, hs_sc):
    """One batch block: LSTM recurrence + attention softmax pooling + MLP."""
    T, Bb, Dp = xe_ref.shape
    Hd = whh_ref.shape[0]

    # ---- hoisted input projection for all timesteps: one big bf16 MXU matmul
    xg = (jnp.dot(xe_ref[...].reshape(T * Bb, Dp), wih_ref[...],
                  preferred_element_type=jnp.float32)
          + b_ref[...])                                     # (T*Bb, 4*Hd), b folded in
    xg_sc[...] = xg.reshape(T, Bb, 4 * Hd).astype(xg_sc.dtype)

    # ---- serial recurrence: h/c live in vregs (fori_loop carry), only the
    # ---- h @ W_hh matmul + gate nonlinearity sit on the serial chain --------
    def step(t, carry):
        h, c = carry
        gates = (xg_sc[t].astype(jnp.float32)
                 + jnp.dot(h.astype(whh_ref.dtype), whh_ref[...],
                           preferred_element_type=jnp.float32))
        # gate columns are pre-permuted to [i, f, o, g]:
        s = jax.nn.sigmoid(gates[:, :3 * Hd])               # one contiguous EUP slab
        g = jnp.tanh(gates[:, 3 * Hd:])
        i = s[:, 0 * Hd:1 * Hd]
        f = s[:, 1 * Hd:2 * Hd]
        o = s[:, 2 * Hd:3 * Hd]
        c = f * c + i * g
        h = o * jnp.tanh(c)
        hs_sc[t] = h.astype(hs_sc.dtype)
        return (h, c)

    zeros = jnp.zeros((Bb, Hd), jnp.float32)
    unroll = True if T <= 16 else 8                          # bound vreg pressure at large T
    lax.fori_loop(0, T, step, (zeros, zeros), unroll=unroll)

    # ---- batched attention scoring (A padded to lane width) + softmax over
    # ---- time + unnormalized pooling + single reciprocal + MLP --------------
    hs = hs_sc[...]                                          # (T, Bb, Hd) bf16
    a = jnp.tanh(jnp.dot(hs.reshape(T * Bb, Hd), watt_ref[...],
                         preferred_element_type=jnp.float32)
                 + batt_ref[...])                            # (T*Bb, Ap) f32
    # scores via VPU multiply + lane reduce against the (1, Ap) score vector
    scores = jnp.sum(a * watt2_ref[...], axis=-1, keepdims=True)   # (T*Bb, 1)
    scores = scores.reshape(T, Bb, 1)
    m = jnp.max(scores, axis=0, keepdims=True)
    e = jnp.exp(scores - m)                                  # (T, Bb, 1)
    l = jnp.sum(e, axis=0)                                   # (Bb, 1)
    acc = jnp.sum(e * hs.astype(jnp.float32), axis=0)        # (Bb, Hd) unnormalized
    h_att = acc * pl.reciprocal(l, approx=True)              # EUP reciprocal
    # dropout == identity in eval mode
    out_ref[...] = (jnp.dot(h_att.astype(wmlp_ref.dtype), wmlp_ref[...],
                            preferred_element_type=jnp.float32)
                    + bmlp_ref[...])


def _reorder_gates(w):
    """Permute the last axis from PyTorch order [i, f, g, o] to [i, f, o, g]."""
    i, f, g, o = jnp.split(w, 4, axis=-1)
    return jnp.concatenate([i, f, o, g], axis=-1)


def _pad_axis(x, axis, multiple):
    """Zero-pad `axis` of x up to a multiple of `multiple` (numerically exact)."""
    pad = (-x.shape[axis]) % multiple
    if pad == 0:
        return x
    widths = [(0, 0)] * x.ndim
    widths[axis] = (0, pad)
    return jnp.pad(x, widths)


def _num_tensorcores():
    """Best-effort TensorCores-per-chip (2 on megacore parts, else 1)."""
    objs = []
    try:
        objs.append(pltpu.get_tpu_info())
    except Exception:
        pass
    try:
        objs.append(jax.devices()[0])
    except Exception:
        pass
    for obj in objs:
        for attr in ("num_cores", "core_count", "num_tensorcores",
                     "tensorcores_per_chip"):
            v = getattr(obj, attr, None)
            try:
                v = int(v)
            except (TypeError, ValueError):
                continue
            if v > 0:
                return v
    return 1


def lstm_text_forward(tokens, p, *, batch_block=None):
    # Embedding lookup is a gather: glue, stays in plain JAX.
    # TODO(synk): arbitrary-index embedding gather has no rectangular BlockSpec
    # equivalent; done outside the kernel.
    embed = _pad_axis(p["embed"], 1, 128)                    # D -> Dp lane-dense
    xe = jnp.transpose(embed[tokens], (1, 0, 2)).astype(jnp.bfloat16)  # (T, B, Dp)
    T, B, Dp = xe.shape
    Hd = p["w_hh"].shape[0]
    Hout = p["w_mlp"].shape[1]
    assert B % 8 == 0, "batch must be a multiple of 8 (sublane dense)"

    # ---- batch block: one grid step per TensorCore ---------------------------
    if batch_block is None:
        nc = _num_tensorcores()
        if nc > 1 and B % nc == 0 and (B // nc) % 8 == 0:
            bb = B // nc                                     # v7x megacore: 2 steps
        else:
            bb = B                                           # v5e/v6e: single step
    else:
        bb = batch_block
    assert B % bb == 0, "batch must be divisible by the batch block"

    # ---- weight prep: gate permutation, exact zero pads, bf16 MXU operands --
    w_ih = _pad_axis(_reorder_gates(p["w_ih"]), 0, 128).astype(jnp.bfloat16)  # (Dp, 4Hd)
    w_hh = _reorder_gates(p["w_hh"]).astype(jnp.bfloat16)                     # (Hd, 4Hd)
    b = _reorder_gates(p["b"]).astype(jnp.float32)                            # (1, 4Hd)
    w_att = _pad_axis(p["w_att"], 1, 128).astype(jnp.bfloat16)                # (Hd, Ap)
    b_att = _pad_axis(p["b_att"], 1, 128).astype(jnp.float32)                 # (1, Ap)
    w_att2 = _pad_axis(p["w_att2"], 0, 128).T.astype(jnp.float32)             # (1, Ap)
    w_mlp = p["w_mlp"].astype(jnp.bfloat16)                                   # (Hd, Hout)
    b_mlp = p["b_mlp"].astype(jnp.float32)                                    # (1, Hout)

    def full(x):  # whole-array block, identical for every grid step
        nd = x.ndim
        return pl.BlockSpec(x.shape, lambda i, _n=nd: (0,) * _n)

    return pl.pallas_call(
        lstm_text_kernel,
        out_shape=jax.ShapeDtypeStruct((B, Hout), jnp.float32),
        grid=(B // bb,),                                     # batch-parallel grid
        in_specs=[
            pl.BlockSpec((T, bb, Dp), lambda i: (0, i, 0)),  # xe batch block
            full(w_ih), full(w_hh), full(b),
            full(w_att), full(b_att), full(w_att2),
            full(w_mlp), full(b_mlp),
        ],
        out_specs=pl.BlockSpec((bb, Hout), lambda i: (i, 0)),
        scratch_shapes=[
            pltpu.VMEM((T, bb, 4 * Hd), jnp.bfloat16),       # precomputed input proj
            pltpu.VMEM((T, bb, Hd), jnp.bfloat16),           # all hidden states
        ],
        compiler_params=pltpu.CompilerParams(
            dimension_semantics=("parallel",),               # megacore split over batch
            vmem_limit_bytes=64 * 1024 * 1024,
        ),
    )(xe, w_ih, w_hh, b, w_att, b_att, w_att2, w_mlp, b_mlp)


def ref_forward(tokens, p):
    """Pure-JAX f32 reference replicating the PyTorch forward (use_att=True, eval)."""
    emb = p["embed"][tokens].astype(jnp.float32)             # (B, T, D)
    B, T, D = emb.shape
    Hd = p["w_hh"].shape[0]

    def cell(carry, x_t):
        h, c = carry
        gates = x_t @ p["w_ih"] + h @ p["w_hh"] + p["b"][0]  # PyTorch [i,f,g,o]
        i = jax.nn.sigmoid(gates[:, :Hd])
        f = jax.nn.sigmoid(gates[:, Hd:2 * Hd])
        g = jnp.tanh(gates[:, 2 * Hd:3 * Hd])
        o = jax.nn.sigmoid(gates[:, 3 * Hd:])
        c = f * c + i * g
        h = o * jnp.tanh(c)
        return (h, c), h

    xs = jnp.transpose(emb, (1, 0, 2))
    (_, _), hs = lax.scan(cell, (jnp.zeros((B, Hd)), jnp.zeros((B, Hd))), xs)
    hs = jnp.transpose(hs, (1, 0, 2))                        # (B, T, Hd)
    has = jnp.tanh(hs @ p["w_att"] + p["b_att"][0])
    at = jax.nn.softmax(has @ p["w_att2"], axis=1)           # (B, T, 1)
    h = jnp.sum(at * hs, axis=1)                             # (B, Hd)
    return h @ p["w_mlp"] + p["b_mlp"][0]


def make_params(key, V, D, Hd, A, Hout):
    ks = jax.random.split(key, 9)
    s = 0.1
    return {
        "embed":  jax.random.normal(ks[0], (V, D), jnp.float32) * s,
        # LSTM weights pre-transposed to (in, 4*Hd), PyTorch gate order [i,f,g,o]
        "w_ih":   jax.random.normal(ks[1], (D, 4 * Hd), jnp.float32) * s,
        "w_hh":   jax.random.normal(ks[2], (Hd, 4 * Hd), jnp.float32) * s,
        "b":      jax.random.normal(ks[3], (1, 4 * Hd), jnp.float32) * s,    # b_ih + b_hh
        "w_att":  jax.random.normal(ks[4], (Hd, A), jnp.float32) * s,
        "b_att":  jax.random.normal(ks[5], (1, A), jnp.float32) * s,
        "w_att2": jax.random.normal(ks[6], (A, 1), jnp.float32) * s,
        "w_mlp":  jax.random.normal(ks[7], (Hd, Hout), jnp.float32) * s,
        "b_mlp":  jax.random.normal(ks[8], (1, Hout), jnp.float32) * s,
    }


if __name__ == "__main__":
    # Small shapes consistent with the module (embed_num=V, d_embed=D, hidden Hd,
    # A=20 attention dim, use_att=True, dropout in eval mode).  B is a multiple
    # of 8 and Hd a multiple of 128; D=64 / A=20 exercise the exact zero-pad
    # to 128 lanes.
    B, T, V, D, Hd, A = 16, 8, 50, 64, 128, 20
    Hout = Hd // 2

    key = jax.random.PRNGKey(0)
    kp, kt = jax.random.split(key)
    params = make_params(kp, V, D, Hd, A, Hout)
    tokens = jax.random.randint(kt, (B, T), 0, V, dtype=jnp.int32)

    logit = jax.block_until_ready(lstm_text_forward(tokens, params))
    ref = jax.block_until_ready(ref_forward(tokens, params))

    assert logit.shape == (B, Hout)
    # Tolerance accounts for bf16 MXU operands / bf16 hs storage / approx
    # reciprocal vs the pure-f32 reference (typical max-abs-diff ~3e-3 here).
    assert jnp.allclose(logit, ref, atol=2e-2, rtol=2e-2), (logit, ref)
    print("KERNEL_OK")
</pallas_src>

<mosaic_0001>
module attributes {stable_mosaic.version = 11 : i64} {
  func.func @lstm_text_kernel(%arg0: i32, %arg1: memref<8x16x128xbf16, #tpu.memory_space<vmem>>, %arg2: memref<128x512xbf16, #tpu.memory_space<vmem>>, %arg3: memref<128x512xbf16, #tpu.memory_space<vmem>>, %arg4: memref<1x512xf32, #tpu.memory_space<vmem>>, %arg5: memref<128x128xbf16, #tpu.memory_space<vmem>>, %arg6: memref<1x128xf32, #tpu.memory_space<vmem>>, %arg7: memref<1x128xf32, #tpu.memory_space<vmem>>, %arg8: memref<128x64xbf16, #tpu.memory_space<vmem>>, %arg9: memref<1x64xf32, #tpu.memory_space<vmem>>, %arg10: memref<16x64xf32, #tpu.memory_space<vmem>>, %arg11: memref<8x16x512xbf16, #tpu.memory_space<vmem>>, %arg12: memref<8x16x128xbf16, #tpu.memory_space<vmem>>) attributes {dimension_semantics = [#tpu.dimension_semantics<parallel>], iteration_bounds = array<i64: 1>, scalar_prefetch = 0 : i64, scratch_operands = 2 : i64, tpu.core_type = #tpu.core_type<tc>, window_params = [{transform_indices = @transform_0, window_bounds = array<i64: 8, 16, 128>}, {pipeline_mode = #tpu.pipeline_mode<synchronous>, transform_indices = @transform_1, window_bounds = array<i64: 128, 512>}, {pipeline_mode = #tpu.pipeline_mode<synchronous>, transform_indices = @transform_2, window_bounds = array<i64: 128, 512>}, {pipeline_mode = #tpu.pipeline_mode<synchronous>, transform_indices = @transform_3, window_bounds = array<i64: 1, 512>}, {pipeline_mode = #tpu.pipeline_mode<synchronous>, transform_indices = @transform_4, window_bounds = array<i64: 128, 128>}, {pipeline_mode = #tpu.pipeline_mode<synchronous>, transform_indices = @transform_5, window_bounds = array<i64: 1, 128>}, {pipeline_mode = #tpu.pipeline_mode<synchronous>, transform_indices = @transform_6, window_bounds = array<i64: 1, 128>}, {pipeline_mode = #tpu.pipeline_mode<synchronous>, transform_indices = @transform_7, window_bounds = array<i64: 128, 64>}, {pipeline_mode = #tpu.pipeline_mode<synchronous>, transform_indices = @transform_8, window_bounds = array<i64: 1, 64>}, {transform_indices = @transform_9, window_bounds = array<i64: 16, 64>}]} {
    %c0 = arith.constant 0 : index
    %c0_0 = arith.constant 0 : index
    %c0_1 = arith.constant 0 : index
    %0 = vector.load %arg1[%c0, %c0_0, %c0_1] : memref<8x16x128xbf16, #tpu.memory_space<vmem>>, vector<8x16x128xbf16>
    %1 = vector.shape_cast %0 : vector<8x16x128xbf16> to vector<128x128xbf16>
    %c0_2 = arith.constant 0 : index
    %c0_3 = arith.constant 0 : index
    %2 = vector.load %arg2[%c0_2, %c0_3] : memref<128x512xbf16, #tpu.memory_space<vmem>>, vector<128x512xbf16>
    %cst = arith.constant dense<0.000000e+00> : vector<128x512xf32>
    %3 = tpu.matmul %1, %2, %cst {dimension_numbers = #tpu.dot_dimension_numbers<[1], [0], [0], [1], [0, 0, 1, 1], [], []>} : vector<128x128xbf16>, vector<128x512xbf16>, vector<128x512xf32> -> vector<128x512xf32>
    %c0_4 = arith.constant 0 : index
    %c0_5 = arith.constant 0 : index
    %4 = vector.load %arg4[%c0_4, %c0_5] : memref<1x512xf32, #tpu.memory_space<vmem>>, vector<1x512xf32>
    %5 = vector.broadcast %4 : vector<1x512xf32> to vector<128x512xf32>
    %6 = arith.addf %3, %5 : vector<128x512xf32>
    %7 = vector.shape_cast %6 : vector<128x512xf32> to vector<8x16x512xf32>
    %8 = arith.truncf %7 : vector<8x16x512xf32> to vector<8x16x512xbf16>
    %c0_6 = arith.constant 0 : index
    %c0_7 = arith.constant 0 : index
    %c0_8 = arith.constant 0 : index
    %9 = vector.load %arg11[%c0_6, %c0_7, %c0_8] : memref<8x16x512xbf16, #tpu.memory_space<vmem>>, vector<8x16x512xbf16>
    tpu.vector_store %arg11[%c0_6, %c0_7, %c0_8], %8 {strides = array<i32>} : memref<8x16x512xbf16, #tpu.memory_space<vmem>>, vector<8x16x512xbf16>,
    %cst_9 = arith.constant 0.000000e+00 : f32
    %10 = vector.broadcast %cst_9 : f32 to vector<16x128xf32>
    %c0_i32 = arith.constant 0 : i32
    %11 = arith.index_cast %c0_i32 : i32 to index
    %c0_10 = arith.constant 0 : index
    %c0_11 = arith.constant 0 : index
    %12 = vector.load %arg11[%11, %c0_10, %c0_11] : memref<8x16x512xbf16, #tpu.memory_space<vmem>>, vector<1x16x512xbf16>
    %13 = vector.shape_cast %12 : vector<1x16x512xbf16> to vector<16x512xbf16>
    %14 = arith.extf %13 : vector<16x512xbf16> to vector<16x512xf32>
    %15 = arith.truncf %10 : vector<16x128xf32> to vector<16x128xbf16>
    %c0_12 = arith.constant 0 : index
    %c0_13 = arith.constant 0 : index
    %16 = vector.load %arg3[%c0_12, %c0_13] : memref<128x512xbf16, #tpu.memory_space<vmem>>, vector<128x512xbf16>
    %cst_14 = arith.constant dense<0.000000e+00> : vector<16x512xf32>
    %17 = tpu.matmul %15, %16, %cst_14 {dimension_numbers = #tpu.dot_dimension_numbers<[1], [0], [0], [1], [0, 0, 1, 1], [], []>} : vector<16x128xbf16>, vector<128x512xbf16>, vector<16x512xf32> -> vector<16x512xf32>
    %18 = arith.addf %14, %17 : vector<16x512xf32>
    %19 = vector.extract_strided_slice %18 {offsets = [0, 0], sizes = [16, 384], strides = [1, 1]} : vector<16x512xf32> to vector<16x384xf32>
    %20 = arith.negf %19 : vector<16x384xf32>
    %21 = math.exp %20 : vector<16x384xf32>
    %cst_15 = arith.constant 1.000000e+00 : f32
    %22 = vector.broadcast %cst_15 : f32 to vector<16x384xf32>
    %23 = arith.addf %22, %21 : vector<16x384xf32>
    %24 = arith.divf %22, %23 : vector<16x384xf32>
    %25 = vector.extract_strided_slice %18 {offsets = [0, 384], sizes = [16, 128], strides = [1, 1]} : vector<16x512xf32> to vector<16x128xf32>
    %26 = math.tanh %25 : vector<16x128xf32>
    %27 = vector.extract_strided_slice %24 {offsets = [0, 0], sizes = [16, 128], strides = [1, 1]} : vector<16x384xf32> to vector<16x128xf32>
    %28 = vector.extract_strided_slice %24 {offsets = [0, 128], sizes = [16, 128], strides = [1, 1]} : vector<16x384xf32> to vector<16x128xf32>
    %29 = vector.extract_strided_slice %24 {offsets = [0, 256], sizes = [16, 128], strides = [1, 1]} : vector<16x384xf32> to vector<16x128xf32>
    %30 = arith.mulf %28, %10 : vector<16x128xf32>
    %31 = arith.mulf %27, %26 : vector<16x128xf32>
    %32 = arith.addf %30, %31 : vector<16x128xf32>
    %33 = math.tanh %32 : vector<16x128xf32>
    %34 = arith.mulf %29, %33 : vector<16x128xf32>
    %35 = arith.truncf %34 : vector<16x128xf32> to vector<16x128xbf16>
    %36 = arith.index_cast %c0_i32 : i32 to index
    %c0_16 = arith.constant 0 : index
    %c0_17 = arith.constant 0 : index
    %37 = vector.load %arg12[%36, %c0_16, %c0_17] : memref<8x16x128xbf16, #tpu.memory_space<vmem>>, vector<1x16x128xbf16>
    %38 = vector.shape_cast %37 : vector<1x16x128xbf16> to vector<16x128xbf16>
    %39 = vector.shape_cast %35 : vector<16x128xbf16> to vector<1x16x128xbf16>
    tpu.vector_store %arg12[%36, %c0_16, %c0_17], %39 {strides = array<i32>} : memref<8x16x128xbf16, #tpu.memory_space<vmem>>, vector<1x16x128xbf16>,
    %c1_i32 = arith.constant 1 : i32
    %40 = arith.index_cast %c1_i32 : i32 to index
    %c0_18 = arith.constant 0 : index
    %c0_19 = arith.constant 0 : index
    %41 = vector.load %arg11[%40, %c0_18, %c0_19] : memref<8x16x512xbf16, #tpu.memory_space<vmem>>, vector<1x16x512xbf16>
    %42 = vector.shape_cast %41 : vector<1x16x512xbf16> to vector<16x512xbf16>
    %43 = arith.extf %42 : vector<16x512xbf16> to vector<16x512xf32>
    %44 = arith.truncf %34 : vector<16x128xf32> to vector<16x128xbf16>
    %c0_20 = arith.constant 0 : index
    %c0_21 = arith.constant 0 : index
    %45 = vector.load %arg3[%c0_20, %c0_21] : memref<128x512xbf16, #tpu.memory_space<vmem>>, vector<128x512xbf16>
    %cst_22 = arith.constant dense<0.000000e+00> : vector<16x512xf32>
    %46 = tpu.matmul %44, %45, %cst_22 {dimension_numbers = #tpu.dot_dimension_numbers<[1], [0], [0], [1], [0, 0, 1, 1], [], []>} : vector<16x128xbf16>, vector<128x512xbf16>, vector<16x512xf32> -> vector<16x512xf32>
    %47 = arith.addf %43, %46 : vector<16x512xf32>
    %48 = vector.extract_strided_slice %47 {offsets = [0, 0], sizes = [16, 384], strides = [1, 1]} : vector<16x512xf32> to vector<16x384xf32>
    %49 = arith.negf %48 : vector<16x384xf32>
    %50 = math.exp %49 : vector<16x384xf32>
    %cst_23 = arith.constant 1.000000e+00 : f32
    %51 = vector.broadcast %cst_23 : f32 to vector<16x384xf32>
    %52 = arith.addf %51, %50 : vector<16x384xf32>
    %53 = arith.divf %51, %52 : vector<16x384xf32>
    %54 = vector.extract_strided_slice %47 {offsets = [0, 384], sizes = [16, 128], strides = [1, 1]} : vector<16x512xf32> to vector<16x128xf32>
    %55 = math.tanh %54 : vector<16x128xf32>
    %56 = vector.extract_strided_slice %53 {offsets = [0, 0], sizes = [16, 128], strides = [1, 1]} : vector<16x384xf32> to vector<16x128xf32>
    %57 = vector.extract_strided_slice %53 {offsets = [0, 128], sizes = [16, 128], strides = [1, 1]} : vector<16x384xf32> to vector<16x128xf32>
    %58 = vector.extract_strided_slice %53 {offsets = [0, 256], sizes = [16, 128], strides = [1, 1]} : vector<16x384xf32> to vector<16x128xf32>
    %59 = arith.mulf %57, %32 : vector<16x128xf32>
    %60 = arith.mulf %56, %55 : vector<16x128xf32>
    %61 = arith.addf %59, %60 : vector<16x128xf32>
    %62 = math.tanh %61 : vector<16x128xf32>
    %63 = arith.mulf %58, %62 : vector<16x128xf32>
    %64 = arith.truncf %63 : vector<16x128xf32> to vector<16x128xbf16>
    %65 = arith.index_cast %c1_i32 : i32 to index
    %c0_24 = arith.constant 0 : index
    %c0_25 = arith.constant 0 : index
    %66 = vector.load %arg12[%65, %c0_24, %c0_25] : memref<8x16x128xbf16, #tpu.memory_space<vmem>>, vector<1x16x128xbf16>
    %67 = vector.shape_cast %66 : vector<1x16x128xbf16> to vector<16x128xbf16>
    %68 = vector.shape_cast %64 : vector<16x128xbf16> to vector<1x16x128xbf16>
    tpu.vector_store %arg12[%65, %c0_24, %c0_25], %68 {strides = array<i32>} : memref<8x16x128xbf16, #tpu.memory_space<vmem>>, vector<1x16x128xbf16>,
    %c2_i32 = arith.constant 2 : i32
    %69 = arith.index_cast %c2_i32 : i32 to index
    %c0_26 = arith.constant 0 : index
    %c0_27 = arith.constant 0 : index
    %70 = vector.load %arg11[%69, %c0_26, %c0_27] : memref<8x16x512xbf16, #tpu.memory_space<vmem>>, vector<1x16x512xbf16>
    %71 = vector.shape_cast %70 : vector<1x16x512xbf16> to vector<16x512xbf16>
    %72 = arith.extf %71 : vector<16x512xbf16> to vector<16x512xf32>
    %73 = arith.truncf %63 : vector<16x128xf32> to vector<16x128xbf16>
    %c0_28 = arith.constant 0 : index
    %c0_29 = arith.constant 0 : index
    %74 = vector.load %arg3[%c0_28, %c0_29] : memref<128x512xbf16, #tpu.memory_space<vmem>>, vector<128x512xbf16>
    %cst_30 = arith.constant dense<0.000000e+00> : vector<16x512xf32>
    %75 = tpu.matmul %73, %74, %cst_30 {dimension_numbers = #tpu.dot_dimension_numbers<[1], [0], [0], [1], [0, 0, 1, 1], [], []>} : vector<16x128xbf16>, vector<128x512xbf16>, vector<16x512xf32> -> vector<16x512xf32>
    %76 = arith.addf %72, %75 : vector<16x512xf32>
    %77 = vector.extract_strided_slice %76 {offsets = [0, 0], sizes = [16, 384], strides = [1, 1]} : vector<16x512xf32> to vector<16x384xf32>
    %78 = arith.negf %77 : vector<16x384xf32>
    %79 = math.exp %78 : vector<16x384xf32>
    %cst_31 = arith.constant 1.000000e+00 : f32
    %80 = vector.broadcast %cst_31 : f32 to vector<16x384xf32>
    %81 = arith.addf %80, %79 : vector<16x384xf32>
    %82 = arith.divf %80, %81 : vector<16x384xf32>
    %83 = vector.extract_strided_slice %76 {offsets = [0, 384], sizes = [16, 128], strides = [1, 1]} : vector<16x512xf32> to vector<16x128xf32>
    %84 = math.tanh %83 : vector<16x128xf32>
    %85 = vector.extract_strided_slice %82 {offsets = [0, 0], sizes = [16, 128], strides = [1, 1]} : vector<16x384xf32> to vector<16x128xf32>
    %86 = vector.extract_strided_slice %82 {offsets = [0, 128], sizes = [16, 128], strides = [1, 1]} : vector<16x384xf32> to vector<16x128xf32>
    %87 = vector.extract_strided_slice %82 {offsets = [0, 256], sizes = [16, 128], strides = [1, 1]} : vector<16x384xf32> to vector<16x128xf32>
    %88 = arith.mulf %86, %61 : vector<16x128xf32>
    %89 = arith.mulf %85, %84 : vector<16x128xf32>
    %90 = arith.addf %88, %89 : vector<16x128xf32>
    %91 = math.tanh %90 : vector<16x128xf32>
    %92 = arith.mulf %87, %91 : vector<16x128xf32>
    %93 = arith.truncf %92 : vector<16x128xf32> to vector<16x128xbf16>
    %94 = arith.index_cast %c2_i32 : i32 to index
    %c0_32 = arith.constant 0 : index
    %c0_33 = arith.constant 0 : index
    %95 = vector.load %arg12[%94, %c0_32, %c0_33] : memref<8x16x128xbf16, #tpu.memory_space<vmem>>, vector<1x16x128xbf16>
    %96 = vector.shape_cast %95 : vector<1x16x128xbf16> to vector<16x128xbf16>
    %97 = vector.shape_cast %93 : vector<16x128xbf16> to vector<1x16x128xbf16>
    tpu.vector_store %arg12[%94, %c0_32, %c0_33], %97 {strides = array<i32>} : memref<8x16x128xbf16, #tpu.memory_space<vmem>>, vector<1x16x128xbf16>,
    %c3_i32 = arith.constant 3 : i32
    %98 = arith.index_cast %c3_i32 : i32 to index
    %c0_34 = arith.constant 0 : index
    %c0_35 = arith.constant 0 : index
    %99 = vector.load %arg11[%98, %c0_34, %c0_35] : memref<8x16x512xbf16, #tpu.memory_space<vmem>>, vector<1x16x512xbf16>
    %100 = vector.shape_cast %99 : vector<1x16x512xbf16> to vector<16x512xbf16>
    %101 = arith.extf %100 : vector<16x512xbf16> to vector<16x512xf32>
    %102 = arith.truncf %92 : vector<16x128xf32> to vector<16x128xbf16>
    %c0_36 = arith.constant 0 : index
    %c0_37 = arith.constant 0 : index
    %103 = vector.load %arg3[%c0_36, %c0_37] : memref<128x512xbf16, #tpu.memory_space<vmem>>, vector<128x512xbf16>
    %cst_38 = arith.constant dense<0.000000e+00> : vector<16x512xf32>
    %104 = tpu.matmul %102, %103, %cst_38 {dimension_numbers = #tpu.dot_dimension_numbers<[1], [0], [0], [1], [0, 0, 1, 1], [], []>} : vector<16x128xbf16>, vector<128x512xbf16>, vector<16x512xf32> -> vector<16x512xf32>
    %105 = arith.addf %101, %104 : vector<16x512xf32>
    %106 = vector.extract_strided_slice %105 {offsets = [0, 0], sizes = [16, 384], strides = [1, 1]} : vector<16x512xf32> to vector<16x384xf32>
    %107 = arith.negf %106 : vector<16x384xf32>
    %108 = math.exp %107 : vector<16x384xf32>
    %cst_39 = arith.constant 1.000000e+00 : f32
    %109 = vector.broadcast %cst_39 : f32 to vector<16x384xf32>
    %110 = arith.addf %109, %108 : vector<16x384xf32>
    %111 = arith.divf %109, %110 : vector<16x384xf32>
    %112 = vector.extract_strided_slice %105 {offsets = [0, 384], sizes = [16, 128], strides = [1, 1]} : vector<16x512xf32> to vector<16x128xf32>
    %113 = math.tanh %112 : vector<16x128xf32>
    %114 = vector.extract_strided_slice %111 {offsets = [0, 0], sizes = [16, 128], strides = [1, 1]} : vector<16x384xf32> to vector<16x128xf32>
    %115 = vector.extract_strided_slice %111 {offsets = [0, 128], sizes = [16, 128], strides = [1, 1]} : vector<16x384xf32> to vector<16x128xf32>
    %116 = vector.extract_strided_slice %111 {offsets = [0, 256], sizes = [16, 128], strides = [1, 1]} : vector<16x384xf32> to vector<16x128xf32>
    %117 = arith.mulf %115, %90 : vector<16x128xf32>
    %118 = arith.mulf %114, %113 : vector<16x128xf32>
    %119 = arith.addf %117, %118 : vector<16x128xf32>
    %120 = math.tanh %119 : vector<16x128xf32>
    %121 = arith.mulf %116, %120 : vector<16x128xf32>
    %122 = arith.truncf %121 : vector<16x128xf32> to vector<16x128xbf16>
    %123 = arith.index_cast %c3_i32 : i32 to index
    %c0_40 = arith.constant 0 : index
    %c0_41 = arith.constant 0 : index
    %124 = vector.load %arg12[%123, %c0_40, %c0_41] : memref<8x16x128xbf16, #tpu.memory_space<vmem>>, vector<1x16x128xbf16>
    %125 = vector.shape_cast %124 : vector<1x16x128xbf16> to vector<16x128xbf16>
    %126 = vector.shape_cast %122 : vector<16x128xbf16> to vector<1x16x128xbf16>
    tpu.vector_store %arg12[%123, %c0_40, %c0_41], %126 {strides = array<i32>} : memref<8x16x128xbf16, #tpu.memory_space<vmem>>, vector<1x16x128xbf16>,
    %c4_i32 = arith.constant 4 : i32
    %127 = arith.index_cast %c4_i32 : i32 to index
    %c0_42 = arith.constant 0 : index
    %c0_43 = arith.constant 0 : index
    %128 = vector.load %arg11[%127, %c0_42, %c0_43] : memref<8x16x512xbf16, #tpu.memory_space<vmem>>, vector<1x16x512xbf16>
    %129 = vector.shape_cast %128 : vector<1x16x512xbf16> to vector<16x512xbf16>
    %130 = arith.extf %129 : vector<16x512xbf16> to vector<16x512xf32>
    %131 = arith.truncf %121 : vector<16x128xf32> to vector<16x128xbf16>
    %c0_44 = arith.constant 0 : index
    %c0_45 = arith.constant 0 : index
    %132 = vector.load %arg3[%c0_44, %c0_45] : memref<128x512xbf16, #tpu.memory_space<vmem>>, vector<128x512xbf16>
    %cst_46 = arith.constant dense<0.000000e+00> : vector<16x512xf32>
    %133 = tpu.matmul %131, %132, %cst_46 {dimension_numbers = #tpu.dot_dimension_numbers<[1], [0], [0], [1], [0, 0, 1, 1], [], []>} : vector<16x128xbf16>, vector<128x512xbf16>, vector<16x512xf32> -> vector<16x512xf32>
    %134 = arith.addf %130, %133 : vector<16x512xf32>
    %135 = vector.extract_strided_slice %134 {offsets = [0, 0], sizes = [16, 384], strides = [1, 1]} : vector<16x512xf32> to vector<16x384xf32>
    %136 = arith.negf %135 : vector<16x384xf32>
    %137 = math.exp %136 : vector<16x384xf32>
    %cst_47 = arith.constant 1.000000e+00 : f32
    %138 = vector.broadcast %cst_47 : f32 to vector<16x384xf32>
    %139 = arith.addf %138, %137 : vector<16x384xf32>
    %140 = arith.divf %138, %139 : vector<16x384xf32>
    %141 = vector.extract_strided_slice %134 {offsets = [0, 384], sizes = [16, 128], strides = [1, 1]} : vector<16x512xf32> to vector<16x128xf32>
    %142 = math.tanh %141 : vector<16x128xf32>
    %143 = vector.extract_strided_slice %140 {offsets = [0, 0], sizes = [16, 128], strides = [1, 1]} : vector<16x384xf32> to vector<16x128xf32>
    %144 = vector.extract_strided_slice %140 {offsets = [0, 128], sizes = [16, 128], strides = [1, 1]} : vector<16x384xf32> to vector<16x128xf32>
    %145 = vector.extract_strided_slice %140 {offsets = [0, 256], sizes = [16, 128], strides = [1, 1]} : vector<16x384xf32> to vector<16x128xf32>
    %146 = arith.mulf %144, %119 : vector<16x128xf32>
    %147 = arith.mulf %143, %142 : vector<16x128xf32>
    %148 = arith.addf %146, %147 : vector<16x128xf32>
    %149 = math.tanh %148 : vector<16x128xf32>
    %150 = arith.mulf %145, %149 : vector<16x128xf32>
    %151 = arith.truncf %150 : vector<16x128xf32> to vector<16x128xbf16>
    %152 = arith.index_cast %c4_i32 : i32 to index
    %c0_48 = arith.constant 0 : index
    %c0_49 = arith.constant 0 : index
    %153 = vector.load %arg12[%152, %c0_48, %c0_49] : memref<8x16x128xbf16, #tpu.memory_space<vmem>>, vector<1x16x128xbf16>
    %154 = vector.shape_cast %153 : vector<1x16x128xbf16> to vector<16x128xbf16>
    %155 = vector.shape_cast %151 : vector<16x128xbf16> to vector<1x16x128xbf16>
    tpu.vector_store %arg12[%152, %c0_48, %c0_49], %155 {strides = array<i32>} : memref<8x16x128xbf16, #tpu.memory_space<vmem>>, vector<1x16x128xbf16>,
    %c5_i32 = arith.constant 5 : i32
    %156 = arith.index_cast %c5_i32 : i32 to index
    %c0_50 = arith.constant 0 : index
    %c0_51 = arith.constant 0 : index
    %157 = vector.load %arg11[%156, %c0_50, %c0_51] : memref<8x16x512xbf16, #tpu.memory_space<vmem>>, vector<1x16x512xbf16>
    %158 = vector.shape_cast %157 : vector<1x16x512xbf16> to vector<16x512xbf16>
    %159 = arith.extf %158 : vector<16x512xbf16> to vector<16x512xf32>
    %160 = arith.truncf %150 : vector<16x128xf32> to vector<16x128xbf16>
    %c0_52 = arith.constant 0 : index
    %c0_53 = arith.constant 0 : index
    %161 = vector.load %arg3[%c0_52, %c0_53] : memref<128x512xbf16, #tpu.memory_space<vmem>>, vector<128x512xbf16>
    %cst_54 = arith.constant dense<0.000000e+00> : vector<16x512xf32>
    %162 = tpu.matmul %160, %161, %cst_54 {dimension_numbers = #tpu.dot_dimension_numbers<[1], [0], [0], [1], [0, 0, 1, 1], [], []>} : vector<16x128xbf16>, vector<128x512xbf16>, vector<16x512xf32> -> vector<16x512xf32>
    %163 = arith.addf %159, %162 : vector<16x512xf32>
    %164 = vector.extract_strided_slice %163 {offsets = [0, 0], sizes = [16, 384], strides = [1, 1]} : vector<16x512xf32> to vector<16x384xf32>
    %165 = arith.negf %164 : vector<16x384xf32>
    %166 = math.exp %165 : vector<16x384xf32>
    %cst_55 = arith.constant 1.000000e+00 : f32
    %167 = vector.broadcast %cst_55 : f32 to vector<16x384xf32>
    %168 = arith.addf %167, %166 : vector<16x384xf32>
    %169 = arith.divf %167, %168 : vector<16x384xf32>
    %170 = vector.extract_strided_slice %163 {offsets = [0, 384], sizes = [16, 128], strides = [1, 1]} : vector<16x512xf32> to vector<16x128xf32>
    %171 = math.tanh %170 : vector<16x128xf32>
    %172 = vector.extract_strided_slice %169 {offsets = [0, 0], sizes = [16, 128], strides = [1, 1]} : vector<16x384xf32> to vector<16x128xf32>
    %173 = vector.extract_strided_slice %169 {offsets = [0, 128], sizes = [16, 128], strides = [1, 1]} : vector<16x384xf32> to vector<16x128xf32>
    %174 = vector.extract_strided_slice %169 {offsets = [0, 256], sizes = [16, 128], strides = [1, 1]} : vector<16x384xf32> to vector<16x128xf32>
    %175 = arith.mulf %173, %148 : vector<16x128xf32>
    %176 = arith.mulf %172, %171 : vector<16x128xf32>
    %177 = arith.addf %175, %176 : vector<16x128xf32>
    %178 = math.tanh %177 : vector<16x128xf32>
    %179 = arith.mulf %174, %178 : vector<16x128xf32>
    %180 = arith.truncf %179 : vector<16x128xf32> to vector<16x128xbf16>
    %181 = arith.index_cast %c5_i32 : i32 to index
    %c0_56 = arith.constant 0 : index
    %c0_57 = arith.constant 0 : index
    %182 = vector.load %arg12[%181, %c0_56, %c0_57] : memref<8x16x128xbf16, #tpu.memory_space<vmem>>, vector<1x16x128xbf16>
    %183 = vector.shape_cast %182 : vector<1x16x128xbf16> to vector<16x128xbf16>
    %184 = vector.shape_cast %180 : vector<16x128xbf16> to vector<1x16x128xbf16>
    tpu.vector_store %arg12[%181, %c0_56, %c0_57], %184 {strides = array<i32>} : memref<8x16x128xbf16, #tpu.memory_space<vmem>>, vector<1x16x128xbf16>,
    %c6_i32 = arith.constant 6 : i32
    %185 = arith.index_cast %c6_i32 : i32 to index
    %c0_58 = arith.constant 0 : index
    %c0_59 = arith.constant 0 : index
    %186 = vector.load %arg11[%185, %c0_58, %c0_59] : memref<8x16x512xbf16, #tpu.memory_space<vmem>>, vector<1x16x512xbf16>
    %187 = vector.shape_cast %186 : vector<1x16x512xbf16> to vector<16x512xbf16>
    %188 = arith.extf %187 : vector<16x512xbf16> to vector<16x512xf32>
    %189 = arith.truncf %179 : vector<16x128xf32> to vector<16x128xbf16>
    %c0_60 = arith.constant 0 : index
    %c0_61 = arith.constant 0 : index
    %190 = vector.load %arg3[%c0_60, %c0_61] : memref<128x512xbf16, #tpu.memory_space<vmem>>, vector<128x512xbf16>
    %cst_62 = arith.constant dense<0.000000e+00> : vector<16x512xf32>
    %191 = tpu.matmul %189, %190, %cst_62 {dimension_numbers = #tpu.dot_dimension_numbers<[1], [0], [0], [1], [0, 0, 1, 1], [], []>} : vector<16x128xbf16>, vector<128x512xbf16>, vector<16x512xf32> -> vector<16x512xf32>
    %192 = arith.addf %188, %191 : vector<16x512xf32>
    %193 = vector.extract_strided_slice %192 {offsets = [0, 0], sizes = [16, 384], strides = [1, 1]} : vector<16x512xf32> to vector<16x384xf32>
    %194 = arith.negf %193 : vector<16x384xf32>
    %195 = math.exp %194 : vector<16x384xf32>
    %cst_63 = arith.constant 1.000000e+00 : f32
    %196 = vector.broadcast %cst_63 : f32 to vector<16x384xf32>
    %197 = arith.addf %196, %195 : vector<16x384xf32>
    %198 = arith.divf %196, %197 : vector<16x384xf32>
    %199 = vector.extract_strided_slice %192 {offsets = [0, 384], sizes = [16, 128], strides = [1, 1]} : vector<16x512xf32> to vector<16x128xf32>
    %200 = math.tanh %199 : vector<16x128xf32>
    %201 = vector.extract_strided_slice %198 {offsets = [0, 0], sizes = [16, 128], strides = [1, 1]} : vector<16x384xf32> to vector<16x128xf32>
    %202 = vector.extract_strided_slice %198 {offsets = [0, 128], sizes = [16, 128], strides = [1, 1]} : vector<16x384xf32> to vector<16x128xf32>
    %203 = vector.extract_strided_slice %198 {offsets = [0, 256], sizes = [16, 128], strides = [1, 1]} : vector<16x384xf32> to vector<16x128xf32>
    %204 = arith.mulf %202, %177 : vector<16x128xf32>
    %205 = arith.mulf %201, %200 : vector<16x128xf32>
    %206 = arith.addf %204, %205 : vector<16x128xf32>
    %207 = math.tanh %206 : vector<16x128xf32>
    %208 = arith.mulf %203, %207 : vector<16x128xf32>
    %209 = arith.truncf %208 : vector<16x128xf32> to vector<16x128xbf16>
    %210 = arith.index_cast %c6_i32 : i32 to index
    %c0_64 = arith.constant 0 : index
    %c0_65 = arith.constant 0 : index
    %211 = vector.load %arg12[%210, %c0_64, %c0_65] : memref<8x16x128xbf16, #tpu.memory_space<vmem>>, vector<1x16x128xbf16>
    %212 = vector.shape_cast %211 : vector<1x16x128xbf16> to vector<16x128xbf16>
    %213 = vector.shape_cast %209 : vector<16x128xbf16> to vector<1x16x128xbf16>
    tpu.vector_store %arg12[%210, %c0_64, %c0_65], %213 {strides = array<i32>} : memref<8x16x128xbf16, #tpu.memory_space<vmem>>, vector<1x16x128xbf16>,
    %c7_i32 = arith.constant 7 : i32
    %214 = arith.index_cast %c7_i32 : i32 to index
    %c0_66 = arith.constant 0 : index
    %c0_67 = arith.constant 0 : index
    %215 = vector.load %arg11[%214, %c0_66, %c0_67] : memref<8x16x512xbf16, #tpu.memory_space<vmem>>, vector<1x16x512xbf16>
    %216 = vector.shape_cast %215 : vector<1x16x512xbf16> to vector<16x512xbf16>
    %217 = arith.extf %216 : vector<16x512xbf16> to vector<16x512xf32>
    %218 = arith.truncf %208 : vector<16x128xf32> to vector<16x128xbf16>
    %c0_68 = arith.constant 0 : index
    %c0_69 = arith.constant 0 : index
    %219 = vector.load %arg3[%c0_68, %c0_69] : memref<128x512xbf16, #tpu.memory_space<vmem>>, vector<128x512xbf16>
    %cst_70 = arith.constant dense<0.000000e+00> : vector<16x512xf32>
    %220 = tpu.matmul %218, %219, %cst_70 {dimension_numbers = #tpu.dot_dimension_numbers<[1], [0], [0], [1], [0, 0, 1, 1], [], []>} : vector<16x128xbf16>, vector<128x512xbf16>, vector<16x512xf32> -> vector<16x512xf32>
    %221 = arith.addf %217, %220 : vector<16x512xf32>
    %222 = vector.extract_strided_slice %221 {offsets = [0, 0], sizes = [16, 384], strides = [1, 1]} : vector<16x512xf32> to vector<16x384xf32>
    %223 = arith.negf %222 : vector<16x384xf32>
    %224 = math.exp %223 : vector<16x384xf32>
    %cst_71 = arith.constant 1.000000e+00 : f32
    %225 = vector.broadcast %cst_71 : f32 to vector<16x384xf32>
    %226 = arith.addf %225, %224 : vector<16x384xf32>
    %227 = arith.divf %225, %226 : vector<16x384xf32>
    %228 = vector.extract_strided_slice %221 {offsets = [0, 384], sizes = [16, 128], strides = [1, 1]} : vector<16x512xf32> to vector<16x128xf32>
    %229 = math.tanh %228 : vector<16x128xf32>
    %230 = vector.extract_strided_slice %227 {offsets = [0, 0], sizes = [16, 128], strides = [1, 1]} : vector<16x384xf32> to vector<16x128xf32>
    %231 = vector.extract_strided_slice %227 {offsets = [0, 128], sizes = [16, 128], strides = [1, 1]} : vector<16x384xf32> to vector<16x128xf32>
    %232 = vector.extract_strided_slice %227 {offsets = [0, 256], sizes = [16, 128], strides = [1, 1]} : vector<16x384xf32> to vector<16x128xf32>
    %233 = arith.mulf %231, %206 : vector<16x128xf32>
    %234 = arith.mulf %230, %229 : vector<16x128xf32>
    %235 = arith.addf %233, %234 : vector<16x128xf32>
    %236 = math.tanh %235 : vector<16x128xf32>
    %237 = arith.mulf %232, %236 : vector<16x128xf32>
    %238 = arith.truncf %237 : vector<16x128xf32> to vector<16x128xbf16>
    %239 = arith.index_cast %c7_i32 : i32 to index
    %c0_72 = arith.constant 0 : index
    %c0_73 = arith.constant 0 : index
    %240 = vector.load %arg12[%239, %c0_72, %c0_73] : memref<8x16x128xbf16, #tpu.memory_space<vmem>>, vector<1x16x128xbf16>
    %241 = vector.shape_cast %240 : vector<1x16x128xbf16> to vector<16x128xbf16>
    %242 = vector.shape_cast %238 : vector<16x128xbf16> to vector<1x16x128xbf16>
    tpu.vector_store %arg12[%239, %c0_72, %c0_73], %242 {strides = array<i32>} : memref<8x16x128xbf16, #tpu.memory_space<vmem>>, vector<1x16x128xbf16>,
    %c8_i32 = arith.constant 8 : i32
    %c0_74 = arith.constant 0 : index
    %c0_75 = arith.constant 0 : index
    %c0_76 = arith.constant 0 : index
    %243 = vector.load %arg12[%c0_74, %c0_75, %c0_76] : memref<8x16x128xbf16, #tpu.memory_space<vmem>>, vector<8x16x128xbf16>
    %244 = vector.shape_cast %243 : vector<8x16x128xbf16> to vector<128x128xbf16>
    %c0_77 = arith.constant 0 : index
    %c0_78 = arith.constant 0 : index
    %245 = vector.load %arg5[%c0_77, %c0_78] : memref<128x128xbf16, #tpu.memory_space<vmem>>, vector<128x128xbf16>
    %cst_79 = arith.constant dense<0.000000e+00> : vector<128x128xf32>
    %246 = tpu.matmul %244, %245, %cst_79 {dimension_numbers = #tpu.dot_dimension_numbers<[1], [0], [0], [1], [0, 0, 1, 1], [], []>} : vector<128x128xbf16>, vector<128x128xbf16>, vector<128x128xf32> -> vector<128x128xf32>
    %c0_80 = arith.constant 0 : index
    %c0_81 = arith.constant 0 : index
    %247 = vector.load %arg6[%c0_80, %c0_81] : memref<1x128xf32, #tpu.memory_space<vmem>>, vector<1x128xf32>
    %248 = vector.broadcast %247 : vector<1x128xf32> to vector<128x128xf32>
    %249 = arith.addf %246, %248 : vector<128x128xf32>
    %250 = math.tanh %249 : vector<128x128xf32>
    %c0_82 = arith.constant 0 : index
    %c0_83 = arith.constant 0 : index
    %251 = vector.load %arg7[%c0_82, %c0_83] : memref<1x128xf32, #tpu.memory_space<vmem>>, vector<1x128xf32>
    %252 = vector.broadcast %251 : vector<1x128xf32> to vector<128x128xf32>
    %253 = arith.mulf %250, %252 : vector<128x128xf32>
    %cst_84 = arith.constant dense<0.000000e+00> : vector<128xf32>
    %254 = vector.multi_reduction <add>, %253, %cst_84 [1] : vector<128x128xf32> to vector<128xf32>
    %255 = vector.shape_cast %254 : vector<128xf32> to vector<128x1xf32>
    %256 = vector.shape_cast %255 : vector<128x1xf32> to vector<8x16x1xf32>
    %cst_85 = arith.constant dense<0xFF800000> : vector<16x1xf32>
    %257 = vector.multi_reduction <maximumf>, %256, %cst_85 [0] : vector<8x16x1xf32> to vector<16x1xf32>
    %258 = vector.shape_cast %257 : vector<16x1xf32> to vector<1x16x1xf32>
    %259 = vector.broadcast %258 : vector<1x16x1xf32> to vector<8x16x1xf32>
    %260 = arith.subf %256, %259 : vector<8x16x1xf32>
    %261 = math.exp %260 : vector<8x16x1xf32>
    %cst_86 = arith.constant dense<0.000000e+00> : vector<16x1xf32>
    %262 = vector.multi_reduction <add>, %261, %cst_86 [0] : vector<8x16x1xf32> to vector<16x1xf32>
    %263 = arith.extf %243 : vector<8x16x128xbf16> to vector<8x16x128xf32>
    %264 = vector.broadcast %261 : vector<8x16x1xf32> to vector<8x16x128xf32>
    %265 = arith.mulf %264, %263 : vector<8x16x128xf32>
    %cst_87 = arith.constant dense<0.000000e+00> : vector<16x128xf32>
    %266 = vector.multi_reduction <add>, %265, %cst_87 [0] : vector<8x16x128xf32> to vector<16x128xf32>
    %267 = tpu.reciprocal %262 {approx = true} : vector<16x1xf32> -> vector<16x1xf32>
    %268 = vector.broadcast %267 : vector<16x1xf32> to vector<16x128xf32>
    %269 = arith.mulf %266, %268 : vector<16x128xf32>
    %270 = arith.truncf %269 : vector<16x128xf32> to vector<16x128xbf16>
    %c0_88 = arith.constant 0 : index
    %c0_89 = arith.constant 0 : index
    %271 = vector.load %arg8[%c0_88, %c0_89] : memref<128x64xbf16, #tpu.memory_space<vmem>>, vector<128x64xbf16>
    %cst_90 = arith.constant dense<0.000000e+00> : vector<16x64xf32>
    %272 = tpu.matmul %270, %271, %cst_90 {dimension_numbers = #tpu.dot_dimension_numbers<[1], [0], [0], [1], [0, 0, 1, 1], [], []>} : vector<16x128xbf16>, vector<128x64xbf16>, vector<16x64xf32> -> vector<16x64xf32>
    %c0_91 = arith.constant 0 : index
    %c0_92 = arith.constant 0 : index
    %273 = vector.load %arg9[%c0_91, %c0_92] : memref<1x64xf32, #tpu.memory_space<vmem>>, vector<1x64xf32>
    %274 = vector.broadcast %273 : vector<1x64xf32> to vector<16x64xf32>
    %275 = arith.addf %272, %274 : vector<16x64xf32>
    %c0_93 = arith.constant 0 : index
    %c0_94 = arith.constant 0 : index
    %276 = vector.load %arg10[%c0_93, %c0_94] : memref<16x64xf32, #tpu.memory_space<vmem>>, vector<16x64xf32>
    tpu.vector_store %arg10[%c0_93, %c0_94], %275 {strides = array<i32>} : memref<16x64xf32, #tpu.memory_space<vmem>>, vector<16x64xf32>,
    return
  }
  func.func @transform_0(%arg0: i32) -> (i32, i32, i32) {
    %c0_i32 = arith.constant 0 : i32
    %c0_i32_0 = arith.constant 0 : i32
    %c0_i32_1 = arith.constant 0 : i32
    return %c0_i32, %arg0, %c0_i32_0 : i32, i32, i32
  }
  func.func @transform_1(%arg0: i32) -> (i32, i32) {
    %c0_i32 = arith.constant 0 : i32
    %c0_i32_0 = arith.constant 0 : i32
    %c0_i32_1 = arith.constant 0 : i32
    return %c0_i32, %c0_i32_0 : i32, i32
  }
  func.func @transform_2(%arg0: i32) -> (i32, i32) {
    %c0_i32 = arith.constant 0 : i32
    %c0_i32_0 = arith.constant 0 : i32
    %c0_i32_1 = arith.constant 0 : i32
    return %c0_i32, %c0_i32_0 : i32, i32
  }
  func.func @transform_3(%arg0: i32) -> (i32, i32) {
    %c0_i32 = arith.constant 0 : i32
    %c0_i32_0 = arith.constant 0 : i32
    %c0_i32_1 = arith.constant 0 : i32
    return %c0_i32, %c0_i32_0 : i32, i32
  }
  func.func @transform_4(%arg0: i32) -> (i32, i32) {
    %c0_i32 = arith.constant 0 : i32
    %c0_i32_0 = arith.constant 0 : i32
    %c0_i32_1 = arith.constant 0 : i32
    return %c0_i32, %c0_i32_0 : i32, i32
  }
  func.func @transform_5(%arg0: i32) -> (i32, i32) {
    %c0_i32 = arith.constant 0 : i32
    %c0_i32_0 = arith.constant 0 : i32
    %c0_i32_1 = arith.constant 0 : i32
    return %c0_i32, %c0_i32_0 : i32, i32
  }
  func.func @transform_6(%arg0: i32) -> (i32, i32) {
    %c0_i32 = arith.constant 0 : i32
    %c0_i32_0 = arith.constant 0 : i32
    %c0_i32_1 = arith.constant 0 : i32
    return %c0_i32, %c0_i32_0 : i32, i32
  }
  func.func @transform_7(%arg0: i32) -> (i32, i32) {
    %c0_i32 = arith.constant 0 : i32
    %c0_i32_0 = arith.constant 0 : i32
    %c0_i32_1 = arith.constant 0 : i32
    return %c0_i32, %c0_i32_0 : i32, i32
  }
  func.func @transform_8(%arg0: i32) -> (i32, i32) {
    %c0_i32 = arith.constant 0 : i32
    %c0_i32_0 = arith.constant 0 : i32
    %c0_i32_1 = arith.constant 0 : i32
    return %c0_i32, %c0_i32_0 : i32, i32
  }
  func.func @transform_9(%arg0: i32) -> (i32, i32) {
    %c0_i32 = arith.constant 0 : i32
    %c0_i32_0 = arith.constant 0 : i32
    return %arg0, %c0_i32 : i32, i32
  }
}

</mosaic_0001>

<bundles_post_ra>
// kernel: tpu_custom_call.1
= control target key start
LH: loop header
LB: loop body
LE: loop exit
PB: predicated region body
PF: predicated region fallthrough
CT: control target
= control target key end

     0   :  { %14 = vsyncpa [#allocation5], 0  ;;  %s6247_s0 = inlined_call_operand.hbm [shape: bf16[8,16,128], index: 0, kind: input, shape index: {}]   ;;  %s6248_s1 = inlined_call_operand.hbm [shape: bf16[128,512], index: 1, kind: input, shape index: {}]   ;;  %s6249_s2 = inlined_call_operand.hbm [shape: bf16[128,512], index: 2, kind: input, shape index: {}]   ;;  %s6250_s3 = inlined_call_operand.hbm [shape: f32[1,512], index: 3, kind: input, shape index: {}]   ;;  %s6251_s4 = inlined_call_operand.hbm [shape: bf16[128,128], index: 4, kind: input, shape index: {}]   ;;  %s6252_s5 = inlined_call_operand.hbm [shape: f32[1,128], index: 5, kind: input, shape index: {}]   ;;  %s6253_s6 = inlined_call_operand.hbm [shape: f32[1,128], index: 6, kind: input, shape index: {}]   ;;  %s6254_s7 = inlined_call_operand.hbm [shape: bf16[128,64], index: 7, kind: input, shape index: {}]   ;;  %s6255_s8 = inlined_call_operand.hbm [shape: f32[1,64], index: 8, kind: input, shape index: {}]   ;;  %s6256_s9 = inlined_call_operand.hbm [shape: f32[16,64], index: 9, kind: output, shape index: {}]  }
   0x1   :  { %15 = vsyncpa [#allocation8], 0 }
   0x2   :  { %16 = vsyncpa [#allocation11], 0 }
   0x3   :  { %17 = vsyncpa [#allocation14], 0 }
   0x4   :  { %18 = vsyncpa [#allocation17], 0 }
   0x5   :  { %19 = vsyncpa [#allocation6], 0  ;;  %s5255_s30 = smov [#allocation7]   ;;  %s5023_s13 = scalar_lea.hbm %s6248_s1, 4096 }
   0x6   :  { %s37_s10 = sshll.u32 %s5255_s30, 4  ;;  %p5024_p0 = scmp.ne.s32.totalorder %s6248_s1, %s5023_s13  ;;  %s38_s10 = int_to_ptr.vmem [resolvable:$true] %s37_s10 }
   0x7   :  { %p5027_p1 = scmp.lt.u32.totalorder %s5023_s13, %s6248_s1 }
   0x9   :  { %p5029_p2 = pnand %p5027_p1, %p5024_p0 }
   0xb   :  { %5032 = shalt.err (!%p5029_p2)
}
   0xc   :  { %s5033_s18 = scalar_lea.vmem %s38_s10, 4096  ;;  %p5038_p4 = scmp.lt.s32.totalorder %s38_s10, %s38_s10 }
   0xd   :  { %p5034_p3 = scmp.ne.s32.totalorder %s38_s10, %s5033_s18  ;;  %p5039_p5 = scmp.lt.s32.totalorder %s5033_s18, %s5033_s18 }
   0xf   :  { %p5040_p6 = por %p5039_p5, %p5038_p4 }
  0x11   :  { %p5041_p7 = pnand %p5040_p6, %p5034_p3 }
  0x13   :  { %5044 = shalt.err (!%p5041_p7)
}
  0x14   :  { %s5256_s19 = smov 256   ;;  %s5257_s20 = smov 16  }
  0x15   :  { %43 = dma.hbm_to_vmem [thread:$0]  %s6248_s1, 4096, %s38_s10, [#allocation8], %s5256_s19, %s5256_s19, %s5257_s20  }
  0x16   :  { %s5258_s23 = smov [#allocation10]   ;;  %s5259_s25 = smov [#allocation13]  }
  0x17   :  { %s62_s24 = sshll.u32 %s5258_s23, 4  ;;  %s84_s26 = sshll.u32 %s5259_s25, 4  ;;  %s63_s24 = int_to_ptr.vmem [resolvable:$true] %s62_s24  ;;  %s85_s26 = int_to_ptr.vmem [resolvable:$true] %s84_s26 }
  0x18   :  { %s5045_s29 = scalar_lea.hbm %s6250_s3, 64 }
  0x19   :  { %p5046_p8 = scmp.ne.s32.totalorder %s6250_s3, %s5045_s29  ;;  %p5049_p9 = scmp.lt.u32.totalorder %s5045_s29, %s6250_s3 }
  0x1b   :  { %p5051_p10 = pnand %p5049_p9, %p5046_p8 }
  0x1d   :  { %5054 = shalt.err (!%p5051_p10)
}
  0x1e   :  { %s5055_s1 = scalar_lea.vmem %s63_s24, 64  ;;  %p5060_p12 = scmp.lt.s32.totalorder %s63_s24, %s63_s24 }
  0x1f   :  { %p5056_p11 = scmp.ne.s32.totalorder %s63_s24, %s5055_s1  ;;  %p5061_p13 = scmp.lt.s32.totalorder %s5055_s1, %s5055_s1 }
  0x21   :  { %p5062_p0 = por %p5061_p13, %p5060_p12 }
  0x23   :  { %p5063_p1 = pnand %p5062_p0, %p5056_p11 }
  0x25   :  { %5066 = shalt.err (!%p5063_p1)
}
  0x26   :  { %65 = dma.hbm_to_vmem [thread:$0]  %s6250_s3, 64, %s63_s24, [#allocation11]  }
  0x27   :  { %s5067_s17 = scalar_lea.hbm %s6252_s5, 16 }
  0x28   :  { %p5068_p2 = scmp.ne.s32.totalorder %s6252_s5, %s5067_s17  ;;  %p5071_p3 = scmp.lt.u32.totalorder %s5067_s17, %s6252_s5 }
  0x2a   :  { %p5073_p4 = pnand %p5071_p3, %p5068_p2 }
  0x2c   :  { %5076 = shalt.err (!%p5073_p4)
}
  0x2d   :  { %s5077_s25 = scalar_lea.vmem %s85_s26, 16  ;;  %s5081_s27 = scalar_lea.vmem %s85_s26, 32 }
  0x2e   :  { %p5078_p5 = scmp.ne.s32.totalorder %s85_s26, %s5077_s25  ;;  %p5082_p6 = scmp.lt.s32.totalorder %s85_s26, %s85_s26 }
  0x2f   :  { %p5083_p7 = scmp.lt.s32.totalorder %s5081_s27, %s5077_s25 }
  0x31   :  { %p5084_p8 = por %p5083_p7, %p5082_p6 }
  0x33   :  { %p5085_p9 = pnand %p5084_p8, %p5078_p5 }
  0x35   :  { %5088 = shalt.err (!%p5085_p9)
}
  0x36   :  { %87 = dma.hbm_to_vmem [thread:$0]  %s6252_s5, 16, %s85_s26, [#allocation14]  }
  0x37   :  { %s5260_s28 = smov [#allocation16]   ;;  %s5261_s30 = smov [#allocation4]  }
  0x38   :  { %s103_s29 = sshll.u32 %s5260_s28, 4  ;;  %s25_s11 = sshll.u32 %s5261_s30, 4  ;;  %s104_s29 = int_to_ptr.vmem [resolvable:$true] %s103_s29  ;;  %s26_s11 = int_to_ptr.vmem [resolvable:$true] %s25_s11 }
  0x39   :  { %s5089_s1 = scalar_lea.hbm %s6254_s7, 1024 }
  0x3a   :  { %p5090_p10 = scmp.ne.s32.totalorder %s6254_s7, %s5089_s1  ;;  %p5093_p11 = scmp.lt.u32.totalorder %s5089_s1, %s6254_s7 }
  0x3c   :  { %p5095_p12 = pnand %p5093_p11, %p5090_p10 }
  0x3e   :  { %5098 = shalt.err (!%p5095_p12)
}
  0x3f   :  { %s5099_s5 = scalar_lea.vmem %s104_s29, 1024  ;;  %p5104_p0 = scmp.lt.s32.totalorder %s104_s29, %s104_s29 }
  0x40   :  { %p5100_p13 = scmp.ne.s32.totalorder %s104_s29, %s5099_s5  ;;  %p5105_p1 = scmp.lt.s32.totalorder %s5099_s5, %s5099_s5 }
  0x42   :  { %p5106_p2 = por %p5105_p1, %p5104_p0 }
  0x44   :  { %p5107_p3 = pnand %p5106_p2, %p5100_p13 }
  0x46   :  { %5110 = shalt.err (!%p5107_p3)
}
  0x47   :  { %s5262_s26 = smov 64   ;;  %s5263_s17 = smov 4  }
  0x48   :  { %109 = dma.hbm_to_vmem [thread:$0]  %s6254_s7, 1024, %s104_s29, [#allocation17], %s5262_s26, %s5262_s26, %s5263_s17  }
  0x49   :  { %s5111_s25 = scalar_lea.hbm %s6247_s0, 1024 }
  0x4a   :  { %p5112_p4 = scmp.ne.s32.totalorder %s6247_s0, %s5111_s25  ;;  %p5115_p5 = scmp.lt.u32.totalorder %s5111_s25, %s6247_s0 }
  0x4c   :  { %p5117_p6 = pnand %p5115_p5, %p5112_p4 }
  0x4e   :  { %5120 = shalt.err (!%p5117_p6)
}
  0x4f   :  { %s5121_s30 = scalar_lea.vmem %s26_s11, 1024  ;;  %p5126_p8 = scmp.lt.s32.totalorder %s26_s11, %s26_s11 }
  0x50   :  { %p5122_p7 = scmp.ne.s32.totalorder %s26_s11, %s5121_s30  ;;  %p5127_p9 = scmp.lt.s32.totalorder %s5121_s30, %s5121_s30 }
  0x52   :  { %p5128_p10 = por %p5127_p9, %p5126_p8 }
  0x54   :  { %p5129_p11 = pnand %p5128_p10, %p5122_p7 }
  0x56   :  { %5132 = shalt.err (!%p5129_p11)
}
  0x57   :  { %31 = dma.hbm_to_vmem [thread:$0]  %s6247_s0, 1024, %s26_s11, [#allocation5], %s5262_s26, %s5262_s26, %s5263_s17  }
  0x58   :  { %s5264_s12 = smov [#allocation9]   ;;  %s5265_s1 = smov [#allocation12]  }
  0x59   :  { %s49_s13 = sshll.u32 %s5264_s12, 4  ;;  %s71_s10 = sshll.u32 %s5265_s1, 4  ;;  %s50_s13 = int_to_ptr.vmem [resolvable:$true] %s49_s13  ;;  %s72_s10 = int_to_ptr.vmem [resolvable:$true] %s71_s10 }
  0x5a   :  { %s5133_s16 = scalar_lea.hbm %s6249_s2, 4096 }
  0x5b   :  { %p5134_p12 = scmp.ne.s32.totalorder %s6249_s2, %s5133_s16  ;;  %p5137_p13 = scmp.lt.u32.totalorder %s5133_s16, %s6249_s2 }
  0x5d   :  { %p5139_p0 = pnand %p5137_p13, %p5134_p12 }
  0x5f   :  { %5142 = shalt.err (!%p5139_p0)
}
  0x60   :  { %s5143_s0 = scalar_lea.vmem %s50_s13, 4096  ;;  %p5148_p2 = scmp.lt.s32.totalorder %s50_s13, %s50_s13 }
  0x61   :  { %p5144_p1 = scmp.ne.s32.totalorder %s50_s13, %s5143_s0  ;;  %p5149_p3 = scmp.lt.s32.totalorder %s5143_s0, %s5143_s0 }
  0x63   :  { %p5150_p4 = por %p5149_p3, %p5148_p2 }
  0x65   :  { %p5151_p5 = pnand %p5150_p4, %p5144_p1 }
  0x67   :  { %5154 = shalt.err (!%p5151_p5)
}
  0x68   :  { %55 = dma.hbm_to_vmem [thread:$0]  %s6249_s2, 4096, %s50_s13, [#allocation8], %s5256_s19, %s5256_s19, %s5257_s20  }
  0x69   :  { %s5155_s3 = scalar_lea.hbm %s6251_s4, 1024 }
  0x6a   :  { %p5156_p6 = scmp.ne.s32.totalorder %s6251_s4, %s5155_s3  ;;  %p5159_p7 = scmp.lt.u32.totalorder %s5155_s3, %s6251_s4 }
  0x6c   :  { %p5161_p8 = pnand %p5159_p7, %p5156_p6 }
  0x6e   :  { %5164 = shalt.err (!%p5161_p8)
}
  0x6f   :  { %s5165_s29 = scalar_lea.vmem %s72_s10, 1024  ;;  %p5170_p10 = scmp.lt.s32.totalorder %s72_s10, %s72_s10 }
  0x70   :  { %p5166_p9 = scmp.ne.s32.totalorder %s72_s10, %s5165_s29  ;;  %p5171_p11 = scmp.lt.s32.totalorder %s5165_s29, %s5165_s29 }
  0x72   :  { %p5172_p12 = por %p5171_p11, %p5170_p10 }
  0x74   :  { %p5173_p13 = pnand %p5172_p12, %p5166_p9 }
  0x76   :  { %5176 = shalt.err (!%p5173_p13)
}
  0x77   :  { %77 = dma.hbm_to_vmem [thread:$0]  %s6251_s4, 1024, %s72_s10, [#allocation11], %s5262_s26, %s5262_s26, %s5263_s17  }
  0x78   :  { %s5266_s20 = smov [#allocation15]   ;;  %s5267_s13 = smov [#allocation18]  }
  0x79   :  { %s94_s12 = sshll.u32 %s5266_s20, 4  ;;  %s116_s1 = sshll.u32 %s5267_s13, 4  ;;  %s95_s12 = int_to_ptr.vmem [resolvable:$true] %s94_s12  ;;  %s117_s1 = int_to_ptr.vmem [resolvable:$true] %s116_s1 }
  0x7a   :  { %s5177_s16 = scalar_lea.hbm %s6253_s6, 16 }
  0x7b   :  { %p5178_p0 = scmp.ne.s32.totalorder %s6253_s6, %s5177_s16  ;;  %p5181_p1 = scmp.lt.u32.totalorder %s5177_s16, %s6253_s6 }
  0x7d   :  { %p5183_p2 = pnand %p5181_p1, %p5178_p0 }
  0x7f   :  { %5186 = shalt.err (!%p5183_p2)
}
  0x80   :  { %s5187_s4 = scalar_lea.vmem %s95_s12, 16  ;;  %s5191_s26 = scalar_lea.vmem %s95_s12, 32 }
  0x81   :  { %p5188_p3 = scmp.ne.s32.totalorder %s95_s12, %s5187_s4  ;;  %p5192_p4 = scmp.lt.s32.totalorder %s95_s12, %s95_s12 }
  0x82   :  { %p5193_p5 = scmp.lt.s32.totalorder %s5191_s26, %s5187_s4 }
  0x84   :  { %p5194_p6 = por %p5193_p5, %p5192_p4 }
  0x86   :  { %p5195_p7 = pnand %p5194_p6, %p5188_p3 }
  0x88   :  { %5198 = shalt.err (!%p5195_p7)
}
  0x89   :  { %97 = dma.hbm_to_vmem [thread:$0]  %s6253_s6, 16, %s95_s12, [#allocation14]  }
  0x8a   :  { %s5199_s23 = scalar_lea.hbm %s6255_s8, 16 }
  0x8b   :  { %p5200_p8 = scmp.ne.s32.totalorder %s6255_s8, %s5199_s23  ;;  %p5203_p9 = scmp.lt.u32.totalorder %s5199_s23, %s6255_s8 }
  0x8d   :  { %p5205_p10 = pnand %p5203_p9, %p5200_p8 }
  0x8f   :  { %5208 = shalt.err (!%p5205_p10)
}
  0x90   :  { %s5209_s28 = scalar_lea.vmem %s117_s1, 16  ;;  %s5213_s30 = scalar_lea.vmem %s117_s1, 32 }
  0x91   :  { %p5210_p11 = scmp.ne.s32.totalorder %s117_s1, %s5209_s28  ;;  %p5214_p12 = scmp.lt.s32.totalorder %s117_s1, %s117_s1 }
  0x92   :  { %p5215_p13 = scmp.lt.s32.totalorder %s5213_s30, %s5209_s28 }
  0x94   :  { %p5216_p0 = por %p5215_p13, %p5214_p12 }
  0x96   :  { %p5217_p1 = pnand %p5216_p0, %p5210_p11 }
  0x98   :  { %5220 = shalt.err (!%p5217_p1)
}
  0x99   :  { %119 = dma.hbm_to_vmem [thread:$0]  %s6255_s8, 16, %s117_s1, [#allocation17]  }
  0x9a   :  { %5243 = dma.done.wait [#allocation5], 1024  }
  0x9b   :  { %5244 = vsyncadd [#allocation5], 4294966272 }
  0x9c   :  { %5245 = dma.done.wait [#allocation8], 8192  }
  0x9d   :  { %5246 = vsyncadd [#allocation8], 4294959104 }
  0x9e   :  { %5247 = dma.done.wait [#allocation11], 1088  }
  0x9f   :  { %5248 = vsyncadd [#allocation11], 4294966208 }
  0xa0   :  { %5249 = dma.done.wait [#allocation14], 32  }
  0xa1   :  { %5250 = vsyncadd [#allocation14], 4294967264 }
  0xa2   :  { %5251 = dma.done.wait [#allocation17], 1040  }
  0xa3   :  { %5252 = vsyncadd [#allocation17], 4294966256  ;;  %v6257_v0 = vmov 0   ;;  %v4483_v1 = vld [vmem:[#allocation7 + $0x4] ss:$16 sps:$4 sm:$0xff]   ;;  %v4535_v43 = vld [vmem:[#allocation4 + $0x8] sm:$0xff]  }
  0xa4   :  { %458 = vmatprep.mubr.bf16.mxu0 %v6257_v0  ;;  %571 = vmatprep.mubr.bf16.mxu1 %v6257_v0  ;;  %v4485_v2 = vld [vmem:[#allocation7 + $0xc] ss:$16 sps:$4 sm:$0xff]   ;;  %v4487_v3 = vld [vmem:[#allocation7] ss:$16 sps:$4 sm:$0xff]   ;;  %v4488_v4 = vld [vmem:[#allocation7 + $0x8] ss:$16 sps:$4 sm:$0xff]  }
  0xa5   :  { %426 = vmatprep.subr.bf16.mxu0 %v4483_v1  ;;  %539 = vmatprep.subr.bf16.mxu1 %v4485_v2  ;;  %v4489_v5 = vld [vmem:[#allocation7 + $0x24] ss:$16 sps:$4 sm:$0xff]   ;;  %v4491_v6 = vld [vmem:[#allocation7 + $0x2c] ss:$16 sps:$4 sm:$0xff]   ;;  %v4493_v7 = vld [vmem:[#allocation7 + $0x20] ss:$16 sps:$4 sm:$0xff]  }
  0xa6   :  { %427 = vmatpush1.bf16.msra.mxu0 %v4487_v3  ;;  %540 = vmatpush1.bf16.msra.mxu1 %v4488_v4  ;;  %v4494_v8 = vld [vmem:[#allocation7 + $0x28] ss:$16 sps:$4 sm:$0xff]   ;;  %v4495_v9 = vld [vmem:[#allocation7 + $0x44] ss:$16 sps:$4 sm:$0xff]   ;;  %v4497_v10 = vld [vmem:[#allocation7 + $0x4c] ss:$16 sps:$4 sm:$0xff]  }
  0xa7   :  { %428 = vmatprep.subr.bf16.mxu0 %v4489_v5  ;;  %541 = vmatprep.subr.bf16.mxu1 %v4491_v6  ;;  %v4499_v11 = vld [vmem:[#allocation7 + $0x40] ss:$16 sps:$4 sm:$0xff]   ;;  %v4500_v12 = vld [vmem:[#allocation7 + $0x48] ss:$16 sps:$4 sm:$0xff]   ;;  %v4501_v13 = vld [vmem:[#allocation7 + $0x64] ss:$16 sps:$4 sm:$0xff]  }
  0xa8   :  { %v4503_v14 = vld [vmem:[#allocation7 + $0x6c] ss:$16 sps:$4 sm:$0xff]   ;;  %v4505_v15 = vld [vmem:[#allocation7 + $0x60] ss:$16 sps:$4 sm:$0xff]   ;;  %v4506_v16 = vld [vmem:[#allocation7 + $0x68] ss:$16 sps:$4 sm:$0xff]  }
  0xa9   :  { %v4507_v17 = vld [vmem:[#allocation7 + $0x84] ss:$16 sps:$4 sm:$0xff]   ;;  %v4509_v18 = vld [vmem:[#allocation7 + $0x8c] ss:$16 sps:$4 sm:$0xff]   ;;  %v4511_v19 = vld [vmem:[#allocation7 + $0x80] ss:$16 sps:$4 sm:$0xff]  }
  0xaa   :  { %429 = vmatpush1.bf16.msra.mxu0 %v4493_v7  ;;  %542 = vmatpush1.bf16.msra.mxu1 %v4494_v8  ;;  %v4512_v20 = vld [vmem:[#allocation7 + $0x88] ss:$16 sps:$4 sm:$0xff]   ;;  %v4513_v21 = vld [vmem:[#allocation7 + $0xa4] ss:$16 sps:$4 sm:$0xff]   ;;  %v4515_v22 = vld [vmem:[#allocation7 + $0xac] ss:$16 sps:$4 sm:$0xff]  }
  0xab   :  { %430 = vmatprep.subr.bf16.mxu0 %v4495_v9  ;;  %543 = vmatprep.subr.bf16.mxu1 %v4497_v10  ;;  %v4517_v23 = vld [vmem:[#allocation7 + $0xa0] ss:$16 sps:$4 sm:$0xff]   ;;  %v4518_v24 = vld [vmem:[#allocation7 + $0xa8] ss:$16 sps:$4 sm:$0xff]   ;;  %v4519_v25 = vld [vmem:[#allocation7 + $0xc4] ss:$16 sps:$4 sm:$0xff]   ;;  %v198_v10 = vlaneseq }
  0xac   :  { %v4521_v26 = vld [vmem:[#allocation7 + $0xcc] ss:$16 sps:$4 sm:$0xff]   ;;  %v4523_v27 = vld [vmem:[#allocation7 + $0xc0] ss:$16 sps:$4 sm:$0xff]   ;;  %v4524_v28 = vld [vmem:[#allocation7 + $0xc8] ss:$16 sps:$4 sm:$0xff]  }
  0xad   :  { %v4525_v29 = vld [vmem:[#allocation7 + $0xe4] ss:$16 sps:$4 sm:$0xff]   ;;  %v4527_v30 = vld [vmem:[#allocation7 + $0xec] ss:$16 sps:$4 sm:$0xff]   ;;  %v4529_v31 = vld [vmem:[#allocation7 + $0xe0] ss:$16 sps:$4 sm:$0xff]  }
  0xae   :  { %431 = vmatpush1.bf16.msra.mxu0 %v4499_v11  ;;  %544 = vmatpush1.bf16.msra.mxu1 %v4500_v12  ;;  %v4530_v32 = vld [vmem:[#allocation7 + $0xe8] ss:$16 sps:$4 sm:$0xff]   ;;  %v5449_v33 = vld [vmem:[#allocation9 + $0x4] ss:$16 sps:$4 sm:$0xff]   ;;  %v5451_v34 = vld [vmem:[#allocation9 + $0xc] ss:$16 sps:$4 sm:$0xff]  }
  0xaf   :  { %432 = vmatprep.subr.bf16.mxu0 %v4501_v13  ;;  %545 = vmatprep.subr.bf16.mxu1 %v4503_v14  ;;  %v4531_v35 = vld [vmem:[#allocation4] sm:$0xff]   ;;  %v5459_v38 = vld [vmem:[#allocation9 + $0x8] ss:$16 sps:$4 sm:$0xff]   ;;  %v5461_v39 = vld [vmem:[#allocation9 + $0x2c] ss:$16 sps:$4 sm:$0xff]   ;;  %v199_v11 = vshrl.u32 %v198_v10, 7 }
  0xb0   :  { %v5453_v36 = vld [vmem:[#allocation9] ss:$16 sps:$4 sm:$0xff]   ;;  %v5456_v37 = vld [vmem:[#allocation9 + $0x24] ss:$16 sps:$4 sm:$0xff]   ;;  %v5472_v42 = vld [vmem:[#allocation9 + $0x28] ss:$16 sps:$4 sm:$0xff]  }
  0xb1   :  { %v5465_v40 = vld [vmem:[#allocation9 + $0x20] ss:$16 sps:$4 sm:$0xff]   ;;  %v5469_v41 = vld [vmem:[#allocation9 + $0x44] ss:$16 sps:$4 sm:$0xff]   ;;  %v5481_v46 = vld [vmem:[#allocation9 + $0x4c] ss:$16 sps:$4 sm:$0xff]  }
  0xb2   :  { %433 = vmatpush1.bf16.msra.mxu0 %v4505_v15  ;;  %546 = vmatpush1.bf16.msra.mxu1 %v4506_v16  ;;  %v5476_v44 = vld [vmem:[#allocation9 + $0x40] ss:$16 sps:$4 sm:$0xff]   ;;  %v5479_v45 = vld [vmem:[#allocation9 + $0x64] ss:$16 sps:$4 sm:$0xff]   ;;  %v5484_v47 = vld [vmem:[#allocation9 + $0x48] ss:$16 sps:$4 sm:$0xff]  }
  0xb3   :  { %434 = vmatprep.subr.bf16.mxu0 %v4507_v17  ;;  %547 = vmatprep.subr.bf16.mxu1 %v4509_v18  ;;  %v5486_v48 = vld [vmem:[#allocation9 + $0x6c] ss:$16 sps:$4 sm:$0xff]   ;;  %v5491_v49 = vld [vmem:[#allocation9 + $0x60] ss:$16 sps:$4 sm:$0xff]   ;;  %v5494_v50 = vld [vmem:[#allocation9 + $0x84] ss:$16 sps:$4 sm:$0xff]  }
  0xb4   :  { %v5498_v51 = vld [vmem:[#allocation9 + $0x68] ss:$16 sps:$4 sm:$0xff]   ;;  %v4542_v52 = vld [vmem:[#allocation4 + $0x10] sm:$0xff]   ;;  %v5504_v54 = vld [vmem:[#allocation9 + $0x8c] ss:$16 sps:$4 sm:$0xff]   ;;  %v208_v12 = vsub.s32 2, %v199_v11 }
  0xb5   :  { %v5501_v53 = vld [vmem:[#allocation9 + $0x80] ss:$16 sps:$4 sm:$0xff]   ;;  %v5507_v55 = vld [vmem:[#allocation9 + $0xa4] ss:$16 sps:$4 sm:$0xff]   ;;  %v5510_v56 = vld [vmem:[#allocation9 + $0x88] ss:$16 sps:$4 sm:$0xff]  }
  0xb6   :  { %435 = vmatpush1.bf16.msra.mxu0 %v4511_v19  ;;  %548 = vmatpush1.bf16.msra.mxu1 %v4512_v20  ;;  %v5512_v57 = vld [vmem:[#allocation9 + $0xac] ss:$16 sps:$4 sm:$0xff]   ;;  %v5514_v58 = vld [vmem:[#allocation9 + $0xa0] ss:$16 sps:$4 sm:$0xff]   ;;  %v5518_v59 = vld [vmem:[#allocation9 + $0xc4] ss:$16 sps:$4 sm:$0xff]  }
  0xb7   :  { %436 = vmatprep.subr.bf16.mxu0 %v4513_v21  ;;  %549 = vmatprep.subr.bf16.mxu1 %v4515_v22  ;;  %v5520_v60 = vld [vmem:[#allocation9 + $0xa8] ss:$16 sps:$4 sm:$0xff]   ;;  %v5526_v62 = vld [vmem:[#allocation9 + $0xc0] ss:$16 sps:$4 sm:$0xff]   ;;  %v5529_v63 = vld [vmem:[#allocation9 + $0xcc] ss:$16 sps:$4 sm:$0xff]  }
  0xb8   :  { %v4549_v61 = vld [vmem:[#allocation4 + $0x18] sm:$0xff]   ;;  %v5531_v1 = vld [vmem:[#allocation9 + $0xe4] ss:$16 sps:$4 sm:$0xff]   ;;  %v5540_v4 = vld [vmem:[#allocation9 + $0xe0] ss:$16 sps:$4 sm:$0xff]   ;;  %v212_v13 = vsub.s32 3, %v199_v11 }
  0xb9   :  { %v5533_v2 = vld [vmem:[#allocation9 + $0xc8] ss:$16 sps:$4 sm:$0xff]   ;;  %v5536_v3 = vld [vmem:[#allocation9 + $0xec] ss:$16 sps:$4 sm:$0xff]   ;;  %v4556_v6 = vld [vmem:[#allocation4 + $0x20] sm:$0xff]   ;;  %v200_v14 = vsub.s32 0, %v199_v11 }
  0xba   :  { %437 = vmatpush1.bf16.msra.mxu0 %v4517_v23  ;;  %550 = vmatpush1.bf16.msra.mxu1 %v4518_v24  ;;  %v5544_v5 = vld [vmem:[#allocation9 + $0xe8] ss:$16 sps:$4 sm:$0xff]   ;;  %v4570_v8 = vld [vmem:[#allocation4 + $0x30] sm:$0xff]   ;;  %v196_v15 = vld [vmem:[#allocation10] sm:$0xf]  ;;  %v204_v16 = vsub.s32 1, %v199_v11 }
  0xbb   :  { %438 = vmatprep.subr.bf16.mxu0 %v4519_v25  ;;  %551 = vmatprep.subr.bf16.mxu1 %v4521_v26  ;;  %v4563_v7 = vld [vmem:[#allocation4 + $0x28] sm:$0xff]   ;;  %v4577_v9 = vld [vmem:[#allocation4 + $0x38] sm:$0xff]   ;;  %v5597_v17 = vrot.slane %v196_v15, %v208_v12  ;;  %v5599_v18 = vrot.slane %v196_v15, %v212_v13  ;;  %v5601_v19 = vrot.slane %v196_v15, %v200_v14  ;;  %vm5270_vm0 = vmmov 0   ;;  %s5271_s8 = smov [#allocation19]  }
  0xbc   :  { %v5603_v21 = vrot.slane %v196_v15, %v204_v16  ;;  %vm4000_vm1 = vcmask 523264   ;;  %s4008_s29 = sshll.u32 %s5271_s8, 4  ;;  %s4009_s29 = int_to_ptr.vmem [resolvable:$true] %s4008_s29 }
  0xbd   :  { %s5221_s2 = scalar_lea.vmem %s4009_s29, 256  ;;  %p5226_p3 = scmp.lt.s32.totalorder %s4009_s29, %s4009_s29 }
  0xbe   :  { %439 = vmatpush1.bf16.msra.mxu0 %v4523_v27  ;;  %552 = vmatpush1.bf16.msra.mxu1 %v4524_v28  ;;  %p5222_p2 = scmp.ne.s32.totalorder %s4009_s29, %s5221_s2  ;;  %p5227_p4 = scmp.lt.s32.totalorder %s5221_s2, %s5221_s2 }
  0xbf   :  { %440 = vmatprep.subr.bf16.mxu0 %v4525_v29  ;;  %553 = vmatprep.subr.bf16.mxu1 %v4527_v30 }
  0xc0   :  { %p5228_p5 = por %p5227_p4, %p5226_p3 }
  0xc2   :  { %441 = vmatpush1.bf16.msra.mxu0 %v4529_v31  ;;  %554 = vmatpush1.bf16.msra.mxu1 %v4530_v32  ;;  %p5229_p6 = pnand %p5228_p5, %p5222_p2 }
  0xc3   :  { %920 = vmatprep.subr.bf16.mxu0 %v5449_v33  ;;  %963 = vmatprep.subr.bf16.mxu1 %v5451_v34 }
  0xc5   :  { %459 = vmatmul.mubr.bf16.vlgmr.msra.gmra.mrb[0].mxu0 %v4531_v35  ;;  %572 = vmatmul.mubr.bf16.vlgmr.msra.gmra.mrb[0].mxu1 %v4531_v35 }
  0xc6   :  { %921 = vmatpush1.bf16.msra.mxu0 %v5453_v36  ;;  %468 = vmatprep.mubr.bf16.mxu0 %v6257_v0 }
  0xc7   :  { %581 = vmatprep.mubr.bf16.mxu1 %v6257_v0  ;;  %922 = vmatprep.subr.bf16.mxu0 %v5456_v37 }
  0xc8   :  { %964 = vmatpush1.bf16.msra.mxu1 %v5459_v38 }
  0xc9   :  { %965 = vmatprep.subr.bf16.mxu1 %v5461_v39 }
  0xca   :  { %923 = vmatpush1.bf16.msra.mxu0 %v5465_v40 }
  0xcb   :  { %924 = vmatprep.subr.bf16.mxu0 %v5469_v41 }
  0xcc   :  { %966 = vmatpush1.bf16.msra.mxu1 %v5472_v42 }
  0xcd   :  { %469 = vmatmul.mubr.bf16.gmra.mrb[4].mxu0 %v4535_v43  ;;  %582 = vmatmul.mubr.bf16.gmra.mrb[4].mxu1 %v4535_v43 }
  0xce   :  { %478 = vmatprep.mubr.bf16.mxu0 %v6257_v0  ;;  %591 = vmatprep.mubr.bf16.mxu1 %v6257_v0 }
  0xcf   :  { %925 = vmatpush1.bf16.msra.mxu0 %v5476_v44  ;;  %967 = vmatprep.subr.bf16.mxu1 %v5481_v46 }
  0xd0   :  { %926 = vmatprep.subr.bf16.mxu0 %v5479_v45  ;;  %968 = vmatpush1.bf16.msra.mxu1 %v5484_v47 }
  0xd1   :  { %969 = vmatprep.subr.bf16.mxu1 %v5486_v48 }
  0xd3   :  { %927 = vmatpush1.bf16.msra.mxu0 %v5491_v49 }
  0xd4   :  { %928 = vmatprep.subr.bf16.mxu0 %v5494_v50  ;;  %970 = vmatpush1.bf16.msra.mxu1 %v5498_v51 }
  0xd5   :  { %479 = vmatmul.mubr.bf16.gmra.mrb[8].mxu0 %v4542_v52  ;;  %592 = vmatmul.mubr.bf16.gmra.mrb[8].mxu1 %v4542_v52 }
  0xd6   :  { %488 = vmatprep.mubr.bf16.mxu0 %v6257_v0  ;;  %601 = vmatprep.mubr.bf16.mxu1 %v6257_v0 }
  0xd7   :  { %929 = vmatpush1.bf16.msra.mxu0 %v5501_v53  ;;  %971 = vmatprep.subr.bf16.mxu1 %v5504_v54 }
  0xd8   :  { %930 = vmatprep.subr.bf16.mxu0 %v5507_v55  ;;  %972 = vmatpush1.bf16.msra.mxu1 %v5510_v56 }
  0xd9   :  { %973 = vmatprep.subr.bf16.mxu1 %v5512_v57 }
  0xdb   :  { %931 = vmatpush1.bf16.msra.mxu0 %v5514_v58 }
  0xdc   :  { %932 = vmatprep.subr.bf16.mxu0 %v5518_v59  ;;  %974 = vmatpush1.bf16.msra.mxu1 %v5520_v60 }
  0xdd   :  { %489 = vmatmul.mubr.bf16.gmra.mrb[12].mxu0 %v4549_v61  ;;  %602 = vmatmul.mubr.bf16.gmra.mrb[12].mxu1 %v4549_v61 }
  0xde   :  { %498 = vmatprep.mubr.bf16.mxu0 %v6257_v0  ;;  %611 = vmatprep.mubr.bf16.mxu1 %v6257_v0 }
  0xdf   :  { %933 = vmatpush1.bf16.msra.mxu0 %v5526_v62  ;;  %975 = vmatprep.subr.bf16.mxu1 %v5529_v63 }
  0xe0   :  { %934 = vmatprep.subr.bf16.mxu0 %v5531_v1  ;;  %976 = vmatpush1.bf16.msra.mxu1 %v5533_v2 }
  0xe1   :  { %977 = vmatprep.subr.bf16.mxu1 %v5536_v3 }
  0xe3   :  { %935 = vmatpush1.bf16.msra.mxu0 %v5540_v4 }
  0xe4   :  { %978 = vmatpush1.bf16.msra.mxu1 %v5544_v5  ;;  %1269 = vmatprep.subr.bf16.mxu0 %v5449_v33 }
  0xe5   :  { %499 = vmatmul.mubr.bf16.gmra.mrb[16].mxu0 %v4556_v6  ;;  %612 = vmatmul.mubr.bf16.gmra.mrb[16].mxu1 %v4556_v6 }
  0xe6   :  { %508 = vmatprep.mubr.bf16.mxu0 %v6257_v0  ;;  %621 = vmatprep.mubr.bf16.mxu1 %v6257_v0 }
  0xe7   :  { %1312 = vmatprep.subr.bf16.mxu1 %v5451_v34 }
  0xed   :  { %509 = vmatmul.mubr.bf16.gmra.mrb[20].mxu0 %v4563_v7  ;;  %622 = vmatmul.mubr.bf16.gmra.mrb[20].mxu1 %v4563_v7 }
  0xee   :  { %518 = vmatprep.mubr.bf16.mxu0 %v6257_v0  ;;  %631 = vmatprep.mubr.bf16.mxu1 %v6257_v0 }
  0xf5   :  { %519 = vmatmul.mubr.bf16.gmra.mrb[24].mxu0 %v4570_v8  ;;  %632 = vmatmul.mubr.bf16.gmra.mrb[24].mxu1 %v4570_v8 }
  0xf6   :  { %528 = vmatprep.mubr.bf16.mxu0 %v6257_v0  ;;  %641 = vmatprep.mubr.bf16.mxu1 %v6257_v0 }
  0xfd   :  { %529 = vmatmul.mubr.bf16.gmra.mrb[28].mxu0 %v4577_v9  ;;  %642 = vmatmul.mubr.bf16.gmra.mrb[28].mxu1 %v4577_v9 }
  0xfe   :  { %952 = vmatprep.mubr.bf16.mxu0 %v6257_v0  ;;  %995 = vmatprep.mubr.bf16.mxu1 %v6257_v0 }
 0x105   :  { %953 = vmatmul.mubr.bf16.vlgmr.msra.gmra.mrb[32].mxu0 %v6257_v0  ;;  %996 = vmatmul.mubr.bf16.vlgmr.msra.gmra.mrb[32].mxu1 %v6257_v0 }
 0x106   :  { %1270 = vmatpush1.bf16.msra.mxu0 %v5453_v36  ;;  %1313 = vmatpush1.bf16.msra.mxu1 %v5459_v38 }
 0x107   :  { %1271 = vmatprep.subr.bf16.mxu0 %v5456_v37  ;;  %1314 = vmatprep.subr.bf16.mxu1 %v5461_v39 }
 0x108   :  { %1301 = vmatprep.mubr.bf16.mxu0 %v6257_v0  ;;  %1344 = vmatprep.mubr.bf16.mxu1 %v6257_v0 }
 0x10a   :  { %1272 = vmatpush1.bf16.msra.mxu0 %v5465_v40  ;;  %1315 = vmatpush1.bf16.msra.mxu1 %v5472_v42 }
 0x10b   :  { %1273 = vmatprep.subr.bf16.mxu0 %v5469_v41  ;;  %1316 = vmatprep.subr.bf16.mxu1 %v5481_v46 }
 0x10e   :  { %1274 = vmatpush1.bf16.msra.mxu0 %v5476_v44  ;;  %1317 = vmatpush1.bf16.msra.mxu1 %v5484_v47 }
 0x10f   :  { %1275 = vmatprep.subr.bf16.mxu0 %v5479_v45  ;;  %1318 = vmatprep.subr.bf16.mxu1 %v5486_v48 }
 0x112   :  { %1276 = vmatpush1.bf16.msra.mxu0 %v5491_v49  ;;  %1319 = vmatpush1.bf16.msra.mxu1 %v5498_v51 }
 0x113   :  { %1277 = vmatprep.subr.bf16.mxu0 %v5494_v50  ;;  %1320 = vmatprep.subr.bf16.mxu1 %v5504_v54 }
 0x116   :  { %1278 = vmatpush1.bf16.msra.mxu0 %v5501_v53  ;;  %1321 = vmatpush1.bf16.msra.mxu1 %v5510_v56 }
 0x117   :  { %1279 = vmatprep.subr.bf16.mxu0 %v5507_v55  ;;  %1322 = vmatprep.subr.bf16.mxu1 %v5512_v57 }
 0x11a   :  { %1280 = vmatpush1.bf16.msra.mxu0 %v5514_v58  ;;  %1323 = vmatpush1.bf16.msra.mxu1 %v5520_v60 }
 0x11b   :  { %1281 = vmatprep.subr.bf16.mxu0 %v5518_v59  ;;  %1324 = vmatprep.subr.bf16.mxu1 %v5529_v63 }
 0x11e   :  { %1282 = vmatpush1.bf16.msra.mxu0 %v5526_v62  ;;  %1325 = vmatpush1.bf16.msra.mxu1 %v5533_v2 }
 0x11f   :  { %1283 = vmatprep.subr.bf16.mxu0 %v5531_v1  ;;  %1326 = vmatprep.subr.bf16.mxu1 %v5536_v3 }
 0x122   :  { %1284 = vmatpush1.bf16.msra.mxu0 %v5540_v4  ;;  %1327 = vmatpush1.bf16.msra.mxu1 %v5544_v5 }
 0x198   :  { %v460_v20 = vpop.f32.mrb[0].mxu0  ;;  %v573_v22 = vpop.f32.mrb[0].mxu1 }
 0x199   :  { %v462_v23 = vpop.f32.mrb[1].mxu0  ;;  %v574_v24 = vadd.f32 %v573_v22, %v5597_v17  ;;  %v575_v25 = vpop.f32.mrb[1].mxu1  ;;  %v461_v29 = vadd.f32 %v460_v20, %v5601_v19 }
 0x19a   :  { %v464_v26 = vpop.f32.mrb[2].mxu0  ;;  %v576_v27 = vadd.f32 %v575_v25, %v5599_v18  ;;  %v577_v28 = vpop.f32.mrb[2].mxu1  ;;  %v463_v34 = vadd.f32 %v462_v23, %v5603_v21 }
 0x19b   :  { %v465_v30 = vadd.f32 %v464_v26, %v5601_v19  ;;  %v466_v31 = vpop.f32.mrb[3].mxu0  ;;  %v578_v32 = vadd.f32 %v577_v28, %v5597_v17  ;;  %v579_v33 = vpop.f32.mrb[3].mxu1 }
 0x19c   :  { %v467_v35 = vadd.f32 %v466_v31, %v5603_v21  ;;  %v580_v36 = vadd.f32 %v579_v33, %v5599_v18 }
 0x19d   :  { %v5613_v37 = vpack.c.bf16 %v465_v30, %v461_v29  ;;  %v5615_v38 = vpack.c.bf16 %v578_v32, %v574_v24 }
 0x19e   :  { %v5617_v39 = vpack.c.bf16 %v467_v35, %v463_v34  ;;  %v5619_v40 = vpack.c.bf16 %v580_v36, %v576_v27 }
 0x1a0   :  { %v470_v41 = vpop.f32.mrb[4].mxu0  ;;  %v583_v42 = vpop.f32.mrb[4].mxu1 }
 0x1a1   :  { %v471_v43 = vadd.f32 %v470_v41, %v5601_v19  ;;  %v472_v44 = vpop.f32.mrb[5].mxu0  ;;  %v584_v45 = vadd.f32 %v583_v42, %v5597_v17  ;;  %v585_v49 = vpop.f32.mrb[5].mxu1 }
 0x1a2   :  { %v473_v50 = vadd.f32 %v472_v44, %v5603_v21  ;;  %v474_v52 = vpop.f32.mrb[6].mxu0  ;;  %v586_v53 = vadd.f32 %v585_v49, %v5599_v18  ;;  %v587_v55 = vpop.f32.mrb[6].mxu1 }
 0x1a3   :  { %v475_v58 = vadd.f32 %v474_v52, %v5601_v19  ;;  %v476_v61 = vpop.f32.mrb[7].mxu0  ;;  %v588_v6 = vadd.f32 %v587_v55, %v5597_v17  ;;  %v589_v7 = vpop.f32.mrb[7].mxu1 }
 0x1a4   :  { %v477_v8 = vadd.f32 %v476_v61, %v5603_v21  ;;  %v590_v9 = vadd.f32 %v589_v7, %v5599_v18 }
 0x1a5   :  { %v5629_v10 = vpack.c.bf16 %v475_v58, %v471_v43  ;;  %v5631_v11 = vpack.c.bf16 %v588_v6, %v584_v45 }
 0x1a6   :  { %v5633_v12 = vpack.c.bf16 %v477_v8, %v473_v50  ;;  %v5635_v13 = vpack.c.bf16 %v590_v9, %v586_v53 }
 0x1a8   :  { %v480_v14 = vpop.f32.mrb[8].mxu0  ;;  %v593_v15 = vpop.f32.mrb[8].mxu1 }
 0x1a9   :  { %v481_v16 = vadd.f32 %v480_v14, %v5601_v19  ;;  %v482_v20 = vpop.f32.mrb[9].mxu0  ;;  %v594_v22 = vadd.f32 %v593_v15, %v5597_v17  ;;  %v595_v23 = vpop.f32.mrb[9].mxu1 }
 0x1aa   :  { %v483_v24 = vadd.f32 %v482_v20, %v5603_v21  ;;  %v484_v25 = vpop.f32.mrb[10].mxu0  ;;  %v596_v26 = vadd.f32 %v595_v23, %v5599_v18  ;;  %v597_v27 = vpop.f32.mrb[10].mxu1 }
 0x1ab   :  { %v485_v28 = vadd.f32 %v484_v25, %v5601_v19  ;;  %v486_v29 = vpop.f32.mrb[11].mxu0  ;;  %v598_v30 = vadd.f32 %v597_v27, %v5597_v17  ;;  %v599_v31 = vpop.f32.mrb[11].mxu1 }
 0x1ac   :  { %v487_v32 = vadd.f32 %v486_v29, %v5603_v21  ;;  %v600_v33 = vadd.f32 %v599_v31, %v5599_v18 }
 0x1ad   :  { %v5645_v34 = vpack.c.bf16 %v485_v28, %v481_v16  ;;  %v5647_v35 = vpack.c.bf16 %v598_v30, %v594_v22 }
 0x1ae   :  { %v5649_v36 = vpack.c.bf16 %v487_v32, %v483_v24  ;;  %v5651_v41 = vpack.c.bf16 %v600_v33, %v596_v26 }
 0x1b0   :  { %v490_v42 = vpop.f32.mrb[12].mxu0  ;;  %v603_v43 = vpop.f32.mrb[12].mxu1 }
 0x1b1   :  { %v491_v44 = vadd.f32 %v490_v42, %v5601_v19  ;;  %v492_v45 = vpop.f32.mrb[13].mxu0  ;;  %v604_v49 = vadd.f32 %v603_v43, %v5597_v17  ;;  %v605_v50 = vpop.f32.mrb[13].mxu1 }
 0x1b2   :  { %v493_v52 = vadd.f32 %v492_v45, %v5603_v21  ;;  %v494_v53 = vpop.f32.mrb[14].mxu0  ;;  %v606_v55 = vadd.f32 %v605_v50, %v5599_v18  ;;  %v607_v58 = vpop.f32.mrb[14].mxu1 }
 0x1b3   :  { %v495_v61 = vadd.f32 %v494_v53, %v5601_v19  ;;  %v496_v6 = vpop.f32.mrb[15].mxu0  ;;  %v608_v7 = vadd.f32 %v607_v58, %v5597_v17  ;;  %v609_v8 = vpop.f32.mrb[15].mxu1 }
 0x1b4   :  { %v497_v9 = vadd.f32 %v496_v6, %v5603_v21  ;;  %v610_v14 = vadd.f32 %v609_v8, %v5599_v18 }
 0x1b5   :  { %v5661_v15 = vpack.c.bf16 %v495_v61, %v491_v44  ;;  %v5663_v16 = vpack.c.bf16 %v608_v7, %v604_v49 }
 0x1b6   :  { %v5665_v20 = vpack.c.bf16 %v497_v9, %v493_v52  ;;  %v5667_v22 = vpack.c.bf16 %v610_v14, %v606_v55 }
 0x1b8   :  { %6281 = vst [vmem:[#allocation26_spill] sm:$0xff] %v5665_v20  ;;  %6282 = vst [vmem:[#allocation27_spill] sm:$0xff] %v5667_v22  ;;  %v500_v23 = vpop.f32.mrb[16].mxu0  ;;  %v613_v24 = vpop.f32.mrb[16].mxu1 }
 0x1b9   :  { %v501_v25 = vadd.f32 %v500_v23, %v5601_v19  ;;  %v502_v26 = vpop.f32.mrb[17].mxu0  ;;  %v614_v27 = vadd.f32 %v613_v24, %v5597_v17  ;;  %v615_v28 = vpop.f32.mrb[17].mxu1 }
 0x1ba   :  { %v503_v29 = vadd.f32 %v502_v26, %v5603_v21  ;;  %v504_v30 = vpop.f32.mrb[18].mxu0  ;;  %v616_v31 = vadd.f32 %v615_v28, %v5599_v18  ;;  %v617_v32 = vpop.f32.mrb[18].mxu1 }
 0x1bb   :  { %v505_v33 = vadd.f32 %v504_v30, %v5601_v19  ;;  %v506_v42 = vpop.f32.mrb[19].mxu0  ;;  %v618_v43 = vadd.f32 %v617_v32, %v5597_v17  ;;  %v619_v44 = vpop.f32.mrb[19].mxu1 }
 0x1bc   :  { %v507_v45 = vadd.f32 %v506_v42, %v5603_v21  ;;  %v620_v49 = vadd.f32 %v619_v44, %v5599_v18 }
 0x1bd   :  { %v5677_v50 = vpack.c.bf16 %v505_v33, %v501_v25  ;;  %v5679_v52 = vpack.c.bf16 %v618_v43, %v614_v27 }
 0x1be   :  { %v5681_v53 = vpack.c.bf16 %v507_v45, %v503_v29  ;;  %v5683_v55 = vpack.c.bf16 %v620_v49, %v616_v31 }
 0x1bf   :  { %6283 = vst [vmem:[#allocation28_spill] sm:$0xff] %v5677_v50  ;;  %6284 = vst [vmem:[#allocation29_spill] sm:$0xff] %v5679_v52 }
 0x1c0   :  { %6285 = vst [vmem:[#allocation30_spill] sm:$0xff] %v5681_v53  ;;  %6286 = vst [vmem:[#allocation31_spill] sm:$0xff] %v5683_v55  ;;  %v510_v58 = vpop.f32.mrb[20].mxu0  ;;  %v623_v61 = vpop.f32.mrb[20].mxu1  ;;  %v1426_v55 = vunpack.c.h.bf16 %v5651_v41 }
 0x1c1   :  { %v511_v6 = vadd.f32 %v510_v58, %v5601_v19  ;;  %v512_v7 = vpop.f32.mrb[21].mxu0  ;;  %v624_v8 = vadd.f32 %v623_v61, %v5597_v17  ;;  %v625_v9 = vpop.f32.mrb[21].mxu1 }
 0x1c2   :  { %v513_v14 = vadd.f32 %v512_v7, %v5603_v21  ;;  %v514_v23 = vpop.f32.mrb[22].mxu0  ;;  %v626_v24 = vadd.f32 %v625_v9, %v5599_v18  ;;  %v627_v25 = vpop.f32.mrb[22].mxu1 }
 0x1c3   :  { %v515_v26 = vadd.f32 %v514_v23, %v5601_v19  ;;  %v516_v27 = vpop.f32.mrb[23].mxu0  ;;  %v628_v28 = vadd.f32 %v627_v25, %v5597_v17  ;;  %v629_v29 = vpop.f32.mrb[23].mxu1 }
 0x1c4   :  { %v517_v30 = vadd.f32 %v516_v27, %v5603_v21  ;;  %v630_v31 = vadd.f32 %v629_v29, %v5599_v18 }
 0x1c5   :  { %v5693_v32 = vpack.c.bf16 %v515_v26, %v511_v6  ;;  %v5695_v33 = vpack.c.bf16 %v628_v28, %v624_v8 }
 0x1c6   :  { %v5697_v42 = vpack.c.bf16 %v517_v30, %v513_v14  ;;  %v5699_v43 = vpack.c.bf16 %v630_v31, %v626_v24 }
 0x1c7   :  { %6287 = vst [vmem:[#allocation32_spill] sm:$0xff] %v5693_v32  ;;  %6288 = vst [vmem:[#allocation33_spill] sm:$0xff] %v5695_v33  ;;  %v1424_v32 = vunpack.c.h.bf16 %v5649_v36 }
 0x1c8   :  { %6289 = vst [vmem:[#allocation34_spill] sm:$0xff] %v5697_v42  ;;  %6290 = vst [vmem:[#allocation35_spill] sm:$0xff] %v5699_v43  ;;  %v520_v44 = vpop.f32.mrb[24].mxu0  ;;  %v633_v45 = vpop.f32.mrb[24].mxu1 }
 0x1c9   :  { %v521_v49 = vadd.f32 %v520_v44, %v5601_v19  ;;  %v522_v58 = vpop.f32.mrb[25].mxu0  ;;  %v634_v61 = vadd.f32 %v633_v45, %v5597_v17  ;;  %v635_v7 = vpop.f32.mrb[25].mxu1 }
 0x1ca   :  { %v523_v9 = vadd.f32 %v522_v58, %v5603_v21  ;;  %v524_v23 = vpop.f32.mrb[26].mxu0  ;;  %v636_v6 = vadd.f32 %v635_v7, %v5599_v18  ;;  %v637_v25 = vpop.f32.mrb[26].mxu1 }
 0x1cb   :  { %v525_v8 = vadd.f32 %v524_v23, %v5601_v19  ;;  %v526_v14 = vpop.f32.mrb[27].mxu0  ;;  %v638_v24 = vadd.f32 %v637_v25, %v5597_v17  ;;  %v639_v26 = vpop.f32.mrb[27].mxu1 }
 0x1cc   :  { %v527_v27 = vadd.f32 %v526_v14, %v5603_v21  ;;  %v640_v28 = vadd.f32 %v639_v26, %v5599_v18 }
 0x1cd   :  { %v5709_v29 = vpack.c.bf16 %v525_v8, %v521_v49  ;;  %v5711_v30 = vpack.c.bf16 %v638_v24, %v634_v61 }
 0x1ce   :  { %v5713_v31 = vpack.c.bf16 %v527_v27, %v523_v9  ;;  %v5715_v44 = vpack.c.bf16 %v640_v28, %v636_v6 }
 0x1cf   :  { %6291 = vst [vmem:[#allocation36_spill] sm:$0xff] %v5709_v29  ;;  %6292 = vst [vmem:[#allocation37_spill] sm:$0xff] %v5711_v30 }
 0x1d0   :  { %6293 = vst [vmem:[#allocation38_spill] sm:$0xff] %v5713_v31  ;;  %6294 = vst [vmem:[#allocation39_spill] sm:$0xff] %v5715_v44  ;;  %v530_v45 = vpop.f32.mrb[28].mxu0  ;;  %v643_v58 = vpop.f32.mrb[28].mxu1 }
 0x1d1   :  { %v531_v7 = vadd.f32 %v530_v45, %v5601_v19  ;;  %v532_v23 = vpop.f32.mrb[29].mxu0  ;;  %v644_v25 = vadd.f32 %v643_v58, %v5597_v17  ;;  %v645_v0 = vpop.f32.mrb[29].mxu1 }
 0x1d2   :  { %v533_v14 = vadd.f32 %v532_v23, %v5603_v21  ;;  %v534_v43 = vpop.f32.mrb[30].mxu0  ;;  %v646_v49 = vadd.f32 %v645_v0, %v5599_v18  ;;  %v647_v8 = vpop.f32.mrb[30].mxu1  ;;  %v720_v0 = vunpack.c.l.bf16 %v5613_v37 }
 0x1d3   :  { %v535_v61 = vadd.f32 %v534_v43, %v5601_v19  ;;  %v536_v9 = vpop.f32.mrb[31].mxu0  ;;  %v648_v6 = vadd.f32 %v647_v8, %v5597_v17  ;;  %v649_v24 = vpop.f32.mrb[31].mxu1  ;;  %v722_v19 = vunpack.c.l.bf16 %v5615_v38  ;;  %v721_v17 = vunpack.c.l.bf16 %v5617_v39 }
 0x1d4   :  { %v537_v26 = vadd.f32 %v536_v9, %v5603_v21  ;;  %v650_v27 = vadd.f32 %v649_v24, %v5599_v18  ;;  %v723_v21 = vunpack.c.l.bf16 %v5619_v40 }
 0x1d5   :  { %v5725_v28 = vpack.c.bf16 %v535_v61, %v531_v7  ;;  %v5727_v45 = vpack.c.bf16 %v648_v6, %v644_v25  ;;  %v724_v25 = vunpack.c.h.bf16 %v5613_v37 }
 0x1d6   :  { %v5729_v58 = vpack.c.bf16 %v537_v26, %v533_v14  ;;  %v5731_v23 = vpack.c.bf16 %v650_v27, %v646_v49  ;;  %v726_v14 = vunpack.c.h.bf16 %v5615_v38  ;;  %v725_v26 = vunpack.c.h.bf16 %v5617_v39 }
 0x1d7   :  { %6295 = vst [vmem:[#allocation40_spill] sm:$0xff] %v5725_v28  ;;  %6296 = vst [vmem:[#allocation41_spill] sm:$0xff] %v5727_v45  ;;  %v727_v27 = vunpack.c.h.bf16 %v5619_v40 }
 0x1d8   :  { %6297 = vst [vmem:[#allocation42_spill] sm:$0xff] %v5729_v58  ;;  %6298 = vst [vmem:[#allocation43_spill] sm:$0xff] %v5731_v23  ;;  %v954_v43 = vpop.f32.mrb[32].mxu0  ;;  %v997_v44 = vpop.f32.mrb[32].mxu1 }
 0x1d9   :  { %v1006_v8 = vadd.f32 %v954_v43, %v720_v0  ;;  %v1008_v18 = vadd.f32 %v997_v44, %v722_v19  ;;  %v956_v7 = vpop.f32.mrb[33].mxu0  ;;  %v999_v61 = vpop.f32.mrb[33].mxu1 }
 0x1da   :  { %v1007_v49 = vadd.f32 %v956_v7, %v721_v17  ;;  %v1009_v9 = vadd.f32 %v999_v61, %v723_v21  ;;  %v958_v6 = vpop.f32.mrb[34].mxu0  ;;  %v1001_v24 = vpop.f32.mrb[34].mxu1 }
 0x1db   :  { %v4096_v23 = vmul.f32 -1.442695, %v1006_v8  ;;  %v1010_v58 = vadd.f32 %v958_v6, %v724_v25  ;;  %v1012_v45 = vadd.f32 %v1001_v24, %v726_v14  ;;  %v960_v28 = vpop.f32.mrb[35].mxu0  ;;  %v1003_v0 = vpop.f32.mrb[35].mxu1  ;;  %v4098_v38 = vmul.f32 -1.442695, %v1008_v18 }
 0x1dc   :  { %v4097_v44 = vmul.f32 -1.442695, %v1007_v49  ;;  %v1011_v19 = vadd.f32 %v960_v28, %v725_v26  ;;  %v1013_v43 = vadd.f32 %v1003_v0, %v727_v27 }
 0x1dd   :  { %4699 = vpow2.f32 %v4096_v23  ;;  %v4099_v37 = vmul.f32 -1.442695, %v1010_v58  ;;  %v4101_v17 = vmul.f32 -1.442695, %v1012_v45 }
 0x1de   :  { %v4100_v31 = vmul.f32 -1.442695, %v1011_v19  ;;  %4701 = vpow2.f32 %v4097_v44 }
 0x1df   :  { %4703 = vpow2.f32 %v4099_v37 }
 0x1e0   :  { %4705 = vpow2.f32 %v4100_v31 }
 0x1e1   :  { %4707 = vtanh.f32 %v1009_v9 }
 0x1e2   :  { %4709 = vpow2.f32 %v4098_v38 }
 0x1e3   :  { %4711 = vpow2.f32 %v4101_v17 }
 0x1e7   :  { %v4700_v21 = vpop.eup %4699 }
 0x1e8   :  { %v1032_v39 = vadd.f32 1.0, %v4700_v21  ;;  %v4702_v40 = vpop.eup %4701 }
 0x1e9   :  { %v4704_v8 = vpop.eup %4703  ;;  %v1033_v7 = vadd.f32 1.0, %v4702_v40 }
 0x1ea   :  { %4713 = vrcp.f32 %v1032_v39  ;;  %v1035_v61 = vadd.f32 1.0, %v4704_v8  ;;  %v4706_v28 = vpop.eup %4705 }
 0x1eb   :  { %4715 = vtanh.f32 %v1013_v43  ;;  %v1036_v58 = vadd.f32 1.0, %v4706_v28  ;;  %v4708_v23 = vpop.eup %4707  ;;  %v5755_v28 = vld [vmem:[#allocation9 + $0xc] ss:$16 sps:$4 sm:$0xff]  }
 0x1ec   :  { %4717 = vrcp.f32 %v1033_v7  ;;  %v4710_v31 = vpop.eup %4709  ;;  %v6300_v7 = vmov 0   ;;  %1662 = vmatprep.subr.bf16.mxu1 %v5755_v28 }
 0x1ed   :  { %4719 = vrcp.f32 %v1035_v61  ;;  %v4712_v18 = vpop.eup %4711  ;;  %v1034_v6 = vadd.f32 1.0, %v4710_v31  ;;  %v5753_v61 = vld [vmem:[#allocation9 + $0x4] ss:$16 sps:$4 sm:$0xff]  }
 0x1ee   :  { %4721 = vrcp.f32 %v1036_v58  ;;  %v1037_v44 = vadd.f32 1.0, %v4712_v18  ;;  %v5757_v58 = vld [vmem:[#allocation9] ss:$16 sps:$4 sm:$0xff]   ;;  %1619 = vmatprep.subr.bf16.mxu0 %v5753_v61  ;;  %v5765_v31 = vld [vmem:[#allocation9 + $0x24] ss:$16 sps:$4 sm:$0xff]  }
 0x1ef   :  { %4723 = vrcp.f32 %v1034_v6  ;;  %v5767_v18 = vld [vmem:[#allocation9 + $0x2c] ss:$16 sps:$4 sm:$0xff]   ;;  %v5788_v6 = vld [vmem:[#allocation9 + $0x60] ss:$16 sps:$4 sm:$0xff]  }
 0x1f4   :  { %v4714_v45 = vpop.eup %4713 }
 0x1f5   :  { %v4716_v25 = vpop.eup %4715  ;;  %v1054_v14 = vmul.f32 %v4714_v45, %v4708_v23  ;;  %v5759_v23 = vld [vmem:[#allocation9 + $0x8] ss:$16 sps:$4 sm:$0xff]   ;;  %v5769_v45 = vld [vmem:[#allocation9 + $0x20] ss:$16 sps:$4 sm:$0xff]  }
 0x1f6   :  { %v4718_v49 = vpop.eup %4717 }
 0x1f7   :  { %v4720_v9 = vpop.eup %4719  ;;  %v1052_v24 = vmul.f32 0.0, %v4718_v49  ;;  %v5780_v49 = vld [vmem:[#allocation9 + $0x40] ss:$16 sps:$4 sm:$0xff]  }
 0x1f8   :  { %v1055_v26 = vmul.f32 %v4720_v9, %v4716_v25  ;;  %v4722_v27 = vpop.eup %4721  ;;  %v5771_v25 = vld [vmem:[#allocation9 + $0x28] ss:$16 sps:$4 sm:$0xff]   ;;  %v5785_v9 = vld [vmem:[#allocation9 + $0x64] ss:$16 sps:$4 sm:$0xff]  }
 0x1f9   :  { %v5741_v0 = vadd.f32 %v1054_v14, %v1052_v24  ;;  %v1053_v19 = vmul.f32 0.0, %v4722_v27  ;;  %v4724_v37 = vpop.eup %4723  ;;  %v5777_v14 = vld [vmem:[#allocation9 + $0x44] ss:$16 sps:$4 sm:$0xff]  }
 0x1fa   :  { %v5795_v24 = vld [vmem:[#allocation9 + $0x84] ss:$16 sps:$4 sm:$0xff]  }
 0x1fb   :  { %4725 = vtanh.f32 %v5741_v0  ;;  %v5744_v43 = vadd.f32 %v1055_v26, %v1053_v19  ;;  %v5798_v26 = vld [vmem:[#allocation9 + $0xa4] ss:$16 sps:$4 sm:$0xff]   ;;  %v1074_v19 = vunpack.c.h.bf16 %v5633_v12 }
 0x1fc   :  { %4727 = vrcp.f32 %v1037_v44 }
 0x1fd   :  { %4729 = vtanh.f32 %v5744_v43 }
 0x205   :  { %v4726_v38 = vpop.eup %4725 }
 0x206   :  { %v4728_v17 = vpop.eup %4727  ;;  %v1060_v39 = vmul.f32 %v4726_v38, %v4724_v37  ;;  %v1076_v37 = vunpack.c.h.bf16 %v5635_v13 }
 0x207   :  { %v4730_v21 = vpop.eup %4729 }
 0x208   :  { %v1061_v40 = vmul.f32 %v4730_v21, %v4728_v17 }
 0x20a   :  { %v5747_v8 = vpack.c.bf16 %v1061_v40, %v1060_v39 }
 0x20c   :  { %6299 = vst [vmem:[#allocation44_spill] sm:$0xff] %v5747_v8  ;;  %1302 = vmatmul.mubr.bf16.vlgmr.msra.gmra.mrb[36].mxu0 %v5747_v8  ;;  %1345 = vmatmul.mubr.bf16.vlgmr.msra.gmra.mrb[36].mxu1 %v5747_v8  ;;  %v1425_v8 = vunpack.c.h.bf16 %v5647_v35 }
 0x20d   :  { %1651 = vmatprep.mubr.bf16.mxu0 %v6300_v7  ;;  %1694 = vmatprep.mubr.bf16.mxu1 %v6300_v7 }
 0x20e   :  { %1620 = vmatpush1.bf16.msra.mxu0 %v5757_v58  ;;  %1663 = vmatpush1.bf16.msra.mxu1 %v5759_v23 }
 0x20f   :  { %1621 = vmatprep.subr.bf16.mxu0 %v5765_v31  ;;  %1664 = vmatprep.subr.bf16.mxu1 %v5767_v18 }
 0x212   :  { %1622 = vmatpush1.bf16.msra.mxu0 %v5769_v45  ;;  %1665 = vmatpush1.bf16.msra.mxu1 %v5771_v25 }
 0x213   :  { %1666 = vmatprep.subr.bf16.mxu1 %v5481_v46  ;;  %1623 = vmatprep.subr.bf16.mxu0 %v5777_v14  ;;  %v5793_v46 = vld [vmem:[#allocation9 + $0x80] ss:$16 sps:$4 sm:$0xff]  }
 0x216   :  { %1624 = vmatpush1.bf16.msra.mxu0 %v5780_v49  ;;  %1667 = vmatpush1.bf16.msra.mxu1 %v5484_v47  ;;  %v5803_v47 = vld [vmem:[#allocation9 + $0xa0] ss:$16 sps:$4 sm:$0xff]  }
 0x217   :  { %1668 = vmatprep.subr.bf16.mxu1 %v5486_v48  ;;  %1625 = vmatprep.subr.bf16.mxu0 %v5785_v9  ;;  %v1069_v48 = vunpack.c.l.bf16 %v5629_v10 }
 0x21a   :  { %1626 = vmatpush1.bf16.msra.mxu0 %v5788_v6  ;;  %1669 = vmatpush1.bf16.msra.mxu1 %v5498_v51  ;;  %v1071_v51 = vunpack.c.l.bf16 %v5631_v11 }
 0x21b   :  { %1670 = vmatprep.subr.bf16.mxu1 %v5504_v54  ;;  %1627 = vmatprep.subr.bf16.mxu0 %v5795_v24 }
 0x21e   :  { %1628 = vmatpush1.bf16.msra.mxu0 %v5793_v46  ;;  %1671 = vmatpush1.bf16.msra.mxu1 %v5510_v56 }
 0x21f   :  { %1629 = vmatprep.subr.bf16.mxu0 %v5798_v26  ;;  %1672 = vmatprep.subr.bf16.mxu1 %v5512_v57  ;;  %v1070_v57 = vunpack.c.l.bf16 %v5633_v12 }
 0x222   :  { %1630 = vmatpush1.bf16.msra.mxu0 %v5803_v47  ;;  %1673 = vmatpush1.bf16.msra.mxu1 %v5520_v60 }
 0x223   :  { %1631 = vmatprep.subr.bf16.mxu0 %v5518_v59  ;;  %1674 = vmatprep.subr.bf16.mxu1 %v5529_v63  ;;  %v1072_v59 = vunpack.c.l.bf16 %v5635_v13 }
 0x226   :  { %1632 = vmatpush1.bf16.msra.mxu0 %v5526_v62  ;;  %1675 = vmatpush1.bf16.msra.mxu1 %v5533_v2  ;;  %v1073_v2 = vunpack.c.h.bf16 %v5629_v10 }
 0x227   :  { %1633 = vmatprep.subr.bf16.mxu0 %v5531_v1  ;;  %1676 = vmatprep.subr.bf16.mxu1 %v5536_v3  ;;  %v1075_v3 = vunpack.c.h.bf16 %v5631_v11 }
 0x22a   :  { %1634 = vmatpush1.bf16.msra.mxu0 %v5540_v4  ;;  %1677 = vmatpush1.bf16.msra.mxu1 %v5544_v5 }
 0x22b   :  { %1969 = vmatprep.subr.bf16.mxu0 %v5753_v61  ;;  %2012 = vmatprep.subr.bf16.mxu1 %v5755_v28 }
 0x2df   :  { %v1303_v54 = vpop.f32.mrb[36].mxu0  ;;  %v1346_v56 = vpop.f32.mrb[36].mxu1 }
 0x2e0   :  { %v1355_v60 = vadd.f32 %v1303_v54, %v1069_v48  ;;  %v1357_v62 = vadd.f32 %v1346_v56, %v1071_v51  ;;  %v1305_v63 = vpop.f32.mrb[37].mxu0  ;;  %v1348_v1 = vpop.f32.mrb[37].mxu1 }
 0x2e1   :  { %v1356_v4 = vadd.f32 %v1305_v63, %v1070_v57  ;;  %v1358_v5 = vadd.f32 %v1348_v1, %v1072_v59  ;;  %v1307_v27 = vpop.f32.mrb[38].mxu0  ;;  %v1350_v44 = vpop.f32.mrb[38].mxu1 }
 0x2e2   :  { %v4134_v38 = vmul.f32 -1.442695, %v1355_v60  ;;  %v1359_v17 = vadd.f32 %v1307_v27, %v1073_v2  ;;  %v1361_v21 = vadd.f32 %v1350_v44, %v1075_v3  ;;  %v1309_v39 = vpop.f32.mrb[39].mxu0  ;;  %v1352_v40 = vpop.f32.mrb[39].mxu1  ;;  %v4136_v11 = vmul.f32 -1.442695, %v1357_v62 }
 0x2e3   :  { %v4135_v48 = vmul.f32 -1.442695, %v1356_v4  ;;  %v1360_v51 = vadd.f32 %v1309_v39, %v1074_v19  ;;  %v1362_v54 = vadd.f32 %v1352_v40, %v1076_v37 }
 0x2e4   :  { %4731 = vpow2.f32 %v4134_v38  ;;  %v4137_v10 = vmul.f32 -1.442695, %v1359_v17  ;;  %v4139_v57 = vmul.f32 -1.442695, %v1361_v21 }
 0x2e5   :  { %v4138_v56 = vmul.f32 -1.442695, %v1360_v51  ;;  %4733 = vpow2.f32 %v4135_v48 }
 0x2e6   :  { %4735 = vpow2.f32 %v4137_v10 }
 0x2e7   :  { %4737 = vpow2.f32 %v4138_v56 }
 0x2e8   :  { %4739 = vtanh.f32 %v1358_v5 }
 0x2e9   :  { %4741 = vpow2.f32 %v4136_v11 }
 0x2ea   :  { %4743 = vpow2.f32 %v4139_v57 }
 0x2ee   :  { %v4732_v59 = vpop.eup %4731 }
 0x2ef   :  { %v1381_v12 = vadd.f32 1.0, %v4732_v59  ;;  %v4734_v13 = vpop.eup %4733 }
 0x2f0   :  { %v4736_v60 = vpop.eup %4735  ;;  %v1382_v63 = vadd.f32 1.0, %v4734_v13 }
 0x2f1   :  { %4745 = vrcp.f32 %v1381_v12  ;;  %v1384_v1 = vadd.f32 1.0, %v4736_v60  ;;  %v4738_v2 = vpop.eup %4737  ;;  %v5857_v60 = vld [vmem:[#allocation9 + $0x48] ss:$16 sps:$4 sm:$0xff]  }
 0x2f2   :  { %4747 = vtanh.f32 %v1362_v54  ;;  %v1385_v3 = vadd.f32 1.0, %v4738_v2  ;;  %v4740_v4 = vpop.eup %4739  ;;  %v5867_v2 = vld [vmem:[#allocation9 + $0x88] ss:$16 sps:$4 sm:$0xff]  }
 0x2f3   :  { %4749 = vrcp.f32 %v1382_v63  ;;  %v4742_v27 = vpop.eup %4741  ;;  %v5861_v63 = vld [vmem:[#allocation9 + $0x6c] ss:$16 sps:$4 sm:$0xff]  }
 0x2f4   :  { %4751 = vrcp.f32 %v1384_v1  ;;  %v4744_v62 = vpop.eup %4743  ;;  %v1383_v17 = vadd.f32 1.0, %v4742_v27  ;;  %v5863_v1 = vld [vmem:[#allocation9 + $0x68] ss:$16 sps:$4 sm:$0xff]   ;;  %v5873_v27 = vld [vmem:[#allocation9 + $0xc0] ss:$16 sps:$4 sm:$0xff]  }
 0x2f5   :  { %4753 = vrcp.f32 %v1385_v3  ;;  %v1386_v51 = vadd.f32 1.0, %v4744_v62  ;;  %v5869_v3 = vld [vmem:[#allocation9 + $0x8c] ss:$16 sps:$4 sm:$0xff]   ;;  %v5875_v62 = vld [vmem:[#allocation9 + $0xc4] ss:$16 sps:$4 sm:$0xff]  }
 0x2f6   :  { %4755 = vrcp.f32 %v1383_v17  ;;  %v5895_v17 = vld [vmem:[#allocation9 + $0xec] ss:$16 sps:$4 sm:$0xff]  }
 0x2fb   :  { %v4746_v44 = vpop.eup %4745 }
 0x2fc   :  { %v4748_v19 = vpop.eup %4747  ;;  %v1403_v5 = vmul.f32 %v4746_v44, %v4740_v4  ;;  %v5871_v4 = vld [vmem:[#allocation9 + $0xac] ss:$16 sps:$4 sm:$0xff]   ;;  %v5879_v44 = vld [vmem:[#allocation9 + $0xa8] ss:$16 sps:$4 sm:$0xff]  }
 0x2fd   :  { %v4750_v37 = vpop.eup %4749 }
 0x2fe   :  { %v4752_v38 = vpop.eup %4751  ;;  %v1401_v21 = vmul.f32 %v4750_v37, %v5741_v0  ;;  %v5888_v37 = vld [vmem:[#allocation9 + $0xe0] ss:$16 sps:$4 sm:$0xff]  }
 0x2ff   :  { %v1404_v39 = vmul.f32 %v4752_v38, %v4748_v19  ;;  %v4754_v40 = vpop.eup %4753  ;;  %v5882_v19 = vld [vmem:[#allocation9 + $0xe4] ss:$16 sps:$4 sm:$0xff]   ;;  %v5892_v38 = vld [vmem:[#allocation9 + $0xc8] ss:$16 sps:$4 sm:$0xff]  }
 0x300   :  { %v5828_v48 = vadd.f32 %v1403_v5, %v1401_v21  ;;  %v1402_v54 = vmul.f32 %v4754_v40, %v5744_v43  ;;  %v4756_v56 = vpop.eup %4755  ;;  %v5855_v43 = vld [vmem:[#allocation9 + $0x4c] ss:$16 sps:$4 sm:$0xff]   ;;  %v5900_v21 = vld [vmem:[#allocation9 + $0xe8] ss:$16 sps:$4 sm:$0xff]   ;;  %v1421_v40 = vunpack.c.l.bf16 %v5647_v35 }
 0x301   :  { %v5885_v5 = vld [vmem:[#allocation9 + $0xcc] ss:$16 sps:$4 sm:$0xff]  }
 0x302   :  { %4757 = vtanh.f32 %v5828_v48  ;;  %v5832_v10 = vadd.f32 %v1404_v39, %v1402_v54  ;;  %v1419_v39 = vunpack.c.l.bf16 %v5645_v34 }
 0x303   :  { %4759 = vrcp.f32 %v1386_v51 }
 0x304   :  { %4761 = vtanh.f32 %v5832_v10 }
 0x30c   :  { %v4758_v11 = vpop.eup %4757 }
 0x30d   :  { %v4760_v57 = vpop.eup %4759  ;;  %v1409_v0 = vmul.f32 %v4758_v11, %v4756_v56  ;;  %v1420_v56 = vunpack.c.l.bf16 %v5649_v36  ;;  %v1422_v11 = vunpack.c.l.bf16 %v5651_v41 }
 0x30e   :  { %v4762_v59 = vpop.eup %4761 }
 0x30f   :  { %v1410_v12 = vmul.f32 %v4762_v59, %v4760_v57 }
 0x311   :  { %v5835_v13 = vpack.c.bf16 %v1410_v12, %v1409_v0 }
 0x313   :  { %6301 = vst [vmem:[#allocation45_spill] sm:$0xff] %v5835_v13  ;;  %1652 = vmatmul.mubr.bf16.vlgmr.msra.gmra.mrb[40].mxu0 %v5835_v13  ;;  %1695 = vmatmul.mubr.bf16.vlgmr.msra.gmra.mrb[40].mxu1 %v5835_v13  ;;  %v1423_v13 = vunpack.c.h.bf16 %v5645_v34 }
 0x314   :  { %1970 = vmatpush1.bf16.msra.mxu0 %v5757_v58  ;;  %2013 = vmatpush1.bf16.msra.mxu1 %v5759_v23 }
 0x315   :  { %1971 = vmatprep.subr.bf16.mxu0 %v5765_v31  ;;  %2014 = vmatprep.subr.bf16.mxu1 %v5767_v18 }
 0x316   :  { %2001 = vmatprep.mubr.bf16.mxu0 %v6300_v7  ;;  %2044 = vmatprep.mubr.bf16.mxu1 %v6300_v7 }
 0x318   :  { %1972 = vmatpush1.bf16.msra.mxu0 %v5769_v45  ;;  %2015 = vmatpush1.bf16.msra.mxu1 %v5771_v25 }
 0x319   :  { %1973 = vmatprep.subr.bf16.mxu0 %v5777_v14  ;;  %2016 = vmatprep.subr.bf16.mxu1 %v5855_v43 }
 0x31c   :  { %1974 = vmatpush1.bf16.msra.mxu0 %v5780_v49  ;;  %2017 = vmatpush1.bf16.msra.mxu1 %v5857_v60 }
 0x31d   :  { %1975 = vmatprep.subr.bf16.mxu0 %v5785_v9  ;;  %2018 = vmatprep.subr.bf16.mxu1 %v5861_v63 }
 0x320   :  { %1976 = vmatpush1.bf16.msra.mxu0 %v5788_v6  ;;  %2019 = vmatpush1.bf16.msra.mxu1 %v5863_v1 }
 0x321   :  { %1977 = vmatprep.subr.bf16.mxu0 %v5795_v24  ;;  %2020 = vmatprep.subr.bf16.mxu1 %v5869_v3 }
 0x324   :  { %1978 = vmatpush1.bf16.msra.mxu0 %v5793_v46  ;;  %2021 = vmatpush1.bf16.msra.mxu1 %v5867_v2 }
 0x325   :  { %1979 = vmatprep.subr.bf16.mxu0 %v5798_v26  ;;  %2022 = vmatprep.subr.bf16.mxu1 %v5871_v4 }
 0x328   :  { %1980 = vmatpush1.bf16.msra.mxu0 %v5803_v47  ;;  %2023 = vmatpush1.bf16.msra.mxu1 %v5879_v44 }
 0x329   :  { %1981 = vmatprep.subr.bf16.mxu0 %v5875_v62  ;;  %2024 = vmatprep.subr.bf16.mxu1 %v5885_v5 }
 0x32c   :  { %1982 = vmatpush1.bf16.msra.mxu0 %v5873_v27  ;;  %2025 = vmatpush1.bf16.msra.mxu1 %v5892_v38 }
 0x32d   :  { %1983 = vmatprep.subr.bf16.mxu0 %v5882_v19  ;;  %2026 = vmatprep.subr.bf16.mxu1 %v5895_v17 }
 0x330   :  { %1984 = vmatpush1.bf16.msra.mxu0 %v5888_v37  ;;  %2027 = vmatpush1.bf16.msra.mxu1 %v5900_v21 }
 0x331   :  { %2319 = vmatprep.subr.bf16.mxu0 %v5753_v61  ;;  %2362 = vmatprep.subr.bf16.mxu1 %v5755_v28 }
 0x3e6   :  { %v1653_v51 = vpop.f32.mrb[40].mxu0  ;;  %v1696_v54 = vpop.f32.mrb[40].mxu1 }
 0x3e7   :  { %v1705_v57 = vadd.f32 %v1653_v51, %v1419_v39  ;;  %v1707_v59 = vadd.f32 %v1696_v54, %v1421_v40  ;;  %v1655_v0 = vpop.f32.mrb[41].mxu0  ;;  %v1698_v12 = vpop.f32.mrb[41].mxu1 }
 0x3e8   :  { %v1706_v30 = vadd.f32 %v1655_v0, %v1420_v56  ;;  %v1708_v29 = vadd.f32 %v1698_v12, %v1422_v11  ;;  %v1657_v42 = vpop.f32.mrb[42].mxu0  ;;  %v1700_v33 = vpop.f32.mrb[42].mxu1 }
 0x3e9   :  { %v4172_v53 = vmul.f32 -1.442695, %v1705_v57  ;;  %v1709_v52 = vadd.f32 %v1657_v42, %v1423_v13  ;;  %v1711_v50 = vadd.f32 %v1700_v33, %v1425_v8  ;;  %v1659_v22 = vpop.f32.mrb[43].mxu0  ;;  %v1702_v39 = vpop.f32.mrb[43].mxu1  ;;  %v4174_v35 = vmul.f32 -1.442695, %v1707_v59 }
 0x3ea   :  { %v4173_v40 = vmul.f32 -1.442695, %v1706_v30  ;;  %v1710_v51 = vadd.f32 %v1659_v22, %v1424_v32  ;;  %v1712_v54 = vadd.f32 %v1702_v39, %v1426_v55 }
 0x3eb   :  { %4763 = vpow2.f32 %v4172_v53  ;;  %v4175_v34 = vmul.f32 -1.442695, %v1709_v52  ;;  %v4177_v56 = vmul.f32 -1.442695, %v1711_v50 }
 0x3ec   :  { %v4176_v20 = vmul.f32 -1.442695, %v1710_v51  ;;  %4765 = vpow2.f32 %v4173_v40 }
 0x3ed   :  { %4767 = vpow2.f32 %v4175_v34 }
 0x3ee   :  { %4769 = vpow2.f32 %v4176_v20 }
 0x3ef   :  { %4771 = vtanh.f32 %v1708_v29 }
 0x3f0   :  { %4773 = vpow2.f32 %v4174_v35 }
 0x3f1   :  { %4775 = vpow2.f32 %v4177_v56 }
 0x3f5   :  { %v4764_v11 = vpop.eup %4763 }
 0x3f6   :  { %v1731_v36 = vadd.f32 1.0, %v4764_v11  ;;  %v4766_v41 = vpop.eup %4765 }
 0x3f7   :  { %v4768_v33 = vpop.eup %4767  ;;  %v1732_v42 = vadd.f32 1.0, %v4766_v41 }
 0x3f8   :  { %4777 = vrcp.f32 %v1731_v36  ;;  %v1734_v30 = vadd.f32 1.0, %v4768_v33  ;;  %v4770_v22 = vpop.eup %4769  ;;  %v1771_v33 = vunpack.c.l.bf16 %v5663_v16 }
 0x3f9   :  { %4779 = vtanh.f32 %v1712_v54  ;;  %v1735_v52 = vadd.f32 1.0, %v4770_v22  ;;  %v4772_v53 = vpop.eup %4771  ;;  %v6302_v22 = vld [vmem:[#allocation26_spill] sm:$0xff] }
 0x3fa   :  { %4781 = vrcp.f32 %v1732_v42  ;;  %v4774_v20 = vpop.eup %4773 }
 0x3fb   :  { %4783 = vrcp.f32 %v1734_v30  ;;  %v4776_v55 = vpop.eup %4775  ;;  %v1733_v57 = vadd.f32 1.0, %v4774_v20 }
 0x3fc   :  { %4785 = vrcp.f32 %v1735_v52  ;;  %v1736_v40 = vadd.f32 1.0, %v4776_v55  ;;  %v1770_v52 = vunpack.c.l.bf16 %v6302_v22 }
 0x3fd   :  { %4787 = vrcp.f32 %v1733_v57 }
 0x402   :  { %v4778_v50 = vpop.eup %4777 }
 0x403   :  { %v4780_v32 = vpop.eup %4779  ;;  %v1753_v29 = vmul.f32 %v4778_v50, %v4772_v53  ;;  %v6303_v53 = vld [vmem:[#allocation27_spill] sm:$0xff] }
 0x404   :  { %v4782_v8 = vpop.eup %4781  ;;  %v1772_v20 = vunpack.c.l.bf16 %v6303_v53 }
 0x405   :  { %v4784_v13 = vpop.eup %4783  ;;  %v1751_v59 = vmul.f32 %v4782_v8, %v5828_v48  ;;  %v1773_v8 = vunpack.c.h.bf16 %v5661_v15 }
 0x406   :  { %v1754_v0 = vmul.f32 %v4784_v13, %v4780_v32  ;;  %v4786_v12 = vpop.eup %4785 }
 0x407   :  { %v5914_v39 = vadd.f32 %v1753_v29, %v1751_v59  ;;  %v1752_v51 = vmul.f32 %v4786_v12, %v5832_v10  ;;  %v4788_v34 = vpop.eup %4787  ;;  %v1769_v10 = vunpack.c.l.bf16 %v5661_v15  ;;  %v1776_v12 = vunpack.c.h.bf16 %v6303_v53 }
 0x409   :  { %4789 = vtanh.f32 %v5914_v39  ;;  %v5918_v54 = vadd.f32 %v1754_v0, %v1752_v51  ;;  %v1774_v0 = vunpack.c.h.bf16 %v6302_v22 }
 0x40a   :  { %4791 = vrcp.f32 %v1736_v40 }
 0x40b   :  { %4793 = vtanh.f32 %v5918_v54 }
 0x413   :  { %v4790_v35 = vpop.eup %4789 }
 0x414   :  { %v4792_v56 = vpop.eup %4791  ;;  %v1759_v48 = vmul.f32 %v4790_v35, %v4788_v34 }
 0x415   :  { %v4794_v11 = vpop.eup %4793 }
 0x416   :  { %v1760_v36 = vmul.f32 %v4794_v11, %v4792_v56 }
 0x418   :  { %v5921_v41 = vpack.c.bf16 %v1760_v36, %v1759_v48 }
 0x41a   :  { %2002 = vmatmul.mubr.bf16.vlgmr.msra.gmra.mrb[44].mxu0 %v5921_v41  ;;  %2045 = vmatmul.mubr.bf16.vlgmr.msra.gmra.mrb[44].mxu1 %v5921_v41 }
 0x41b   :  { %2320 = vmatpush1.bf16.msra.mxu0 %v5757_v58  ;;  %2363 = vmatpush1.bf16.msra.mxu1 %v5759_v23 }
 0x41c   :  { %2321 = vmatprep.subr.bf16.mxu0 %v5765_v31  ;;  %2364 = vmatprep.subr.bf16.mxu1 %v5767_v18 }
 0x41d   :  { %2351 = vmatprep.mubr.bf16.mxu0 %v6300_v7  ;;  %2394 = vmatprep.mubr.bf16.mxu1 %v6300_v7 }
 0x41f   :  { %2322 = vmatpush1.bf16.msra.mxu0 %v5769_v45  ;;  %2365 = vmatpush1.bf16.msra.mxu1 %v5771_v25 }
 0x420   :  { %2323 = vmatprep.subr.bf16.mxu0 %v5777_v14  ;;  %2366 = vmatprep.subr.bf16.mxu1 %v5855_v43 }
 0x423   :  { %2324 = vmatpush1.bf16.msra.mxu0 %v5780_v49  ;;  %2367 = vmatpush1.bf16.msra.mxu1 %v5857_v60 }
 0x424   :  { %2325 = vmatprep.subr.bf16.mxu0 %v5785_v9  ;;  %2368 = vmatprep.subr.bf16.mxu1 %v5861_v63 }
 0x427   :  { %2326 = vmatpush1.bf16.msra.mxu0 %v5788_v6  ;;  %2369 = vmatpush1.bf16.msra.mxu1 %v5863_v1 }
 0x428   :  { %2327 = vmatprep.subr.bf16.mxu0 %v5795_v24  ;;  %2370 = vmatprep.subr.bf16.mxu1 %v5869_v3 }
 0x42b   :  { %2328 = vmatpush1.bf16.msra.mxu0 %v5793_v46  ;;  %2371 = vmatpush1.bf16.msra.mxu1 %v5867_v2 }
 0x42c   :  { %2329 = vmatprep.subr.bf16.mxu0 %v5798_v26  ;;  %2372 = vmatprep.subr.bf16.mxu1 %v5871_v4 }
 0x42f   :  { %2330 = vmatpush1.bf16.msra.mxu0 %v5803_v47  ;;  %2373 = vmatpush1.bf16.msra.mxu1 %v5879_v44 }
 0x430   :  { %2331 = vmatprep.subr.bf16.mxu0 %v5875_v62  ;;  %2374 = vmatprep.subr.bf16.mxu1 %v5885_v5 }
 0x433   :  { %2332 = vmatpush1.bf16.msra.mxu0 %v5873_v27  ;;  %2375 = vmatpush1.bf16.msra.mxu1 %v5892_v38 }
 0x434   :  { %2333 = vmatprep.subr.bf16.mxu0 %v5882_v19  ;;  %2376 = vmatprep.subr.bf16.mxu1 %v5895_v17 }
 0x437   :  { %2334 = vmatpush1.bf16.msra.mxu0 %v5888_v37  ;;  %2377 = vmatpush1.bf16.msra.mxu1 %v5900_v21 }
 0x438   :  { %2669 = vmatprep.subr.bf16.mxu0 %v5753_v61  ;;  %2712 = vmatprep.subr.bf16.mxu1 %v5755_v28  ;;  %v1775_v61 = vunpack.c.h.bf16 %v5663_v16 }
 0x4ed   :  { %v2003_v42 = vpop.f32.mrb[44].mxu0  ;;  %v2046_v30 = vpop.f32.mrb[44].mxu1 }
 0x4ee   :  { %v2055_v55 = vadd.f32 %v2003_v42, %v1769_v10  ;;  %v2057_v50 = vadd.f32 %v2046_v30, %v1771_v33  ;;  %v2005_v32 = vpop.f32.mrb[45].mxu0  ;;  %v2048_v29 = vpop.f32.mrb[45].mxu1 }
 0x4ef   :  { %v2056_v13 = vadd.f32 %v2005_v32, %v1770_v52  ;;  %v2058_v28 = vadd.f32 %v2048_v29, %v1772_v20  ;;  %v2007_v57 = vpop.f32.mrb[46].mxu0  ;;  %v2050_v59 = vpop.f32.mrb[46].mxu1 }
 0x4f0   :  { %v4210_v40 = vmul.f32 -1.442695, %v2055_v55  ;;  %v2059_v51 = vadd.f32 %v2007_v57, %v1773_v8  ;;  %v2061_v34 = vadd.f32 %v2050_v59, %v1775_v61  ;;  %v2009_v35 = vpop.f32.mrb[47].mxu0  ;;  %v2052_v56 = vpop.f32.mrb[47].mxu1  ;;  %v4212_v16 = vmul.f32 -1.442695, %v2057_v50 }
 0x4f1   :  { %v4211_v11 = vmul.f32 -1.442695, %v2056_v13  ;;  %v2060_v48 = vadd.f32 %v2009_v35, %v1774_v0  ;;  %v2062_v36 = vadd.f32 %v2052_v56, %v1776_v12 }
 0x4f2   :  { %4795 = vpow2.f32 %v4210_v40  ;;  %v4213_v15 = vmul.f32 -1.442695, %v2059_v51  ;;  %v4215_v33 = vmul.f32 -1.442695, %v2061_v34 }
 0x4f3   :  { %v4214_v10 = vmul.f32 -1.442695, %v2060_v48  ;;  %4797 = vpow2.f32 %v4211_v11 }
 0x4f4   :  { %4799 = vpow2.f32 %v4213_v15 }
 0x4f5   :  { %4801 = vpow2.f32 %v4214_v10 }
 0x4f6   :  { %4803 = vtanh.f32 %v2058_v28 }
 0x4f7   :  { %4805 = vpow2.f32 %v4212_v16 }
 0x4f8   :  { %4807 = vpow2.f32 %v4215_v33 }
 0x4fc   :  { %v4796_v42 = vpop.eup %4795 }
 0x4fd   :  { %v2081_v30 = vadd.f32 1.0, %v4796_v42  ;;  %v4798_v22 = vpop.eup %4797 }
 0x4fe   :  { %v4800_v52 = vpop.eup %4799  ;;  %v2082_v53 = vadd.f32 1.0, %v4798_v22 }
 0x4ff   :  { %4809 = vrcp.f32 %v2081_v30  ;;  %v2084_v20 = vadd.f32 1.0, %v4800_v52  ;;  %v4802_v55 = vpop.eup %4801 }
 0x500   :  { %4811 = vtanh.f32 %v2062_v36  ;;  %v2085_v32 = vadd.f32 1.0, %v4802_v55  ;;  %v4804_v29 = vpop.eup %4803 }
 0x501   :  { %4813 = vrcp.f32 %v2082_v53  ;;  %v4806_v8 = vpop.eup %4805 }
 0x502   :  { %4815 = vrcp.f32 %v2084_v20  ;;  %v4808_v50 = vpop.eup %4807  ;;  %v2083_v0 = vadd.f32 1.0, %v4806_v8 }
 0x503   :  { %4817 = vrcp.f32 %v2085_v32  ;;  %v2086_v35 = vadd.f32 1.0, %v4808_v50 }
 0x504   :  { %4819 = vrcp.f32 %v2083_v0 }
 0x509   :  { %v4810_v61 = vpop.eup %4809 }
 0x50a   :  { %v4812_v13 = vpop.eup %4811  ;;  %v2103_v28 = vmul.f32 %v4810_v61, %v4804_v29 }
 0x50b   :  { %v4814_v57 = vpop.eup %4813 }
 0x50c   :  { %v4816_v59 = vpop.eup %4815  ;;  %v2101_v12 = vmul.f32 %v4814_v57, %v5914_v39 }
 0x50d   :  { %v2104_v40 = vmul.f32 %v4816_v59, %v4812_v13  ;;  %v4818_v51 = vpop.eup %4817 }
 0x50e   :  { %v5968_v34 = vadd.f32 %v2103_v28, %v2101_v12  ;;  %v2102_v56 = vmul.f32 %v4818_v51, %v5918_v54  ;;  %v4820_v48 = vpop.eup %4819 }
 0x510   :  { %4821 = vtanh.f32 %v5968_v34  ;;  %v5972_v11 = vadd.f32 %v2104_v40, %v2102_v56 }
 0x511   :  { %4823 = vrcp.f32 %v2086_v35 }
 0x512   :  { %4825 = vtanh.f32 %v5972_v11 }
 0x51a   :  { %v4822_v36 = vpop.eup %4821 }
 0x51b   :  { %v4824_v15 = vpop.eup %4823  ;;  %v2109_v39 = vmul.f32 %v4822_v36, %v4820_v48 }
 0x51c   :  { %v4826_v10 = vpop.eup %4825 }
 0x51d   :  { %v2110_v16 = vmul.f32 %v4826_v10, %v4824_v15 }
 0x51f   :  { %v5975_v33 = vpack.c.bf16 %v2110_v16, %v2109_v39 }
 0x521   :  { %2352 = vmatmul.mubr.bf16.vlgmr.msra.gmra.mrb[48].mxu0 %v5975_v33  ;;  %2395 = vmatmul.mubr.bf16.vlgmr.msra.gmra.mrb[48].mxu1 %v5975_v33 }
 0x522   :  { %2670 = vmatpush1.bf16.msra.mxu0 %v5757_v58  ;;  %2713 = vmatpush1.bf16.msra.mxu1 %v5759_v23  ;;  %v6304_v58 = vld [vmem:[#allocation28_spill] sm:$0xff] }
 0x523   :  { %2671 = vmatprep.subr.bf16.mxu0 %v5765_v31  ;;  %2714 = vmatprep.subr.bf16.mxu1 %v5767_v18  ;;  %v2119_v23 = vunpack.c.l.bf16 %v6304_v58  ;;  %v6305_v31 = vld [vmem:[#allocation29_spill] sm:$0xff]  ;;  %v2123_v54 = vunpack.c.h.bf16 %v6304_v58 }
 0x524   :  { %2701 = vmatprep.mubr.bf16.mxu0 %v6300_v7  ;;  %2744 = vmatprep.mubr.bf16.mxu1 %v6300_v7  ;;  %v2121_v18 = vunpack.c.l.bf16 %v6305_v31  ;;  %v2125_v42 = vunpack.c.h.bf16 %v6305_v31 }
 0x526   :  { %2672 = vmatpush1.bf16.msra.mxu0 %v5769_v45  ;;  %2715 = vmatpush1.bf16.msra.mxu1 %v5771_v25 }
 0x527   :  { %2673 = vmatprep.subr.bf16.mxu0 %v5777_v14  ;;  %2716 = vmatprep.subr.bf16.mxu1 %v5855_v43  ;;  %v6306_v14 = vld [vmem:[#allocation30_spill] sm:$0xff] }
 0x528   :  { %v2124_v20 = vunpack.c.h.bf16 %v6306_v14 }
 0x52a   :  { %2674 = vmatpush1.bf16.msra.mxu0 %v5780_v49  ;;  %2717 = vmatpush1.bf16.msra.mxu1 %v5857_v60  ;;  %v2120_v49 = vunpack.c.l.bf16 %v6306_v14 }
 0x52b   :  { %2675 = vmatprep.subr.bf16.mxu0 %v5785_v9  ;;  %2718 = vmatprep.subr.bf16.mxu1 %v5861_v63  ;;  %v6307_v9 = vld [vmem:[#allocation31_spill] sm:$0xff] }
 0x52c   :  { %v2126_v55 = vunpack.c.h.bf16 %v6307_v9 }
 0x52e   :  { %2676 = vmatpush1.bf16.msra.mxu0 %v5788_v6  ;;  %2719 = vmatpush1.bf16.msra.mxu1 %v5863_v1  ;;  %v2122_v6 = vunpack.c.l.bf16 %v6307_v9 }
 0x52f   :  { %2677 = vmatprep.subr.bf16.mxu0 %v5795_v24  ;;  %2720 = vmatprep.subr.bf16.mxu1 %v5869_v3 }
 0x532   :  { %2678 = vmatpush1.bf16.msra.mxu0 %v5793_v46  ;;  %2721 = vmatpush1.bf16.msra.mxu1 %v5867_v2 }
 0x533   :  { %2679 = vmatprep.subr.bf16.mxu0 %v5798_v26  ;;  %2722 = vmatprep.subr.bf16.mxu1 %v5871_v4 }
 0x536   :  { %2680 = vmatpush1.bf16.msra.mxu0 %v5803_v47  ;;  %2723 = vmatpush1.bf16.msra.mxu1 %v5879_v44 }
 0x537   :  { %2681 = vmatprep.subr.bf16.mxu0 %v5875_v62  ;;  %2724 = vmatprep.subr.bf16.mxu1 %v5885_v5 }
 0x53a   :  { %2682 = vmatpush1.bf16.msra.mxu0 %v5873_v27  ;;  %2725 = vmatpush1.bf16.msra.mxu1 %v5892_v38 }
 0x53b   :  { %2683 = vmatprep.subr.bf16.mxu0 %v5882_v19  ;;  %2726 = vmatprep.subr.bf16.mxu1 %v5895_v17 }
 0x53e   :  { %2684 = vmatpush1.bf16.msra.mxu0 %v5888_v37  ;;  %2727 = vmatpush1.bf16.msra.mxu1 %v5900_v21 }
 0x5f4   :  { %v2353_v45 = vpop.f32.mrb[48].mxu0  ;;  %v2396_v25 = vpop.f32.mrb[48].mxu1 }
 0x5f5   :  { %v2405_v46 = vadd.f32 %v2353_v45, %v2119_v23  ;;  %v2407_v24 = vadd.f32 %v2396_v25, %v2121_v18  ;;  %v2355_v26 = vpop.f32.mrb[49].mxu0  ;;  %v2398_v47 = vpop.f32.mrb[49].mxu1 }
 0x5f6   :  { %v2406_v30 = vadd.f32 %v2355_v26, %v2120_v49  ;;  %v2408_v22 = vadd.f32 %v2398_v47, %v2122_v6  ;;  %v2357_v52 = vpop.f32.mrb[50].mxu0  ;;  %v2400_v53 = vpop.f32.mrb[50].mxu1 }
 0x5f7   :  { %v4248_v32 = vmul.f32 -1.442695, %v2405_v46  ;;  %v2409_v29 = vadd.f32 %v2357_v52, %v2123_v54  ;;  %v2411_v8 = vadd.f32 %v2400_v53, %v2125_v42  ;;  %v2359_v50 = vpop.f32.mrb[51].mxu0  ;;  %v2402_v61 = vpop.f32.mrb[51].mxu1  ;;  %v4250_v12 = vmul.f32 -1.442695, %v2407_v24 }
 0x5f8   :  { %v4249_v13 = vmul.f32 -1.442695, %v2406_v30  ;;  %v2410_v28 = vadd.f32 %v2359_v50, %v2124_v20  ;;  %v2412_v57 = vadd.f32 %v2402_v61, %v2126_v55  ;;  %v4640_v55 = vld [vmem:[#allocation9 + $0xc] ss:$16 sps:$4 sm:$0xff]   ;;  %v6043_v61 = vld [vmem:[#allocation9 + $0x20] ss:$16 sps:$4 sm:$0xff]  }
 0x5f9   :  { %4827 = vpow2.f32 %v4248_v32  ;;  %v4251_v59 = vmul.f32 -1.442695, %v2409_v29  ;;  %v4253_v40 = vmul.f32 -1.442695, %v2411_v8  ;;  %v6033_v32 = vld [vmem:[#allocation9] ss:$16 sps:$4 sm:$0xff]   ;;  %3062 = vmatprep.subr.bf16.mxu1 %v4640_v55 }
 0x5fa   :  { %v4252_v0 = vmul.f32 -1.442695, %v2410_v28  ;;  %4829 = vpow2.f32 %v4249_v13  ;;  %v6035_v29 = vld [vmem:[#allocation9 + $0x8] ss:$16 sps:$4 sm:$0xff]   ;;  %v6039_v8 = vld [vmem:[#allocation9 + $0x24] ss:$16 sps:$4 sm:$0xff]  }
 0x5fb   :  { %4831 = vpow2.f32 %v4251_v59  ;;  %v6041_v50 = vld [vmem:[#allocation9 + $0x2c] ss:$16 sps:$4 sm:$0xff]   ;;  %v6045_v13 = vld [vmem:[#allocation9 + $0x28] ss:$16 sps:$4 sm:$0xff]   ;;  %v6051_v28 = vld [vmem:[#allocation9 + $0x44] ss:$16 sps:$4 sm:$0xff]  }
 0x5fc   :  { %4833 = vpow2.f32 %v4252_v0  ;;  %v6059_v59 = vld [vmem:[#allocation9 + $0x64] ss:$16 sps:$4 sm:$0xff]   ;;  %v6062_v0 = vld [vmem:[#allocation9 + $0x60] ss:$16 sps:$4 sm:$0xff]  }
 0x5fd   :  { %4835 = vtanh.f32 %v2408_v22 }
 0x5fe   :  { %4837 = vpow2.f32 %v4250_v12  ;;  %v6069_v12 = vld [vmem:[#allocation9 + $0x84] ss:$16 sps:$4 sm:$0xff]  }
 0x5ff   :  { %4839 = vpow2.f32 %v4253_v40  ;;  %v6072_v40 = vld [vmem:[#allocation9 + $0xa4] ss:$16 sps:$4 sm:$0xff]  }
 0x603   :  { %v4828_v51 = vpop.eup %4827 }
 0x604   :  { %v2431_v35 = vadd.f32 1.0, %v4828_v51  ;;  %v4830_v56 = vpop.eup %4829 }
 0x605   :  { %v4832_v48 = vpop.eup %4831  ;;  %v2432_v36 = vadd.f32 1.0, %v4830_v56 }
 0x606   :  { %4841 = vrcp.f32 %v2431_v35  ;;  %v2434_v15 = vadd.f32 1.0, %v4832_v48  ;;  %v4834_v10 = vpop.eup %4833 }
 0x607   :  { %4843 = vtanh.f32 %v2412_v57  ;;  %v2435_v39 = vadd.f32 1.0, %v4834_v10  ;;  %v4836_v16 = vpop.eup %4835  ;;  %v6054_v57 = vld [vmem:[#allocation9 + $0x40] ss:$16 sps:$4 sm:$0xff]  }
 0x608   :  { %4845 = vrcp.f32 %v2432_v36  ;;  %v4838_v58 = vpop.eup %4837 }
 0x609   :  { %4847 = vrcp.f32 %v2434_v15  ;;  %v4840_v23 = vpop.eup %4839  ;;  %v2433_v49 = vadd.f32 1.0, %v4838_v58 }
 0x60a   :  { %4849 = vrcp.f32 %v2435_v39  ;;  %v2436_v26 = vadd.f32 1.0, %v4840_v23 }
 0x60b   :  { %4851 = vrcp.f32 %v2433_v49 }
 0x610   :  { %v4842_v31 = vpop.eup %4841 }
 0x611   :  { %v4844_v18 = vpop.eup %4843  ;;  %v2453_v45 = vmul.f32 %v4842_v31, %v4836_v16 }
 0x612   :  { %v4846_v25 = vpop.eup %4845 }
 0x613   :  { %v4848_v14 = vpop.eup %4847  ;;  %v2451_v9 = vmul.f32 %v4846_v25, %v5968_v34 }
 0x614   :  { %v2454_v6 = vmul.f32 %v4848_v14, %v4844_v18  ;;  %v4850_v46 = vpop.eup %4849 }
 0x615   :  { %v6020_v24 = vadd.f32 %v2453_v45, %v2451_v9  ;;  %v2452_v47 = vmul.f32 %v4850_v46, %v5972_v11  ;;  %v4852_v42 = vpop.eup %4851  ;;  %v4637_v11 = vld [vmem:[#allocation9 + $0x4] ss:$16 sps:$4 sm:$0xff]  }
 0x616   :  { %3019 = vmatprep.subr.bf16.mxu0 %v4637_v11 }
 0x617   :  { %4853 = vtanh.f32 %v6020_v24  ;;  %v6024_v54 = vadd.f32 %v2454_v6, %v2452_v47 }
 0x618   :  { %4855 = vrcp.f32 %v2436_v26 }
 0x619   :  { %4857 = vtanh.f32 %v6024_v54 }
 0x621   :  { %v4854_v30 = vpop.eup %4853 }
 0x622   :  { %v4856_v22 = vpop.eup %4855  ;;  %v2459_v34 = vmul.f32 %v4854_v30, %v4852_v42 }
 0x623   :  { %v4858_v52 = vpop.eup %4857 }
 0x624   :  { %v2460_v53 = vmul.f32 %v4858_v52, %v4856_v22 }
 0x626   :  { %v6027_v20 = vpack.c.bf16 %v2460_v53, %v2459_v34 }
 0x628   :  { %2702 = vmatmul.mubr.bf16.vlgmr.msra.gmra.mrb[52].mxu0 %v6027_v20  ;;  %2745 = vmatmul.mubr.bf16.vlgmr.msra.gmra.mrb[52].mxu1 %v6027_v20 }
 0x629   :  { %3051 = vmatprep.mubr.bf16.mxu0 %v6300_v7  ;;  %3094 = vmatprep.mubr.bf16.mxu1 %v6300_v7 }
 0x62a   :  { %3020 = vmatpush1.bf16.msra.mxu0 %v6033_v32  ;;  %3063 = vmatpush1.bf16.msra.mxu1 %v6035_v29 }
 0x62b   :  { %3021 = vmatprep.subr.bf16.mxu0 %v6039_v8  ;;  %3064 = vmatprep.subr.bf16.mxu1 %v6041_v50 }
 0x62e   :  { %3022 = vmatpush1.bf16.msra.mxu0 %v6043_v61  ;;  %3065 = vmatpush1.bf16.msra.mxu1 %v6045_v13 }
 0x62f   :  { %3066 = vmatprep.subr.bf16.mxu1 %v5855_v43  ;;  %3023 = vmatprep.subr.bf16.mxu0 %v6051_v28  ;;  %v6067_v43 = vld [vmem:[#allocation9 + $0x80] ss:$16 sps:$4 sm:$0xff]  }
 0x632   :  { %3024 = vmatpush1.bf16.msra.mxu0 %v6054_v57  ;;  %3067 = vmatpush1.bf16.msra.mxu1 %v5857_v60  ;;  %v6077_v60 = vld [vmem:[#allocation9 + $0xa0] ss:$16 sps:$4 sm:$0xff]  }
 0x633   :  { %3068 = vmatprep.subr.bf16.mxu1 %v5861_v63  ;;  %3025 = vmatprep.subr.bf16.mxu0 %v6059_v59  ;;  %v6308_v63 = vld [vmem:[#allocation32_spill] sm:$0xff] }
 0x636   :  { %3026 = vmatpush1.bf16.msra.mxu0 %v6062_v0  ;;  %3069 = vmatpush1.bf16.msra.mxu1 %v5863_v1  ;;  %v2469_v1 = vunpack.c.l.bf16 %v6308_v63 }
 0x637   :  { %3070 = vmatprep.subr.bf16.mxu1 %v5869_v3  ;;  %3027 = vmatprep.subr.bf16.mxu0 %v6069_v12 }
 0x63a   :  { %3028 = vmatpush1.bf16.msra.mxu0 %v6067_v43  ;;  %3071 = vmatpush1.bf16.msra.mxu1 %v5867_v2  ;;  %v6309_v2 = vld [vmem:[#allocation33_spill] sm:$0xff] }
 0x63b   :  { %3029 = vmatprep.subr.bf16.mxu0 %v6072_v40  ;;  %3072 = vmatprep.subr.bf16.mxu1 %v5871_v4  ;;  %v2471_v3 = vunpack.c.l.bf16 %v6309_v2 }
 0x63e   :  { %3030 = vmatpush1.bf16.msra.mxu0 %v6077_v60  ;;  %3073 = vmatpush1.bf16.msra.mxu1 %v5879_v44  ;;  %v6310_v44 = vld [vmem:[#allocation34_spill] sm:$0xff] }
 0x63f   :  { %3031 = vmatprep.subr.bf16.mxu0 %v5875_v62  ;;  %3074 = vmatprep.subr.bf16.mxu1 %v5885_v5  ;;  %v6311_v5 = vld [vmem:[#allocation35_spill] sm:$0xff]  ;;  %v2474_v10 = vunpack.c.h.bf16 %v6310_v44 }
 0x640   :  { %v2476_v39 = vunpack.c.h.bf16 %v6311_v5 }
 0x642   :  { %3032 = vmatpush1.bf16.msra.mxu0 %v5873_v27  ;;  %3075 = vmatpush1.bf16.msra.mxu1 %v5892_v38  ;;  %v2470_v27 = vunpack.c.l.bf16 %v6310_v44  ;;  %v2472_v38 = vunpack.c.l.bf16 %v6311_v5 }
 0x643   :  { %3033 = vmatprep.subr.bf16.mxu0 %v5882_v19  ;;  %3076 = vmatprep.subr.bf16.mxu1 %v5895_v17 }
 0x646   :  { %3034 = vmatpush1.bf16.msra.mxu0 %v5888_v37  ;;  %3077 = vmatpush1.bf16.msra.mxu1 %v5900_v21  ;;  %v2473_v37 = vunpack.c.h.bf16 %v6308_v63  ;;  %v2475_v21 = vunpack.c.h.bf16 %v6309_v2 }
 0x647   :  { %3369 = vmatprep.subr.bf16.mxu0 %v4637_v11  ;;  %3412 = vmatprep.subr.bf16.mxu1 %v4640_v55 }
 0x6fb   :  { %v2703_v4 = vpop.f32.mrb[52].mxu0  ;;  %v2746_v62 = vpop.f32.mrb[52].mxu1 }
 0x6fc   :  { %v2755_v51 = vadd.f32 %v2703_v4, %v2469_v1  ;;  %v2757_v19 = vadd.f32 %v2746_v62, %v2471_v3  ;;  %v2705_v35 = vpop.f32.mrb[53].mxu0  ;;  %v2748_v17 = vpop.f32.mrb[53].mxu1 }
 0x6fd   :  { %v2756_v56 = vadd.f32 %v2705_v35, %v2470_v27  ;;  %v2758_v48 = vadd.f32 %v2748_v17, %v2472_v38  ;;  %v2707_v36 = vpop.f32.mrb[54].mxu0  ;;  %v2750_v15 = vpop.f32.mrb[54].mxu1 }
 0x6fe   :  { %v4286_v16 = vmul.f32 -1.442695, %v2755_v51  ;;  %v2759_v58 = vadd.f32 %v2707_v36, %v2473_v37  ;;  %v2761_v23 = vadd.f32 %v2750_v15, %v2475_v21  ;;  %v2709_v31 = vpop.f32.mrb[55].mxu0  ;;  %v2752_v18 = vpop.f32.mrb[55].mxu1  ;;  %v4288_v6 = vmul.f32 -1.442695, %v2757_v19 }
 0x6ff   :  { %v4287_v45 = vmul.f32 -1.442695, %v2756_v56  ;;  %v2760_v25 = vadd.f32 %v2709_v31, %v2474_v10  ;;  %v2762_v14 = vadd.f32 %v2752_v18, %v2476_v39  ;;  %v4680_v10 = vld [vmem:[#allocation9 + $0xe8] ss:$16 sps:$4 sm:$0xff]  }
 0x700   :  { %4859 = vpow2.f32 %v4286_v16  ;;  %v4289_v49 = vmul.f32 -1.442695, %v2759_v58  ;;  %v4291_v46 = vmul.f32 -1.442695, %v2761_v23  ;;  %v6312_v39 = vld [vmem:[#allocation36_spill] sm:$0xff]  ;;  %v6313_v58 = vld [vmem:[#allocation37_spill] sm:$0xff] }
 0x701   :  { %v4290_v9 = vmul.f32 -1.442695, %v2760_v25  ;;  %4861 = vpow2.f32 %v4287_v45  ;;  %v2819_v16 = vunpack.c.l.bf16 %v6312_v39  ;;  %v2821_v23 = vunpack.c.l.bf16 %v6313_v58  ;;  %v6314_v45 = vld [vmem:[#allocation38_spill] sm:$0xff] }
 0x702   :  { %4863 = vpow2.f32 %v4289_v49  ;;  %v2820_v25 = vunpack.c.l.bf16 %v6314_v45 }
 0x703   :  { %4865 = vpow2.f32 %v4290_v9 }
 0x704   :  { %4867 = vtanh.f32 %v2758_v48 }
 0x705   :  { %4869 = vpow2.f32 %v4288_v6 }
 0x706   :  { %4871 = vpow2.f32 %v4291_v46 }
 0x70a   :  { %v4860_v26 = vpop.eup %4859 }
 0x70b   :  { %v2781_v47 = vadd.f32 1.0, %v4860_v26  ;;  %v4862_v42 = vpop.eup %4861 }
 0x70c   :  { %v4864_v30 = vpop.eup %4863  ;;  %v2782_v22 = vadd.f32 1.0, %v4862_v42  ;;  %v2825_v42 = vunpack.c.h.bf16 %v6313_v58 }
 0x70d   :  { %4873 = vrcp.f32 %v2781_v47  ;;  %v2784_v52 = vadd.f32 1.0, %v4864_v30  ;;  %v4866_v34 = vpop.eup %4865  ;;  %v2823_v47 = vunpack.c.h.bf16 %v6312_v39 }
 0x70e   :  { %4875 = vtanh.f32 %v2762_v14  ;;  %v2785_v53 = vadd.f32 1.0, %v4866_v34  ;;  %v4868_v11 = vpop.eup %4867  ;;  %v6315_v14 = vld [vmem:[#allocation39_spill] sm:$0xff] }
 0x70f   :  { %4877 = vrcp.f32 %v2782_v22  ;;  %v4870_v55 = vpop.eup %4869  ;;  %v2822_v49 = vunpack.c.l.bf16 %v6315_v14 }
 0x710   :  { %4879 = vrcp.f32 %v2784_v52  ;;  %v4872_v63 = vpop.eup %4871  ;;  %v2783_v44 = vadd.f32 1.0, %v4870_v55 }
 0x711   :  { %4881 = vrcp.f32 %v2785_v53  ;;  %v2786_v19 = vadd.f32 1.0, %v4872_v63  ;;  %v2824_v53 = vunpack.c.h.bf16 %v6314_v45 }
 0x712   :  { %4883 = vrcp.f32 %v2783_v44 }
 0x717   :  { %v4874_v1 = vpop.eup %4873 }
 0x718   :  { %v4876_v2 = vpop.eup %4875  ;;  %v2803_v3 = vmul.f32 %v4874_v1, %v4868_v11  ;;  %v2826_v11 = vunpack.c.h.bf16 %v6315_v14  ;;  %v4685_v14 = vld [vmem:[#allocation12 + $0x10] sm:$0xff]  }
 0x719   :  { %v4878_v4 = vpop.eup %4877 }
 0x71a   :  { %v4880_v62 = vpop.eup %4879  ;;  %v2801_v27 = vmul.f32 %v4878_v4, %v6020_v24 }
 0x71b   :  { %v2804_v5 = vmul.f32 %v4880_v62, %v4876_v2  ;;  %v4882_v38 = vpop.eup %4881 }
 0x71c   :  { %v6100_v51 = vadd.f32 %v2803_v3, %v2801_v27  ;;  %v2802_v35 = vmul.f32 %v4882_v38, %v6024_v54  ;;  %v4884_v37 = vpop.eup %4883  ;;  %v4659_v54 = vld [vmem:[#allocation9 + $0x48] ss:$16 sps:$4 sm:$0xff]  }
 0x71e   :  { %4885 = vtanh.f32 %v6100_v51  ;;  %v6104_v17 = vadd.f32 %v2804_v5, %v2802_v35 }
 0x71f   :  { %4887 = vrcp.f32 %v2786_v19 }
 0x720   :  { %4889 = vtanh.f32 %v6104_v17 }
 0x728   :  { %v4886_v21 = vpop.eup %4885 }
 0x729   :  { %v4888_v56 = vpop.eup %4887  ;;  %v2809_v24 = vmul.f32 %v4886_v21, %v4884_v37 }
 0x72a   :  { %v4890_v48 = vpop.eup %4889 }
 0x72b   :  { %v2810_v36 = vmul.f32 %v4890_v48, %v4888_v56 }
 0x72d   :  { %v6107_v15 = vpack.c.bf16 %v2810_v36, %v2809_v24 }
 0x72f   :  { %3052 = vmatmul.mubr.bf16.vlgmr.msra.gmra.mrb[56].mxu0 %v6107_v15  ;;  %3095 = vmatmul.mubr.bf16.vlgmr.msra.gmra.mrb[56].mxu1 %v6107_v15 }
 0x730   :  { %3370 = vmatpush1.bf16.msra.mxu0 %v6033_v32  ;;  %3413 = vmatpush1.bf16.msra.mxu1 %v6035_v29  ;;  %v4664_v32 = vld [vmem:[#allocation9 + $0x6c] ss:$16 sps:$4 sm:$0xff]   ;;  %v4662_v29 = vld [vmem:[#allocation9 + $0x68] ss:$16 sps:$4 sm:$0xff]  }
 0x731   :  { %3371 = vmatprep.subr.bf16.mxu0 %v6039_v8  ;;  %3414 = vmatprep.subr.bf16.mxu1 %v6041_v50  ;;  %v4665_v8 = vld [vmem:[#allocation9 + $0x88] ss:$16 sps:$4 sm:$0xff]   ;;  %v4667_v50 = vld [vmem:[#allocation9 + $0x8c] ss:$16 sps:$4 sm:$0xff]  }
 0x732   :  { %3401 = vmatprep.mubr.bf16.mxu0 %v6300_v7  ;;  %3444 = vmatprep.mubr.bf16.mxu1 %v6300_v7  ;;  %v4661_v7 = vld [vmem:[#allocation9 + $0x4c] ss:$16 sps:$4 sm:$0xff]  }
 0x734   :  { %3372 = vmatpush1.bf16.msra.mxu0 %v6043_v61  ;;  %3415 = vmatpush1.bf16.msra.mxu1 %v6045_v13  ;;  %v4670_v61 = vld [vmem:[#allocation9 + $0xac] ss:$16 sps:$4 sm:$0xff]   ;;  %v4671_v13 = vld [vmem:[#allocation9 + $0xc0] ss:$16 sps:$4 sm:$0xff]  }
 0x735   :  { %3373 = vmatprep.subr.bf16.mxu0 %v6051_v28  ;;  %3416 = vmatprep.subr.bf16.mxu1 %v4661_v7  ;;  %v4673_v28 = vld [vmem:[#allocation9 + $0xc4] ss:$16 sps:$4 sm:$0xff]  }
 0x738   :  { %3374 = vmatpush1.bf16.msra.mxu0 %v6054_v57  ;;  %3417 = vmatpush1.bf16.msra.mxu1 %v4659_v54  ;;  %v4668_v57 = vld [vmem:[#allocation9 + $0xa8] ss:$16 sps:$4 sm:$0xff]  }
 0x739   :  { %3375 = vmatprep.subr.bf16.mxu0 %v6059_v59  ;;  %3418 = vmatprep.subr.bf16.mxu1 %v4664_v32  ;;  %v4679_v59 = vld [vmem:[#allocation9 + $0xe4] ss:$16 sps:$4 sm:$0xff]  }
 0x73c   :  { %3376 = vmatpush1.bf16.msra.mxu0 %v6062_v0  ;;  %3419 = vmatpush1.bf16.msra.mxu1 %v4662_v29  ;;  %v4676_v0 = vld [vmem:[#allocation9 + $0xcc] ss:$16 sps:$4 sm:$0xff]  }
 0x73d   :  { %3377 = vmatprep.subr.bf16.mxu0 %v6069_v12  ;;  %3420 = vmatprep.subr.bf16.mxu1 %v4667_v50  ;;  %v6127_v12 = vld [vmem:[#allocation12] sm:$0xff]  }
 0x740   :  { %3378 = vmatpush1.bf16.msra.mxu0 %v6067_v43  ;;  %3421 = vmatpush1.bf16.msra.mxu1 %v4665_v8  ;;  %v4677_v43 = vld [vmem:[#allocation9 + $0xe0] ss:$16 sps:$4 sm:$0xff]  }
 0x741   :  { %3379 = vmatprep.subr.bf16.mxu0 %v6072_v40  ;;  %3422 = vmatprep.subr.bf16.mxu1 %v4670_v61  ;;  %v4674_v40 = vld [vmem:[#allocation9 + $0xc8] ss:$16 sps:$4 sm:$0xff]  }
 0x744   :  { %3380 = vmatpush1.bf16.msra.mxu0 %v6077_v60  ;;  %3423 = vmatpush1.bf16.msra.mxu1 %v4668_v57  ;;  %v4682_v60 = vld [vmem:[#allocation9 + $0xec] ss:$16 sps:$4 sm:$0xff]  }
 0x745   :  { %3381 = vmatprep.subr.bf16.mxu0 %v4673_v28  ;;  %3424 = vmatprep.subr.bf16.mxu1 %v4676_v0 }
 0x748   :  { %3382 = vmatpush1.bf16.msra.mxu0 %v4671_v13  ;;  %3425 = vmatpush1.bf16.msra.mxu1 %v4674_v40 }
 0x749   :  { %3383 = vmatprep.subr.bf16.mxu0 %v4679_v59  ;;  %3426 = vmatprep.subr.bf16.mxu1 %v4682_v60 }
 0x74c   :  { %3384 = vmatpush1.bf16.msra.mxu0 %v4677_v43  ;;  %3427 = vmatpush1.bf16.msra.mxu1 %v4680_v10 }
 0x74d   :  { %4412 = vmatprep.subr.bf16.mxu0 %v6127_v12 }
 0x802   :  { %v3053_v31 = vpop.f32.mrb[56].mxu0  ;;  %v3096_v18 = vpop.f32.mrb[56].mxu1 }
 0x803   :  { %v3105_v9 = vadd.f32 %v3053_v31, %v2819_v16  ;;  %v3107_v6 = vadd.f32 %v3096_v18, %v2821_v23  ;;  %v3055_v46 = vpop.f32.mrb[57].mxu0  ;;  %v3098_v26 = vpop.f32.mrb[57].mxu1 }
 0x804   :  { %v3106_v30 = vadd.f32 %v3055_v46, %v2820_v25  ;;  %v3108_v22 = vadd.f32 %v3098_v26, %v2822_v49  ;;  %v3057_v52 = vpop.f32.mrb[58].mxu0  ;;  %v3100_v34 = vpop.f32.mrb[58].mxu1  ;;  %v4684_v25 = vld [vmem:[#allocation12 + $0x8] sm:$0xff]   ;;  %v4686_v49 = vld [vmem:[#allocation12 + $0x18] sm:$0xff]   ;;  %v4689_v46 = vld [vmem:[#allocation12 + $0x30] sm:$0xff]  }
 0x805   :  { %v4324_v55 = vmul.f32 -1.442695, %v3105_v9  ;;  %v3109_v63 = vadd.f32 %v3057_v52, %v2823_v47  ;;  %v3111_v1 = vadd.f32 %v3100_v34, %v2825_v42  ;;  %v3059_v2 = vpop.f32.mrb[59].mxu0  ;;  %v3102_v3 = vpop.f32.mrb[59].mxu1  ;;  %v4326_v38 = vmul.f32 -1.442695, %v3107_v6 }
 0x806   :  { %v4325_v4 = vmul.f32 -1.442695, %v3106_v30  ;;  %v3110_v62 = vadd.f32 %v3059_v2, %v2824_v53  ;;  %v3112_v44 = vadd.f32 %v3102_v3, %v2826_v11  ;;  %v4687_v9 = vld [vmem:[#allocation12 + $0x20] sm:$0xff]   ;;  %v4688_v6 = vld [vmem:[#allocation12 + $0x28] sm:$0xff]   ;;  %v4690_v26 = vld [vmem:[#allocation12 + $0x38] sm:$0xff]  }
 0x807   :  { %4891 = vpow2.f32 %v4324_v55  ;;  %v4327_v27 = vmul.f32 -1.442695, %v3109_v63  ;;  %v4329_v19 = vmul.f32 -1.442695, %v3111_v1  ;;  %v6318_v47 = vld [vmem:[#allocation40_spill] sm:$0xff]  ;;  %v6319_v30 = vld [vmem:[#allocation41_spill] sm:$0xff] }
 0x808   :  { %v4328_v5 = vmul.f32 -1.442695, %v3110_v62  ;;  %4893 = vpow2.f32 %v4325_v4  ;;  %v3169_v42 = vunpack.c.l.bf16 %v6318_v47  ;;  %v6320_v53 = vld [vmem:[#allocation42_spill] sm:$0xff]  ;;  %v6321_v55 = vld [vmem:[#allocation43_spill] sm:$0xff]  ;;  %v3173_v62 = vunpack.c.h.bf16 %v6318_v47 }
 0x809   :  { %4895 = vpow2.f32 %v4327_v27  ;;  %v3170_v11 = vunpack.c.l.bf16 %v6320_v53  ;;  %v3172_v63 = vunpack.c.l.bf16 %v6321_v55 }
 0x80a   :  { %4897 = vpow2.f32 %v4328_v5 }
 0x80b   :  { %4899 = vtanh.f32 %v3108_v22  ;;  %v3171_v22 = vunpack.c.l.bf16 %v6319_v30 }
 0x80c   :  { %4901 = vpow2.f32 %v4326_v38 }
 0x80d   :  { %4903 = vpow2.f32 %v4329_v19 }
 0x811   :  { %v4892_v35 = vpop.eup %4891 }
 0x812   :  { %v3131_v37 = vadd.f32 1.0, %v4892_v35  ;;  %v4894_v21 = vpop.eup %4893  ;;  %v3174_v35 = vunpack.c.h.bf16 %v6320_v53 }
 0x813   :  { %v4896_v56 = vpop.eup %4895  ;;  %v3132_v48 = vadd.f32 1.0, %v4894_v21 }
 0x814   :  { %4905 = vrcp.f32 %v3131_v37  ;;  %v3134_v24 = vadd.f32 1.0, %v4896_v56  ;;  %v4898_v36 = vpop.eup %4897  ;;  %v3176_v37 = vunpack.c.h.bf16 %v6321_v55 }
 0x815   :  { %4907 = vtanh.f32 %v3112_v44  ;;  %v3135_v7 = vadd.f32 1.0, %v4898_v36  ;;  %v4900_v54 = vpop.eup %4899  ;;  %v3175_v44 = vunpack.c.h.bf16 %v6319_v30 }
 0x816   :  { %4909 = vrcp.f32 %v3132_v48  ;;  %v4902_v32 = vpop.eup %4901 }
 0x817   :  { %4911 = vrcp.f32 %v3134_v24  ;;  %v4904_v29 = vpop.eup %4903  ;;  %v3133_v57 = vadd.f32 1.0, %v4902_v32 }
 0x818   :  { %4913 = vrcp.f32 %v3135_v7  ;;  %v3136_v60 = vadd.f32 1.0, %v4904_v29 }
 0x819   :  { %4915 = vrcp.f32 %v3133_v57 }
 0x81e   :  { %v4906_v8 = vpop.eup %4905 }
 0x81f   :  { %v4908_v50 = vpop.eup %4907  ;;  %v3153_v61 = vmul.f32 %v4906_v8, %v4900_v54 }
 0x820   :  { %v4910_v13 = vpop.eup %4909 }
 0x821   :  { %v4912_v28 = vpop.eup %4911  ;;  %v3151_v59 = vmul.f32 %v4910_v13, %v6100_v51 }
 0x822   :  { %v3154_v0 = vmul.f32 %v4912_v28, %v4908_v50  ;;  %v4914_v43 = vpop.eup %4913 }
 0x823   :  { %v6139_v40 = vadd.f32 %v3153_v61, %v3151_v59  ;;  %v3152_v10 = vmul.f32 %v4914_v43, %v6104_v17  ;;  %v4916_v16 = vpop.eup %4915  ;;  %v6316_v17 = vld [vmem:[#allocation44_spill] sm:$0xff] }
 0x825   :  { %4917 = vtanh.f32 %v6139_v40  ;;  %v6143_v39 = vadd.f32 %v3154_v0, %v3152_v10 }
 0x826   :  { %4919 = vrcp.f32 %v3136_v60 }
 0x827   :  { %4921 = vtanh.f32 %v6143_v39 }
 0x82f   :  { %v4918_v58 = vpop.eup %4917 }
 0x830   :  { %v4920_v23 = vpop.eup %4919  ;;  %v3159_v51 = vmul.f32 %v4918_v58, %v4916_v16 }
 0x831   :  { %v4922_v31 = vpop.eup %4921 }
 0x832   :  { %v3160_v18 = vmul.f32 %v4922_v31, %v4920_v23 }
 0x834   :  { %v6146_v45 = vpack.c.bf16 %v3160_v18, %v3159_v51 }
 0x836   :  { %3402 = vmatmul.mubr.bf16.vlgmr.msra.gmra.mrb[60].mxu0 %v6146_v45  ;;  %3445 = vmatmul.mubr.bf16.vlgmr.msra.gmra.mrb[60].mxu1 %v6146_v45 }
 0x837   :  { %4413 = vmatpush3.bf16.msra.mxu0 %v6127_v12  ;;  %4428 = vmatprep.mubr.bf16.mxu0 %v6316_v17  ;;  %v6317_v12 = vld [vmem:[#allocation45_spill] sm:$0xff] }
 0x838   :  { %4414 = vmatprep.subr.bf16.mxu0 %v4684_v25 }
 0x83b   :  { %4415 = vmatpush3.bf16.msra.mxu0 %v4684_v25 }
 0x83c   :  { %4416 = vmatprep.subr.bf16.mxu0 %v4685_v14 }
 0x83f   :  { %4417 = vmatpush3.bf16.msra.mxu0 %v4685_v14 }
 0x840   :  { %4418 = vmatprep.subr.bf16.mxu0 %v4686_v49 }
 0x843   :  { %4419 = vmatpush3.bf16.msra.mxu0 %v4686_v49 }
 0x844   :  { %4420 = vmatprep.subr.bf16.mxu0 %v4687_v9 }
 0x847   :  { %4421 = vmatpush3.bf16.msra.mxu0 %v4687_v9  ;;  %v6166_v9 = vld [vmem:[#allocation13] ss:$0 sm:$0xff] }
 0x848   :  { %4422 = vmatprep.subr.bf16.mxu0 %v4688_v6 }
 0x84b   :  { %4423 = vmatpush3.bf16.msra.mxu0 %v4688_v6 }
 0x84c   :  { %4424 = vmatprep.subr.bf16.mxu0 %v4689_v46 }
 0x84f   :  { %4425 = vmatpush3.bf16.msra.mxu0 %v4689_v46 }
 0x850   :  { %4426 = vmatprep.subr.bf16.mxu0 %v4690_v26 }
 0x853   :  { %4427 = vmatpush3.bf16.msra.mxu0 %v4690_v26 }
 0x856   :  { %4429 = vmatmul.mubr.bf16.vlgmr.msra.gmra.mrb[64].mxu0 %v6317_v12 }
 0x857   :  { %4432 = vmatprep.mubr.bf16.mxu0 %v5921_v41 }
 0x85e   :  { %4433 = vmatmul.mubr.bf16.gmra.mrb[68].mxu0 %v5975_v33 }
 0x85f   :  { %4436 = vmatprep.mubr.bf16.mxu0 %v6027_v20 }
 0x866   :  { %4437 = vmatmul.mubr.bf16.gmra.mrb[72].mxu0 %v6107_v15 }
 0x867   :  { %4440 = vmatprep.mubr.bf16.mxu0 %v6146_v45 }
 0x909   :  { %v3403_v52 = vpop.f32.mrb[60].mxu0  ;;  %v3446_v34 = vpop.f32.mrb[60].mxu1 }
 0x90a   :  { %v3455_v1 = vadd.f32 %v3403_v52, %v3169_v42  ;;  %v3457_v2 = vadd.f32 %v3446_v34, %v3171_v22  ;;  %v3405_v3 = vpop.f32.mrb[61].mxu0  ;;  %v3448_v4 = vpop.f32.mrb[61].mxu1 }
 0x90b   :  { %v3456_v27 = vadd.f32 %v3405_v3, %v3170_v11  ;;  %v3458_v5 = vadd.f32 %v3448_v4, %v3172_v63  ;;  %v3407_v38 = vpop.f32.mrb[62].mxu0  ;;  %v3450_v19 = vpop.f32.mrb[62].mxu1 }
 0x90c   :  { %v4362_v21 = vmul.f32 -1.442695, %v3455_v1  ;;  %v3459_v56 = vadd.f32 %v3407_v38, %v3173_v62  ;;  %v3461_v48 = vadd.f32 %v3450_v19, %v3175_v44  ;;  %v3409_v24 = vpop.f32.mrb[63].mxu0  ;;  %v3452_v36 = vpop.f32.mrb[63].mxu1  ;;  %v4364_v50 = vmul.f32 -1.442695, %v3457_v2 }
 0x90d   :  { %v4363_v7 = vmul.f32 -1.442695, %v3456_v27  ;;  %v3460_v54 = vadd.f32 %v3409_v24, %v3174_v35  ;;  %v3462_v32 = vadd.f32 %v3452_v36, %v3176_v37  ;;  %v6178_v35 = vld [vmem:[#allocation15] ss:$0 sm:$0xff] }
 0x90e   :  { %4923 = vpow2.f32 %v4362_v21  ;;  %v4365_v29 = vmul.f32 -1.442695, %v3459_v56  ;;  %v4367_v61 = vmul.f32 -1.442695, %v3461_v48 }
 0x90f   :  { %v4366_v8 = vmul.f32 -1.442695, %v3460_v54  ;;  %4925 = vpow2.f32 %v4363_v7 }
 0x910   :  { %4927 = vpow2.f32 %v4365_v29 }
 0x911   :  { %4929 = vpow2.f32 %v4366_v8 }
 0x912   :  { %4931 = vtanh.f32 %v3458_v5 }
 0x913   :  { %4933 = vpow2.f32 %v4364_v50 }
 0x914   :  { %4935 = vpow2.f32 %v4367_v61 }
 0x918   :  { %v4924_v13 = vpop.eup %4923 }
 0x919   :  { %v3481_v28 = vadd.f32 1.0, %v4924_v13  ;;  %v4926_v57 = vpop.eup %4925 }
 0x91a   :  { %v4928_v59 = vpop.eup %4927  ;;  %v3482_v0 = vadd.f32 1.0, %v4926_v57 }
 0x91b   :  { %4937 = vrcp.f32 %v3481_v28  ;;  %v3484_v43 = vadd.f32 1.0, %v4928_v59  ;;  %v4930_v60 = vpop.eup %4929 }
 0x91c   :  { %4939 = vtanh.f32 %v3462_v32  ;;  %v3485_v10 = vadd.f32 1.0, %v4930_v60  ;;  %v4932_v16 = vpop.eup %4931 }
 0x91d   :  { %4941 = vrcp.f32 %v3482_v0  ;;  %v4934_v58 = vpop.eup %4933 }
 0x91e   :  { %4943 = vrcp.f32 %v3484_v43  ;;  %v4936_v23 = vpop.eup %4935  ;;  %v3483_v18 = vadd.f32 1.0, %v4934_v58 }
 0x91f   :  { %4945 = vrcp.f32 %v3485_v10  ;;  %v3486_v49 = vadd.f32 1.0, %v4936_v23 }
 0x920   :  { %4947 = vrcp.f32 %v3483_v18 }
 0x921   :  { %4949 = vrcp.f32 %v3486_v49 }
 0x925   :  { %v4938_v31 = vpop.eup %4937 }
 0x926   :  { %v4940_v51 = vpop.eup %4939  ;;  %v3503_v25 = vmul.f32 %v4938_v31, %v4932_v16 }
 0x927   :  { %v4942_v14 = vpop.eup %4941 }
 0x928   :  { %v4944_v6 = vpop.eup %4943  ;;  %v3501_v46 = vmul.f32 %v4942_v14, %v6139_v40 }
 0x929   :  { %v3504_v26 = vmul.f32 %v4944_v6, %v4940_v51  ;;  %v4430_v47 = vpop.f32.mrb[64].mxu0  ;;  %v4946_v42 = vpop.eup %4945 }
 0x92a   :  { %v3505_v30 = vadd.f32 %v3503_v25, %v3501_v46  ;;  %v3636_v22 = vadd.f32 %v4430_v47, %v6166_v9  ;;  %v3627_v52 = vpop.f32.mrb[65].mxu0  ;;  %v3502_v34 = vmul.f32 %v4946_v42, %v6143_v39  ;;  %v4948_v44 = vpop.eup %4947 }
 0x92b   :  { %v3628_v53 = vadd.f32 %v6166_v9, %v3627_v52  ;;  %v4431_v11 = vpop.f32.mrb[66].mxu0  ;;  %v4950_v38 = vpop.eup %4949 }
 0x92c   :  { %4951 = vtanh.f32 %v3505_v30  ;;  %v3639_v55 = vadd.f32 %v4431_v11, %v6166_v9  ;;  %v3630_v63 = vpop.f32.mrb[67].mxu0  ;;  %v3506_v1 = vadd.f32 %v3504_v26, %v3502_v34 }
 0x92d   :  { %4953 = vtanh.f32 %v3636_v22  ;;  %v3631_v40 = vadd.f32 %v6166_v9, %v3630_v63 }
 0x92e   :  { %4955 = vtanh.f32 %v3628_v53 }
 0x92f   :  { %4957 = vtanh.f32 %v3506_v1 }
 0x930   :  { %4959 = vtanh.f32 %v3639_v55 }
 0x931   :  { %4961 = vtanh.f32 %v3631_v40  ;;  %v4434_v2 = vpop.f32.mrb[68].mxu0 }
 0x932   :  { %v3652_v3 = vadd.f32 %v4434_v2, %v6166_v9  ;;  %v3643_v4 = vpop.f32.mrb[69].mxu0 }
 0x933   :  { %v3644_v39 = vadd.f32 %v6166_v9, %v3643_v4  ;;  %v4435_v62 = vpop.f32.mrb[70].mxu0 }
 0x934   :  { %4963 = vtanh.f32 %v3652_v3  ;;  %v3655_v27 = vadd.f32 %v4435_v62, %v6166_v9  ;;  %v3646_v5 = vpop.f32.mrb[71].mxu0 }
 0x935   :  { %v3647_v19 = vadd.f32 %v6166_v9, %v3646_v5 }
 0x936   :  { %v4952_v37 = vpop.eup %4951  ;;  %4965 = vtanh.f32 %v3655_v27 }
 0x937   :  { %v4954_v21 = vpop.eup %4953  ;;  %4967 = vtanh.f32 %v3644_v39  ;;  %v3509_v56 = vmul.f32 %v4952_v37, %v4948_v44  ;;  %v4693_v37 = vld [vmem:[#allocation16 + $0x10] sm:$0xff]  }
 0x938   :  { %v4956_v48 = vpop.eup %4955  ;;  %4969 = vtanh.f32 %v3647_v19  ;;  %v3715_v24 = vmul.f32 %v4954_v21, %v6178_v35  ;;  %v4692_v19 = vld [vmem:[#allocation16 + $0x8] sm:$0xff]   ;;  %v4694_v21 = vld [vmem:[#allocation16 + $0x18] sm:$0xff]  }
 0x939   :  { %v4958_v36 = vpop.eup %4957  ;;  %v4438_v7 = vpop.f32.mrb[72].mxu0  ;;  %v3713_v54 = vmul.f32 %v4956_v48, %v6178_v35  ;;  %v4697_v48 = vld [vmem:[#allocation16 + $0x30] sm:$0xff]  }
 0x93a   :  { %v4960_v32 = vpop.eup %4959  ;;  %3733 = vadd.xlane.f32.xlu1 %v3715_v24  ;;  %v3668_v29 = vadd.f32 %v4438_v7, %v6166_v9  ;;  %v3659_v8 = vpop.f32.mrb[73].mxu0  ;;  %v3510_v50 = vmul.f32 %v4958_v36, %v4950_v38  ;;  %v5269_v38 = vmov 0.0   ;;  %v4698_v24 = vld [vmem:[#allocation16 + $0x38] sm:$0xff]  }
 0x93b   :  { %v4962_v61 = vpop.eup %4961  ;;  %v3660_v13 = vadd.f32 %v6166_v9, %v3659_v8  ;;  %3729 = vadd.xlane.f32.xlu0 %v3713_v54  ;;  %v4439_v28 = vpop.f32.mrb[74].mxu0  ;;  %v3716_v0 = vmul.f32 %v4960_v32, %v6178_v35  ;;  %4444 = vmatprep.subr.bf16.mxu1 %v5269_v38 }
 0x93c   :  { %4971 = vtanh.f32 %v3668_v29  ;;  %v3671_v57 = vadd.f32 %v4439_v28, %v6166_v9  ;;  %v3662_v59 = vpop.f32.mrb[75].mxu0  ;;  %v6186_v43 = vpack.c.bf16 %v3510_v50, %v3509_v56  ;;  %v3714_v10 = vmul.f32 %v4962_v61, %v6178_v35  ;;  %4460 = vmatprep.mubr.msk.bf16.mxu1 %vm5270_vm0, %v5269_v38  ;;  %v4695_v56 = vld [vmem:[#allocation16 + $0x20] sm:$0xff]  }
 0x93d   :  { %v3663_v60 = vadd.f32 %v6166_v9, %v3662_v59 }
 0x93e   :  { %v4964_v16 = vpop.eup %4963  ;;  %4973 = vtanh.f32 %v3671_v57  ;;  %3735 = vadd.xlane.f32.xlu1 %v3716_v0  ;;  %4441 = vmatmul.mubr.bf16.gmra.mrb[76].mxu0 %v6186_v43 }
 0x93f   :  { %4975 = vtanh.f32 %v3660_v13  ;;  %3731 = vadd.xlane.f32.xlu0 %v3714_v10  ;;  %v3719_v58 = vmul.f32 %v4964_v16, %v6178_v35 }
 0x940   :  { %v4966_v23 = vpop.eup %4965  ;;  %4977 = vtanh.f32 %v3663_v60 }
 0x941   :  { %v4968_v31 = vpop.eup %4967  ;;  %v3720_v51 = vmul.f32 %v4966_v23, %v6178_v35 }
 0x942   :  { %v4970_v18 = vpop.eup %4969  ;;  %v3717_v25 = vmul.f32 %v4968_v31, %v6178_v35 }
 0x943   :  { %3741 = vadd.xlane.f32.xlu0 %v3719_v58  ;;  %3743 = vadd.xlane.f32.xlu1 %v3720_v51  ;;  %v3718_v14 = vmul.f32 %v4970_v18, %v6178_v35 }
 0x946   :  { %v4972_v49 = vpop.eup %4971 }
 0x947   :  { %3737 = vadd.xlane.f32.xlu0 %v3717_v25  ;;  %3739 = vadd.xlane.f32.xlu1 %v3718_v14  ;;  %v3723_v6 = vmul.f32 %v4972_v49, %v6178_v35 }
 0x948   :  { %v4974_v46 = vpop.eup %4973 }
 0x949   :  { %v4976_v26 = vpop.eup %4975  ;;  %v3724_v47 = vmul.f32 %v4974_v46, %v6178_v35 }
 0x94a   :  { %v4978_v42 = vpop.eup %4977  ;;  %v3721_v30 = vmul.f32 %v4976_v26, %v6178_v35 }
 0x94b   :  { %3749 = vadd.xlane.f32.xlu0 %v3723_v6  ;;  %3751 = vadd.xlane.f32.xlu1 %v3724_v47  ;;  %v3722_v22 = vmul.f32 %v4978_v42, %v6178_v35 }
 0x94f   :  { %3745 = vadd.xlane.f32.xlu0 %v3721_v30  ;;  %3747 = vadd.xlane.f32.xlu1 %v3722_v22 }
 0x9c7   :  { %v3734_v7 = vpop.xlane.xlu1 %3733 }
 0x9c8   :  { %v3730_v36 = vpop.xlane.xlu0 %3729 }
 0x9cb   :  { %v3736_v32 = vpop.xlane.xlu1 %3735 }
 0x9cc   :  { %v3732_v54 = vpop.xlane.xlu0 %3731 }
 0x9d0   :  { %v3742_v29 = vpop.xlane.xlu0 %3741  ;;  %v3744_v8 = vpop.xlane.xlu1 %3743 }
 0x9d1   :  { %v3762_v60 = vmax.f32 %v3734_v7, %v3742_v29  ;;  %v3769_v58 = vmax.f32 %v3736_v32, %v3744_v8 }
 0x9d4   :  { %v3738_v50 = vpop.xlane.xlu0 %3737  ;;  %v3740_v61 = vpop.xlane.xlu1 %3739 }
 0x9d5   :  { %v3761_v10 = vmax.f32 %v3730_v36, %v3738_v50  ;;  %v3768_v51 = vmax.f32 %v3732_v54, %v3740_v61 }
 0x9d8   :  { %v3750_v13 = vpop.xlane.xlu0 %3749  ;;  %v6207_v28 = vpop.xlane.xlu1 %3751 }
 0x9d9   :  { %v3764_v23 = vmax.f32 %v3762_v60, %v3750_v13  ;;  %v3771_v25 = vmax.f32 %v3769_v58, %v6207_v28 }
 0x9dc   :  { %v3746_v57 = vpop.xlane.xlu0 %3745  ;;  %v3748_v59 = vpop.xlane.xlu1 %3747 }
 0x9dd   :  { %v3763_v31 = vmax.f32 %v3761_v10, %v3746_v57  ;;  %v3770_v6 = vmax.f32 %v3768_v51, %v3748_v59 }
 0xa11   :  { %v4442_v52 = vpop.f32.mrb[76].mxu0 }
 0xa12   :  { %v3684_v34 = vadd.f32 %v4442_v52, %v6166_v9  ;;  %v3675_v53 = vpop.f32.mrb[77].mxu0 }
 0xa13   :  { %v3676_v11 = vadd.f32 %v6166_v9, %v3675_v53  ;;  %v4443_v55 = vpop.f32.mrb[78].mxu0 }
 0xa14   :  { %v3678_v63 = vpop.f32.mrb[79].mxu0  ;;  %v3687_v1 = vadd.f32 %v4443_v55, %v6166_v9 }
 0xa15   :  { %4979 = vtanh.f32 %v3676_v11  ;;  %v3679_v40 = vadd.f32 %v6166_v9, %v3678_v63  ;;  %v4691_v9 = vld [vmem:[#allocation16] sm:$0xff]  }
 0xa16   :  { %4981 = vtanh.f32 %v3684_v34  ;;  %4445 = vmatpush3.bf16.msra.mxu1 %v4691_v9 }
 0xa17   :  { %4983 = vtanh.f32 %v3679_v40  ;;  %4446 = vmatprep.subr.bf16.mxu1 %v5269_v38 }
 0xa18   :  { %4985 = vtanh.f32 %v3687_v1 }
 0xa1a   :  { %4447 = vmatpush3.bf16.msra.mxu1 %v4692_v19 }
 0xa1b   :  { %4448 = vmatprep.subr.bf16.mxu1 %v5269_v38 }
 0xa1e   :  { %4449 = vmatpush3.bf16.msra.mxu1 %v4693_v37 }
 0xa1f   :  { %v4980_v2 = vpop.eup %4979  ;;  %4450 = vmatprep.subr.bf16.mxu1 %v5269_v38 }
 0xa20   :  { %v4982_v3 = vpop.eup %4981  ;;  %v3725_v4 = vmul.f32 %v4980_v2, %v6178_v35 }
 0xa21   :  { %v4984_v39 = vpop.eup %4983  ;;  %v3727_v27 = vmul.f32 %v4982_v3, %v6178_v35 }
 0xa22   :  { %3753 = vadd.xlane.f32.xlu0 %v3725_v4  ;;  %v3726_v62 = vmul.f32 %v4984_v39, %v6178_v35  ;;  %v4986_v44 = vpop.eup %4985  ;;  %4451 = vmatpush3.bf16.msra.mxu1 %v4694_v21 }
 0xa23   :  { %v3728_v5 = vmul.f32 %v4986_v44, %v6178_v35  ;;  %4452 = vmatprep.subr.bf16.mxu1 %v5269_v38  ;;  %v4696_v35 = vld [vmem:[#allocation16 + $0x28] sm:$0xff]  }
 0xa24   :  { %3755 = vadd.xlane.f32.xlu1 %v3726_v62 }
 0xa26   :  { %3757 = vadd.xlane.f32.xlu0 %v3727_v27  ;;  %4453 = vmatpush3.bf16.msra.mxu1 %v4695_v56 }
 0xa27   :  { %4454 = vmatprep.subr.bf16.mxu1 %v5269_v38 }
 0xa28   :  { %3759 = vadd.xlane.f32.xlu1 %v3728_v5 }
 0xa2a   :  { %4455 = vmatpush3.bf16.msra.mxu1 %v4696_v35 }
 0xa2b   :  { %4456 = vmatprep.subr.bf16.mxu1 %v5269_v38 }
 0xa2e   :  { %4457 = vmatpush3.bf16.msra.mxu1 %v4697_v48 }
 0xa2f   :  { %4458 = vmatprep.subr.bf16.mxu1 %v5269_v38 }
 0xa32   :  { %4459 = vmatpush3.bf16.msra.mxu1 %v4698_v24 }
 0xaaf   :  { %v3754_v0 = vpop.xlane.xlu0 %3753 }
 0xab0   :  { %v3765_v14 = vmax.f32 %v3763_v31, %v3754_v0 }
 0xab1   :  { %v6209_v16 = vpop.xlane.xlu1 %3755 }
 0xab2   :  { %v3772_v42 = vmax.f32 %v3770_v6, %v6209_v16 }
 0xab3   :  { %v3758_v18 = vpop.xlane.xlu0 %3757 }
 0xab4   :  { %v3766_v49 = vmax.f32 %v3764_v23, %v3758_v18 }
 0xab5   :  { %v6212_v46 = vpop.xlane.xlu1 %3759 }
 0xab6   :  { %v3767_v26 = vmax.f32 %v3765_v14, %v3766_v49  ;;  %v3773_v47 = vmax.f32 %v3771_v25, %v6212_v46  ;;  %v3845_v25 = vunpack.c.l.bf16 %v6027_v20 }
 0xab8   :  { %v3775_v30 = vsub.f32 %v3730_v36, %v3767_v26  ;;  %v3777_v22 = vsub.f32 %v3734_v7, %v3767_v26  ;;  %v3779_v52 = vsub.f32 %v3738_v50, %v3767_v26  ;;  %v3781_v34 = vsub.f32 %v3742_v29, %v3767_v26 }
 0xab9   :  { %v3783_v53 = vsub.f32 %v3746_v57, %v3767_v26  ;;  %v3785_v11 = vsub.f32 %v3750_v13, %v3767_v26  ;;  %v3774_v40 = vmax.f32 %v3772_v42, %v3773_v47  ;;  %v3787_v2 = vsub.f32 %v3754_v0, %v3767_v26 }
 0xaba   :  { %v3791_v55 = vmul.f32 1.442695, %v3775_v30  ;;  %v3795_v63 = vmul.f32 1.442695, %v3777_v22  ;;  %v3799_v1 = vmul.f32 1.442695, %v3779_v52  ;;  %v3789_v5 = vsub.f32 %v3758_v18, %v3767_v26 }
 0xabb   :  { %v3803_v3 = vmul.f32 1.442695, %v3781_v34  ;;  %v3776_v4 = vsub.f32 %v3732_v54, %v3774_v40  ;;  %v3807_v39 = vmul.f32 1.442695, %v3783_v53  ;;  %v3778_v62 = vsub.f32 %v3736_v32, %v3774_v40 }
 0xabc   :  { %4987 = vpow2.f32 %v3791_v55  ;;  %v3811_v44 = vmul.f32 1.442695, %v3785_v11  ;;  %v3780_v27 = vsub.f32 %v3740_v61, %v3774_v40  ;;  %v3815_v9 = vmul.f32 1.442695, %v3787_v2 }
 0xabd   :  { %4989 = vpow2.f32 %v3795_v63  ;;  %v3782_v38 = vsub.f32 %v3744_v8, %v3774_v40  ;;  %v3793_v19 = vmul.f32 1.442695, %v3776_v4  ;;  %v3797_v37 = vmul.f32 1.442695, %v3778_v62 }
 0xabe   :  { %4991 = vpow2.f32 %v3799_v1  ;;  %v3784_v21 = vsub.f32 %v3748_v59, %v3774_v40  ;;  %v3801_v56 = vmul.f32 1.442695, %v3780_v27  ;;  %v3819_v35 = vmul.f32 1.442695, %v3789_v5 }
 0xabf   :  { %4993 = vpow2.f32 %v3803_v3  ;;  %v3786_v48 = vsub.f32 %v6207_v28, %v3774_v40  ;;  %v3805_v24 = vmul.f32 1.442695, %v3782_v38  ;;  %v3837_v36 = vunpack.c.l.bf16 %v6316_v17 }
 0xac0   :  { %4995 = vpow2.f32 %v3807_v39  ;;  %v3788_v7 = vsub.f32 %v6209_v16, %v3774_v40  ;;  %v3839_v32 = vunpack.c.l.bf16 %v6317_v12  ;;  %v3809_v29 = vmul.f32 1.442695, %v3784_v21 }
 0xac1   :  { %4997 = vpow2.f32 %v3811_v44  ;;  %v3841_v50 = vunpack.c.l.bf16 %v5921_v41  ;;  %v3790_v61 = vsub.f32 %v6212_v46, %v3774_v40  ;;  %v3813_v59 = vmul.f32 1.442695, %v3786_v48 }
 0xac2   :  { %4999 = vpow2.f32 %v3815_v9  ;;  %v3817_v10 = vmul.f32 1.442695, %v3788_v7  ;;  %v3843_v16 = vunpack.c.l.bf16 %v5975_v33  ;;  %v3838_v47 = vunpack.c.h.bf16 %v6316_v17 }
 0xac3   :  { %5001 = vpow2.f32 %v3793_v19  ;;  %v3821_v18 = vmul.f32 1.442695, %v3790_v61  ;;  %v3840_v42 = vunpack.c.h.bf16 %v6317_v12  ;;  %v3847_v30 = vunpack.c.l.bf16 %v6107_v15 }
 0xac4   :  { %5003 = vpow2.f32 %v3797_v37  ;;  %v3849_v55 = vunpack.c.l.bf16 %v6146_v45  ;;  %v3842_v12 = vunpack.c.h.bf16 %v5921_v41  ;;  %v3851_v44 = vunpack.c.l.bf16 %v6186_v43 }
 0xac5   :  { %5005 = vpow2.f32 %v3801_v56  ;;  %v3844_v38 = vunpack.c.h.bf16 %v5975_v33 }
 0xac6   :  { %v4988_v54 = vpop.eup %4987  ;;  %5007 = vpow2.f32 %v3819_v35 }
 0xac7   :  { %v4990_v8 = vpop.eup %4989  ;;  %v3853_v13 = vmul.f32 %v4988_v54, %v3837_v36  ;;  %5009 = vpow2.f32 %v3805_v24  ;;  %v3846_v36 = vunpack.c.h.bf16 %v6027_v20  ;;  %v3852_v20 = vunpack.c.h.bf16 %v6186_v43 }
 0xac8   :  { %v4992_v28 = vpop.eup %4991  ;;  %v3823_v57 = vadd.f32 %v4990_v8, %v4988_v54  ;;  %v3855_v0 = vmul.f32 %v4990_v8, %v3839_v32  ;;  %5011 = vpow2.f32 %v3809_v29  ;;  %v3848_v8 = vunpack.c.h.bf16 %v6107_v15 }
 0xac9   :  { %v4994_v60 = vpop.eup %4993  ;;  %v3857_v23 = vmul.f32 %v4992_v28, %v3841_v50  ;;  %5013 = vpow2.f32 %v3813_v59  ;;  %v3850_v59 = vunpack.c.h.bf16 %v6146_v45  ;;  %v4378_v45 = vld [vmem:[#allocation18] ss:$0 sm:$0xff] }
 0xaca   :  { %v3824_v58 = vadd.f32 %v4992_v28, %v3823_v57  ;;  %v3869_v31 = vadd.f32 %v3855_v0, %v3853_v13  ;;  %v4996_v51 = vpop.eup %4995  ;;  %v3859_v6 = vmul.f32 %v4994_v60, %v3843_v16  ;;  %5015 = vpow2.f32 %v3817_v10 }
 0xacb   :  { %v4998_v14 = vpop.eup %4997  ;;  %v3861_v34 = vmul.f32 %v4996_v51, %v3845_v25  ;;  %5017 = vpow2.f32 %v3821_v18 }
 0xacc   :  { %v3825_v49 = vadd.f32 %v4994_v60, %v3824_v58  ;;  %v3870_v46 = vadd.f32 %v3869_v31, %v3857_v23  ;;  %v5000_v26 = vpop.eup %4999  ;;  %v3863_v1 = vmul.f32 %v4998_v14, %v3847_v30 }
 0xacd   :  { %v5002_v22 = vpop.eup %5001  ;;  %v3865_v5 = vmul.f32 %v5000_v26, %v3849_v55 }
 0xace   :  { %v3826_v52 = vadd.f32 %v4996_v51, %v3825_v49  ;;  %v3871_v53 = vadd.f32 %v3870_v46, %v3859_v6  ;;  %v5004_v11 = vpop.eup %5003  ;;  %v3854_v63 = vmul.f32 %v5002_v22, %v3838_v47 }
 0xacf   :  { %v5006_v40 = vpop.eup %5005  ;;  %v3830_v3 = vadd.f32 %v5004_v11, %v5002_v22  ;;  %v3856_v4 = vmul.f32 %v5004_v11, %v3840_v42 }
 0xad0   :  { %v3827_v2 = vadd.f32 %v4998_v14, %v3826_v52  ;;  %v3872_v17 = vadd.f32 %v3871_v53, %v3861_v34  ;;  %v5008_v39 = vpop.eup %5007  ;;  %v3858_v19 = vmul.f32 %v5006_v40, %v3842_v12 }
 0xad1   :  { %v5010_v62 = vpop.eup %5009  ;;  %v3831_v27 = vadd.f32 %v5006_v40, %v3830_v3  ;;  %v3876_v37 = vadd.f32 %v3856_v4, %v3854_v63  ;;  %v3867_v35 = vmul.f32 %v5008_v39, %v3851_v44 }
 0xad2   :  { %v3873_v9 = vadd.f32 %v3872_v17, %v3863_v1  ;;  %v5012_v21 = vpop.eup %5011  ;;  %v3828_v56 = vadd.f32 %v5000_v26, %v3827_v2  ;;  %v3860_v7 = vmul.f32 %v5010_v62, %v3844_v38 }
 0xad3   :  { %v3832_v48 = vadd.f32 %v5010_v62, %v3831_v27  ;;  %v3877_v54 = vadd.f32 %v3876_v37, %v3858_v19  ;;  %v5014_v41 = vpop.eup %5013  ;;  %v3862_v50 = vmul.f32 %v5012_v21, %v3846_v36 }
 0xad4   :  { %v3874_v24 = vadd.f32 %v3873_v9, %v3865_v5  ;;  %v5016_v13 = vpop.eup %5015  ;;  %v3829_v33 = vadd.f32 %v5008_v39, %v3828_v56  ;;  %v3864_v0 = vmul.f32 %v5014_v41, %v3848_v8 }
 0xad5   :  { %v3833_v32 = vadd.f32 %v5012_v21, %v3832_v48  ;;  %v3878_v61 = vadd.f32 %v3877_v54, %v3860_v7  ;;  %v5018_v57 = vpop.eup %5017  ;;  %v3866_v16 = vmul.f32 %v5016_v13, %v3850_v59 }
 0xad6   :  { %v3875_v29 = vadd.f32 %v3874_v24, %v3867_v35  ;;  %5019 = vrcp.f32 %v3829_v33  ;;  %v3868_v31 = vmul.f32 %v5018_v57, %v3852_v20 }
 0xad7   :  { %v3834_v28 = vadd.f32 %v5014_v41, %v3833_v32  ;;  %v3879_v60 = vadd.f32 %v3878_v61, %v3862_v50 }
 0xad9   :  { %v3835_v10 = vadd.f32 %v5016_v13, %v3834_v28  ;;  %v3880_v58 = vadd.f32 %v3879_v60, %v3864_v0 }
 0xadb   :  { %v3836_v23 = vadd.f32 %v5018_v57, %v3835_v10  ;;  %v3881_v51 = vadd.f32 %v3880_v58, %v3866_v16 }
 0xadd   :  { %5021 = vrcp.f32 %v3836_v23  ;;  %v3882_v15 = vadd.f32 %v3881_v51, %v3868_v31 }
 0xae0   :  { %v5020_v18 = vpop.eup %5019 }
 0xae1   :  { %v3885_v14 = vmul.f32 %v5020_v18, %v3875_v29 }
 0xae7   :  { %v5022_v25 = vpop.eup %5021 }
 0xae8   :  { %v3886_v49 = vmul.f32 %v5022_v25, %v3882_v15 }
 0xaea   :  { %v3887_v6 = vpack.c.bf16 %v3886_v49, %v3885_v14 }
 0xaec   :  { %4461 = vmatmul.mubr.bf16.vlgmr.msra.gmra.mrb[64].mxu1 %v3887_v6 }
 0xbbf   :  { %v3993_v46 = vpop.f32.mrb[64].mxu1 }
 0xbc0   :  { %v3994_v43 = vadd.f32 %v4378_v45, %v3993_v46  ;;  %v4462_v26 = vpop.f32.mrb[65].mxu1 }
 0xbc1   :  { %v3996_v47 = vpop.f32.mrb[66].mxu1 }
 0xbc2   :  { %4001 = vst.msk [vmem:[#allocation19] sm:$0xff] %vm4000_vm1, %v3994_v43  ;;  %v3997_v42 = vadd.f32 %v4378_v45, %v3996_v47  ;;  %v4463_v30 = vpop.f32.mrb[67].mxu1 }
 0xbc4   :  { %4002 = vst.msk [vmem:[#allocation19 + $0x8] sm:$0xff] %vm4000_vm1, %v3997_v42 }
 0xbc5   :  { %5232 = shalt.err (!%p5229_p6)
}
 0xbc6   :  { %s5233_s12 = scalar_lea.hbm %s6256_s9, 256 }
 0xbc7   :  { %p5234_p7 = scmp.ne.s32.totalorder %s6256_s9, %s5233_s12  ;;  %p5237_p8 = scmp.lt.u32.totalorder %s5233_s12, %s6256_s9 }
 0xbc9   :  { %p5239_p9 = pnand %p5237_p8, %p5234_p7 }
 0xbcb   :  { %5242 = shalt.err (!%p5239_p9)
}
 0xbcc   :  { %s5272_s16 = smov 128   ;;  %s5273_s5 = smov 8  }
 0xbcd   :  { %4014 = dma.vmem_to_hbm [thread:$0]  %s4009_s29, 256, %s6256_s9, [#allocation6], %s5272_s16, %s5272_s16, %s5273_s5  }
 0xbce   :  { %5253 = dma.done.wait [#allocation6], 256  }
 0xbcf   :  { %5254 = vsyncadd [#allocation6], 4294967040 }
 0xbd0   :  { %4018 = vsyncpa [#allocation5], 1 }
 0xbd1   :  { %4019 = vsyncpa [#allocation8], 1 }
 0xbd2   :  { %4020 = vsyncpa [#allocation11], 1 }
 0xbd3   :  { %4021 = vsyncpa [#allocation14], 1 }
 0xbd4   :  { %4022 = vsyncpa [#allocation17], 1 }
 0xbd5   :  { %4023 = vsyncpa [#allocation6], 1 }

</bundles_post_ra>
